<compile_context>
chip_gen: v5e
topology: v5e:2x2
jax: 0.10.0
libtpu: 0.0.40
codegen_flags: <defaults>
</compile_context>

<pallas_src>
import functools
import math

import jax
import jax.numpy as jnp
from jax.experimental import pallas as pl
from jax.experimental.pallas import tpu as pltpu

_BN_EPS = 1e-5
_NTAPS = 9  # 3x3 kernel taps


# -----------------------------------------------------------------------------
# In-kernel helpers
# -----------------------------------------------------------------------------
def _conv_bn_relu(taps_ref, w_ref, b_ref, bng_ref, bnb_ref):
    """3x3 conv (9 accumulated tap matmuls) + bias + BN(batch stats) + ReLU.

    taps_ref: (9, M, Cin)   w_ref: (9, Cin, Cout)   b/bng/bnb: (1, Cout)
    Returns the (M, Cout) activation as an f32 value (stays in vregs/VMEM).
    """
    z = jnp.dot(taps_ref[0], w_ref[0], preferred_element_type=jnp.float32)
    for t in range(1, _NTAPS):
        z = z + jnp.dot(taps_ref[t], w_ref[t], preferred_element_type=jnp.float32)
    z = z + b_ref[...]
    # BatchNorm2d training-mode statistics over all (N, H, W) rows of the block.
    mean = jnp.mean(z, axis=0, keepdims=True)
    var = jnp.mean(jnp.square(z - mean), axis=0, keepdims=True)
    scale = bng_ref[...] * jax.lax.rsqrt(var + _BN_EPS)
    shift = bnb_ref[...] - mean * scale
    return jnp.maximum(z * scale + shift, 0.0)


# -----------------------------------------------------------------------------
# Pallas kernels
# -----------------------------------------------------------------------------
def _pre_attention_kernel(taps_ref, w_ref, b_ref, bng_ref, bnb_ref,
                          pos_ref, wqkv_ref, bqkv_ref, gamma_ref, o_ref,
                          *, batch):
    # pre_conv + BN + ReLU + positional add (all fused, VMEM-resident)
    y = _conv_bn_relu(taps_ref, w_ref, b_ref, bng_ref, bnb_ref) + pos_ref[...]

    # Fused Q/K/V projection: one matmul against the concatenated weight.
    qkv = (jnp.dot(y, wqkv_ref[...], preferred_element_type=jnp.float32)
           + bqkv_ref[...])
    c = y.shape[1]
    cr = (qkv.shape[1] - c) // 2
    q = qkv[:, :cr]
    k = qkv[:, cr:2 * cr]
    v = qkv[:, 2 * cr:]

    g = gamma_ref[0, 0]                    # SMEM scalar (residual gain)
    n = y.shape[0] // batch                # tokens per image (H*W)

    # Per-batch attention + fused residual epilogue (batch is small & static).
    for bi in range(batch):
        lo = bi * n
        hi = lo + n
        # energy[i, j] = q_i . k_j   (no 1/sqrt(d) scale, per the reference)
        s = jax.lax.dot_general(q[lo:hi], k[lo:hi], (((1,), (1,)), ((), ())),
                                preferred_element_type=jnp.float32)
        s = s - jnp.max(s, axis=-1, keepdims=True)
        p = jnp.exp(s)
        p = p * pl.reciprocal(jnp.sum(p, axis=-1, keepdims=True), approx=True)
        attn_out = jnp.dot(p, v[lo:hi], preferred_element_type=jnp.float32)
        o_ref[lo:hi, :] = g * attn_out + y[lo:hi]


def _final_conv_kernel(taps_ref, w_ref, b_ref, bng_ref, bnb_ref, o_ref):
    o_ref[...] = _conv_bn_relu(taps_ref, w_ref, b_ref, bng_ref, bnb_ref)


# -----------------------------------------------------------------------------
# XLA-side layout glue (tiny: pads, shifted slices, reshapes only)
# -----------------------------------------------------------------------------
def _extract_taps(x_nhwc, stride):
    """3x3 / pad=1 neighborhood taps: (B,H,W,C) -> (9, B*Ho*Wo, C)."""
    b, h, w, c = x_nhwc.shape
    ho = (h + 2 - 3) // stride + 1
    wo = (w + 2 - 3) // stride + 1
    xp = jnp.pad(x_nhwc, ((0, 0), (1, 1), (1, 1), (0, 0)))
    taps = []
    for dy in range(3):
        for dx in range(3):
            t = xp[:, dy:dy + stride * (ho - 1) + 1:stride,
                      dx:dx + stride * (wo - 1) + 1:stride, :]
            taps.append(t.reshape(b * ho * wo, c))
    return jnp.stack(taps, axis=0), ho, wo


def _conv_weight_taps(w):
    """(Cout, Cin, 3, 3) -> (9, Cin, Cout) matching _extract_taps ordering."""
    cout, cin = w.shape[0], w.shape[1]
    return jnp.transpose(w, (2, 3, 1, 0)).reshape(_NTAPS, cin, cout)


# -----------------------------------------------------------------------------
# Forward pass (NCHW in / NCHW out, like the PyTorch module)
# -----------------------------------------------------------------------------
def attention_layer_forward(x_nchw, p, pos_nchw=None, *, stride=1):
    x = jnp.transpose(x_nchw, (0, 2, 3, 1)).astype(jnp.float32)   # NHWC
    bsz, h, w, cin = x.shape
    cout = p["pre_w"].shape[0]
    cr = p["q_w"].shape[0]

    # pre_conv taps + weights
    taps_pre, ho, wo = _extract_taps(x, stride)                   # (9, M, Cin)
    m = bsz * ho * wo
    w_pre = _conv_weight_taps(p["pre_w"])
    b_pre = p["pre_b"].reshape(1, cout)

    # positional embedding, broadcast + flattened to (M, Cout); zeros if None
    if pos_nchw is None:
        pos_flat = jnp.zeros((m, cout), jnp.float32)
    else:
        pos_nhwc = jnp.transpose(pos_nchw, (0, 2, 3, 1)).astype(jnp.float32)
        pos_flat = jnp.broadcast_to(pos_nhwc, (bsz, ho, wo, cout)).reshape(m, cout)

    # fused Q/K/V projection weights:  y @ W_qkv + b_qkv,  W_qkv: (C, 2*Cr + C)
    w_qkv = jnp.concatenate(
        [p["q_w"].reshape(cr, cout).T,
         p["k_w"].reshape(cr, cout).T,
         p["v_w"].reshape(cout, cout).T], axis=1)
    b_qkv = jnp.concatenate([p["q_b"], p["k_b"], p["v_b"]]).reshape(1, 2 * cr + cout)

    # ---- kernel 1: pre_conv + BN + ReLU + pos + QKV + attention + residual ----
    feat = pl.pallas_call(
        functools.partial(_pre_attention_kernel, batch=bsz),
        out_shape=jax.ShapeDtypeStruct((m, cout), jnp.float32),
        grid=(1,),
        in_specs=[
            pl.BlockSpec((_NTAPS, m, cin), lambda i: (0, 0, 0)),
            pl.BlockSpec((_NTAPS, cin, cout), lambda i: (0, 0, 0)),
            pl.BlockSpec((1, cout), lambda i: (0, 0)),
            pl.BlockSpec((1, cout), lambda i: (0, 0)),
            pl.BlockSpec((1, cout), lambda i: (0, 0)),
            pl.BlockSpec((m, cout), lambda i: (0, 0)),
            pl.BlockSpec((cout, 2 * cr + cout), lambda i: (0, 0)),
            pl.BlockSpec((1, 2 * cr + cout), lambda i: (0, 0)),
            pl.BlockSpec(memory_space=pltpu.MemorySpace.SMEM),    # gamma (1,1)
        ],
        out_specs=pl.BlockSpec((m, cout), lambda i: (0, 0)),
        compiler_params=pltpu.CompilerParams(dimension_semantics=("arbitrary",)),
    )(taps_pre, w_pre, b_pre,
      p["pre_bn_g"].reshape(1, cout), p["pre_bn_b"].reshape(1, cout),
      pos_flat, w_qkv, b_qkv, p["gamma"].reshape(1, 1))

    # ---- kernel 2: final_conv 3x3 (stride=1) + BN + ReLU ----
    taps_fin, _, _ = _extract_taps(feat.reshape(bsz, ho, wo, cout), 1)
    w_fin = _conv_weight_taps(p["final_w"])
    out = pl.pallas_call(
        _final_conv_kernel,
        out_shape=jax.ShapeDtypeStruct((m, cout), jnp.float32),
        grid=(1,),
        in_specs=[
            pl.BlockSpec((_NTAPS, m, cout), lambda i: (0, 0, 0)),
            pl.BlockSpec((_NTAPS, cout, cout), lambda i: (0, 0, 0)),
            pl.BlockSpec((1, cout), lambda i: (0, 0)),
            pl.BlockSpec((1, cout), lambda i: (0, 0)),
            pl.BlockSpec((1, cout), lambda i: (0, 0)),
        ],
        out_specs=pl.BlockSpec((m, cout), lambda i: (0, 0)),
        compiler_params=pltpu.CompilerParams(dimension_semantics=("arbitrary",)),
    )(taps_fin, w_fin, p["final_b"].reshape(1, cout),
      p["final_bn_g"].reshape(1, cout), p["final_bn_b"].reshape(1, cout))

    return jnp.transpose(out.reshape(bsz, ho, wo, cout), (0, 3, 1, 2))  # NCHW


# -----------------------------------------------------------------------------
# Deterministic parameter init (mirrors nn.Conv2d / nn.BatchNorm2d defaults)
# -----------------------------------------------------------------------------
def _init_conv(key, cin, cout, ksize):
    k1, k2 = jax.random.split(key)
    fan_in = cin * ksize * ksize
    bound = 1.0 / math.sqrt(fan_in)
    w = jax.random.uniform(k1, (cout, cin, ksize, ksize), jnp.float32, -bound, bound)
    b = jax.random.uniform(k2, (cout,), jnp.float32, -bound, bound)
    return w, b


def init_attention_layer_params(key, in_dim, out_dim, ratio):
    ks = jax.random.split(key, 5)
    pre_w, pre_b = _init_conv(ks[0], in_dim, out_dim, 3)
    q_w, q_b = _init_conv(ks[1], out_dim, out_dim // ratio, 1)
    k_w, k_b = _init_conv(ks[2], out_dim, out_dim // ratio, 1)
    v_w, v_b = _init_conv(ks[3], out_dim, out_dim, 1)
    fin_w, fin_b = _init_conv(ks[4], out_dim, out_dim, 3)
    return {
        "pre_w": pre_w, "pre_b": pre_b,
        "pre_bn_g": jnp.ones((out_dim,), jnp.float32),
        "pre_bn_b": jnp.zeros((out_dim,), jnp.float32),
        "q_w": q_w, "q_b": q_b,
        "k_w": k_w, "k_b": k_b,
        "v_w": v_w, "v_b": v_b,
        "final_w": fin_w, "final_b": fin_b,
        "final_bn_g": jnp.ones((out_dim,), jnp.float32),
        "final_bn_b": jnp.zeros((out_dim,), jnp.float32),
        "gamma": jnp.zeros((1,), jnp.float32),   # torch init: zeros(1)
    }


# -----------------------------------------------------------------------------
if __name__ == "__main__":
    key = jax.random.PRNGKey(0)
    k_x, k_p = jax.random.split(key)

    in_dim, out_dim, ratio, stride = 4, 32, 4, 2
    params = init_attention_layer_params(k_p, in_dim, out_dim, ratio)
    x = jax.random.normal(k_x, (2, in_dim, 16, 16), jnp.float32)   # NCHW

    fwd = jax.jit(functools.partial(attention_layer_forward, stride=stride))
    out = fwd(x, params, None)            # pos=None, as in the PyTorch default
    out = jax.block_until_ready(out)

    assert out.shape == (2, out_dim, 8, 8), out.shape
    assert bool(jnp.all(jnp.isfinite(out)))
    print("KERNEL_OK")
</pallas_src>

<mosaic_0001>
module attributes {stable_mosaic.version = 11 : i64} {
  func.func @_pre_attention_kernel(%arg0: i32, %arg1: memref<9x128x4xf32, #tpu.memory_space<vmem>>, %arg2: memref<9x4x32xf32, #tpu.memory_space<vmem>>, %arg3: memref<1x32xf32, #tpu.memory_space<vmem>>, %arg4: memref<1x32xf32, #tpu.memory_space<vmem>>, %arg5: memref<1x32xf32, #tpu.memory_space<vmem>>, %arg6: memref<128x32xf32, #tpu.memory_space<vmem>>, %arg7: memref<32x48xf32, #tpu.memory_space<vmem>>, %arg8: memref<1x48xf32, #tpu.memory_space<vmem>>, %arg9: memref<1x1xf32, #tpu.memory_space<smem>>, %arg10: memref<128x32xf32, #tpu.memory_space<vmem>>) attributes {dimension_semantics = [#tpu.dimension_semantics<arbitrary>], iteration_bounds = array<i64: 1>, scalar_prefetch = 0 : i64, scratch_operands = 0 : i64, tpu.core_type = #tpu.core_type<tc>, window_params = [{pipeline_mode = #tpu.pipeline_mode<synchronous>, transform_indices = @transform_0, window_bounds = array<i64: 9, 128, 4>}, {pipeline_mode = #tpu.pipeline_mode<synchronous>, transform_indices = @transform_1, window_bounds = array<i64: 9, 4, 32>}, {pipeline_mode = #tpu.pipeline_mode<synchronous>, transform_indices = @transform_2, window_bounds = array<i64: 1, 32>}, {pipeline_mode = #tpu.pipeline_mode<synchronous>, transform_indices = @transform_3, window_bounds = array<i64: 1, 32>}, {pipeline_mode = #tpu.pipeline_mode<synchronous>, transform_indices = @transform_4, window_bounds = array<i64: 1, 32>}, {pipeline_mode = #tpu.pipeline_mode<synchronous>, transform_indices = @transform_5, window_bounds = array<i64: 128, 32>}, {pipeline_mode = #tpu.pipeline_mode<synchronous>, transform_indices = @transform_6, window_bounds = array<i64: 32, 48>}, {pipeline_mode = #tpu.pipeline_mode<synchronous>, transform_indices = @transform_7, window_bounds = array<i64: 1, 48>}, {transform_indices = @transform_8, window_bounds = array<i64: 1, 1>}, {pipeline_mode = #tpu.pipeline_mode<synchronous>, transform_indices = @transform_9, window_bounds = array<i64: 128, 32>}]} {
    %c0 = arith.constant 0 : index
    %c0_0 = arith.constant 0 : index
    %c0_1 = arith.constant 0 : index
    %0 = vector.load %arg1[%c0, %c0_0, %c0_1] : memref<9x128x4xf32, #tpu.memory_space<vmem>>, vector<1x128x4xf32>
    %1 = vector.shape_cast %0 : vector<1x128x4xf32> to vector<128x4xf32>
    %c0_2 = arith.constant 0 : index
    %c0_3 = arith.constant 0 : index
    %c0_4 = arith.constant 0 : index
    %2 = vector.load %arg2[%c0_2, %c0_3, %c0_4] : memref<9x4x32xf32, #tpu.memory_space<vmem>>, vector<1x4x32xf32>
    %3 = vector.shape_cast %2 : vector<1x4x32xf32> to vector<4x32xf32>
    %cst = arith.constant dense<0.000000e+00> : vector<128x32xf32>
    %4 = tpu.matmul %1, %3, %cst {dimension_numbers = #tpu.dot_dimension_numbers<[1], [0], [0], [1], [0, 0, 1, 1], [], []>} : vector<128x4xf32>, vector<4x32xf32>, vector<128x32xf32> -> vector<128x32xf32>
    %c1 = arith.constant 1 : index
    %c0_5 = arith.constant 0 : index
    %c0_6 = arith.constant 0 : index
    %5 = vector.load %arg1[%c1, %c0_5, %c0_6] : memref<9x128x4xf32, #tpu.memory_space<vmem>>, vector<1x128x4xf32>
    %6 = vector.shape_cast %5 : vector<1x128x4xf32> to vector<128x4xf32>
    %c1_7 = arith.constant 1 : index
    %c0_8 = arith.constant 0 : index
    %c0_9 = arith.constant 0 : index
    %7 = vector.load %arg2[%c1_7, %c0_8, %c0_9] : memref<9x4x32xf32, #tpu.memory_space<vmem>>, vector<1x4x32xf32>
    %8 = vector.shape_cast %7 : vector<1x4x32xf32> to vector<4x32xf32>
    %cst_10 = arith.constant dense<0.000000e+00> : vector<128x32xf32>
    %9 = tpu.matmul %6, %8, %cst_10 {dimension_numbers = #tpu.dot_dimension_numbers<[1], [0], [0], [1], [0, 0, 1, 1], [], []>} : vector<128x4xf32>, vector<4x32xf32>, vector<128x32xf32> -> vector<128x32xf32>
    %10 = arith.addf %4, %9 : vector<128x32xf32>
    %c2 = arith.constant 2 : index
    %c0_11 = arith.constant 0 : index
    %c0_12 = arith.constant 0 : index
    %11 = vector.load %arg1[%c2, %c0_11, %c0_12] : memref<9x128x4xf32, #tpu.memory_space<vmem>>, vector<1x128x4xf32>
    %12 = vector.shape_cast %11 : vector<1x128x4xf32> to vector<128x4xf32>
    %c2_13 = arith.constant 2 : index
    %c0_14 = arith.constant 0 : index
    %c0_15 = arith.constant 0 : index
    %13 = vector.load %arg2[%c2_13, %c0_14, %c0_15] : memref<9x4x32xf32, #tpu.memory_space<vmem>>, vector<1x4x32xf32>
    %14 = vector.shape_cast %13 : vector<1x4x32xf32> to vector<4x32xf32>
    %cst_16 = arith.constant dense<0.000000e+00> : vector<128x32xf32>
    %15 = tpu.matmul %12, %14, %cst_16 {dimension_numbers = #tpu.dot_dimension_numbers<[1], [0], [0], [1], [0, 0, 1, 1], [], []>} : vector<128x4xf32>, vector<4x32xf32>, vector<128x32xf32> -> vector<128x32xf32>
    %16 = arith.addf %10, %15 : vector<128x32xf32>
    %c3 = arith.constant 3 : index
    %c0_17 = arith.constant 0 : index
    %c0_18 = arith.constant 0 : index
    %17 = vector.load %arg1[%c3, %c0_17, %c0_18] : memref<9x128x4xf32, #tpu.memory_space<vmem>>, vector<1x128x4xf32>
    %18 = vector.shape_cast %17 : vector<1x128x4xf32> to vector<128x4xf32>
    %c3_19 = arith.constant 3 : index
    %c0_20 = arith.constant 0 : index
    %c0_21 = arith.constant 0 : index
    %19 = vector.load %arg2[%c3_19, %c0_20, %c0_21] : memref<9x4x32xf32, #tpu.memory_space<vmem>>, vector<1x4x32xf32>
    %20 = vector.shape_cast %19 : vector<1x4x32xf32> to vector<4x32xf32>
    %cst_22 = arith.constant dense<0.000000e+00> : vector<128x32xf32>
    %21 = tpu.matmul %18, %20, %cst_22 {dimension_numbers = #tpu.dot_dimension_numbers<[1], [0], [0], [1], [0, 0, 1, 1], [], []>} : vector<128x4xf32>, vector<4x32xf32>, vector<128x32xf32> -> vector<128x32xf32>
    %22 = arith.addf %16, %21 : vector<128x32xf32>
    %c4 = arith.constant 4 : index
    %c0_23 = arith.constant 0 : index
    %c0_24 = arith.constant 0 : index
    %23 = vector.load %arg1[%c4, %c0_23, %c0_24] : memref<9x128x4xf32, #tpu.memory_space<vmem>>, vector<1x128x4xf32>
    %24 = vector.shape_cast %23 : vector<1x128x4xf32> to vector<128x4xf32>
    %c4_25 = arith.constant 4 : index
    %c0_26 = arith.constant 0 : index
    %c0_27 = arith.constant 0 : index
    %25 = vector.load %arg2[%c4_25, %c0_26, %c0_27] : memref<9x4x32xf32, #tpu.memory_space<vmem>>, vector<1x4x32xf32>
    %26 = vector.shape_cast %25 : vector<1x4x32xf32> to vector<4x32xf32>
    %cst_28 = arith.constant dense<0.000000e+00> : vector<128x32xf32>
    %27 = tpu.matmul %24, %26, %cst_28 {dimension_numbers = #tpu.dot_dimension_numbers<[1], [0], [0], [1], [0, 0, 1, 1], [], []>} : vector<128x4xf32>, vector<4x32xf32>, vector<128x32xf32> -> vector<128x32xf32>
    %28 = arith.addf %22, %27 : vector<128x32xf32>
    %c5 = arith.constant 5 : index
    %c0_29 = arith.constant 0 : index
    %c0_30 = arith.constant 0 : index
    %29 = vector.load %arg1[%c5, %c0_29, %c0_30] : memref<9x128x4xf32, #tpu.memory_space<vmem>>, vector<1x128x4xf32>
    %30 = vector.shape_cast %29 : vector<1x128x4xf32> to vector<128x4xf32>
    %c5_31 = arith.constant 5 : index
    %c0_32 = arith.constant 0 : index
    %c0_33 = arith.constant 0 : index
    %31 = vector.load %arg2[%c5_31, %c0_32, %c0_33] : memref<9x4x32xf32, #tpu.memory_space<vmem>>, vector<1x4x32xf32>
    %32 = vector.shape_cast %31 : vector<1x4x32xf32> to vector<4x32xf32>
    %cst_34 = arith.constant dense<0.000000e+00> : vector<128x32xf32>
    %33 = tpu.matmul %30, %32, %cst_34 {dimension_numbers = #tpu.dot_dimension_numbers<[1], [0], [0], [1], [0, 0, 1, 1], [], []>} : vector<128x4xf32>, vector<4x32xf32>, vector<128x32xf32> -> vector<128x32xf32>
    %34 = arith.addf %28, %33 : vector<128x32xf32>
    %c6 = arith.constant 6 : index
    %c0_35 = arith.constant 0 : index
    %c0_36 = arith.constant 0 : index
    %35 = vector.load %arg1[%c6, %c0_35, %c0_36] : memref<9x128x4xf32, #tpu.memory_space<vmem>>, vector<1x128x4xf32>
    %36 = vector.shape_cast %35 : vector<1x128x4xf32> to vector<128x4xf32>
    %c6_37 = arith.constant 6 : index
    %c0_38 = arith.constant 0 : index
    %c0_39 = arith.constant 0 : index
    %37 = vector.load %arg2[%c6_37, %c0_38, %c0_39] : memref<9x4x32xf32, #tpu.memory_space<vmem>>, vector<1x4x32xf32>
    %38 = vector.shape_cast %37 : vector<1x4x32xf32> to vector<4x32xf32>
    %cst_40 = arith.constant dense<0.000000e+00> : vector<128x32xf32>
    %39 = tpu.matmul %36, %38, %cst_40 {dimension_numbers = #tpu.dot_dimension_numbers<[1], [0], [0], [1], [0, 0, 1, 1], [], []>} : vector<128x4xf32>, vector<4x32xf32>, vector<128x32xf32> -> vector<128x32xf32>
    %40 = arith.addf %34, %39 : vector<128x32xf32>
    %c7 = arith.constant 7 : index
    %c0_41 = arith.constant 0 : index
    %c0_42 = arith.constant 0 : index
    %41 = vector.load %arg1[%c7, %c0_41, %c0_42] : memref<9x128x4xf32, #tpu.memory_space<vmem>>, vector<1x128x4xf32>
    %42 = vector.shape_cast %41 : vector<1x128x4xf32> to vector<128x4xf32>
    %c7_43 = arith.constant 7 : index
    %c0_44 = arith.constant 0 : index
    %c0_45 = arith.constant 0 : index
    %43 = vector.load %arg2[%c7_43, %c0_44, %c0_45] : memref<9x4x32xf32, #tpu.memory_space<vmem>>, vector<1x4x32xf32>
    %44 = vector.shape_cast %43 : vector<1x4x32xf32> to vector<4x32xf32>
    %cst_46 = arith.constant dense<0.000000e+00> : vector<128x32xf32>
    %45 = tpu.matmul %42, %44, %cst_46 {dimension_numbers = #tpu.dot_dimension_numbers<[1], [0], [0], [1], [0, 0, 1, 1], [], []>} : vector<128x4xf32>, vector<4x32xf32>, vector<128x32xf32> -> vector<128x32xf32>
    %46 = arith.addf %40, %45 : vector<128x32xf32>
    %c8 = arith.constant 8 : index
    %c0_47 = arith.constant 0 : index
    %c0_48 = arith.constant 0 : index
    %47 = vector.load %arg1[%c8, %c0_47, %c0_48] : memref<9x128x4xf32, #tpu.memory_space<vmem>>, vector<1x128x4xf32>
    %48 = vector.shape_cast %47 : vector<1x128x4xf32> to vector<128x4xf32>
    %c8_49 = arith.constant 8 : index
    %c0_50 = arith.constant 0 : index
    %c0_51 = arith.constant 0 : index
    %49 = vector.load %arg2[%c8_49, %c0_50, %c0_51] : memref<9x4x32xf32, #tpu.memory_space<vmem>>, vector<1x4x32xf32>
    %50 = vector.shape_cast %49 : vector<1x4x32xf32> to vector<4x32xf32>
    %cst_52 = arith.constant dense<0.000000e+00> : vector<128x32xf32>
    %51 = tpu.matmul %48, %50, %cst_52 {dimension_numbers = #tpu.dot_dimension_numbers<[1], [0], [0], [1], [0, 0, 1, 1], [], []>} : vector<128x4xf32>, vector<4x32xf32>, vector<128x32xf32> -> vector<128x32xf32>
    %52 = arith.addf %46, %51 : vector<128x32xf32>
    %c0_53 = arith.constant 0 : index
    %c0_54 = arith.constant 0 : index
    %53 = vector.load %arg3[%c0_53, %c0_54] : memref<1x32xf32, #tpu.memory_space<vmem>>, vector<1x32xf32>
    %54 = vector.broadcast %53 : vector<1x32xf32> to vector<128x32xf32>
    %55 = arith.addf %52, %54 : vector<128x32xf32>
    %cst_55 = arith.constant dense<0.000000e+00> : vector<32xf32>
    %56 = vector.multi_reduction <add>, %55, %cst_55 [0] : vector<128x32xf32> to vector<32xf32>
    %57 = vector.shape_cast %56 : vector<32xf32> to vector<1x32xf32>
    %cst_56 = arith.constant 1.280000e+02 : f32
    %58 = vector.broadcast %cst_56 : f32 to vector<1x32xf32>
    %59 = arith.divf %57, %58 : vector<1x32xf32>
    %60 = vector.broadcast %59 : vector<1x32xf32> to vector<128x32xf32>
    %61 = arith.subf %55, %60 : vector<128x32xf32>
    %62 = arith.mulf %61, %61 : vector<128x32xf32>
    %cst_57 = arith.constant dense<0.000000e+00> : vector<32xf32>
    %63 = vector.multi_reduction <add>, %62, %cst_57 [0] : vector<128x32xf32> to vector<32xf32>
    %64 = vector.shape_cast %63 : vector<32xf32> to vector<1x32xf32>
    %cst_58 = arith.constant 1.280000e+02 : f32
    %65 = vector.broadcast %cst_58 : f32 to vector<1x32xf32>
    %66 = arith.divf %64, %65 : vector<1x32xf32>
    %c0_59 = arith.constant 0 : index
    %c0_60 = arith.constant 0 : index
    %67 = vector.load %arg4[%c0_59, %c0_60] : memref<1x32xf32, #tpu.memory_space<vmem>>, vector<1x32xf32>
    %cst_61 = arith.constant 9.99999974E-6 : f32
    %68 = vector.broadcast %cst_61 : f32 to vector<1x32xf32>
    %69 = arith.addf %66, %68 : vector<1x32xf32>
    %70 = math.rsqrt %69 : vector<1x32xf32>
    %71 = arith.mulf %67, %70 : vector<1x32xf32>
    %c0_62 = arith.constant 0 : index
    %c0_63 = arith.constant 0 : index
    %72 = vector.load %arg5[%c0_62, %c0_63] : memref<1x32xf32, #tpu.memory_space<vmem>>, vector<1x32xf32>
    %73 = arith.mulf %59, %71 : vector<1x32xf32>
    %74 = arith.subf %72, %73 : vector<1x32xf32>
    %75 = vector.broadcast %71 : vector<1x32xf32> to vector<128x32xf32>
    %76 = arith.mulf %55, %75 : vector<128x32xf32>
    %77 = vector.broadcast %74 : vector<1x32xf32> to vector<128x32xf32>
    %78 = arith.addf %76, %77 : vector<128x32xf32>
    %cst_64 = arith.constant 0.000000e+00 : f32
    %79 = vector.broadcast %cst_64 : f32 to vector<128x32xf32>
    %80 = arith.maximumf %78, %79 : vector<128x32xf32>
    %c0_65 = arith.constant 0 : index
    %c0_66 = arith.constant 0 : index
    %81 = vector.load %arg6[%c0_65, %c0_66] : memref<128x32xf32, #tpu.memory_space<vmem>>, vector<128x32xf32>
    %82 = arith.addf %80, %81 : vector<128x32xf32>
    %c0_67 = arith.constant 0 : index
    %c0_68 = arith.constant 0 : index
    %83 = vector.load %arg7[%c0_67, %c0_68] : memref<32x48xf32, #tpu.memory_space<vmem>>, vector<32x48xf32>
    %cst_69 = arith.constant dense<0.000000e+00> : vector<128x48xf32>
    %84 = tpu.matmul %82, %83, %cst_69 {dimension_numbers = #tpu.dot_dimension_numbers<[1], [0], [0], [1], [0, 0, 1, 1], [], []>} : vector<128x32xf32>, vector<32x48xf32>, vector<128x48xf32> -> vector<128x48xf32>
    %c0_70 = arith.constant 0 : index
    %c0_71 = arith.constant 0 : index
    %85 = vector.load %arg8[%c0_70, %c0_71] : memref<1x48xf32, #tpu.memory_space<vmem>>, vector<1x48xf32>
    %86 = vector.broadcast %85 : vector<1x48xf32> to vector<128x48xf32>
    %87 = arith.addf %84, %86 : vector<128x48xf32>
    %88 = vector.extract_strided_slice %87 {offsets = [0, 0], sizes = [128, 8], strides = [1, 1]} : vector<128x48xf32> to vector<128x8xf32>
    %89 = vector.extract_strided_slice %87 {offsets = [0, 8], sizes = [128, 8], strides = [1, 1]} : vector<128x48xf32> to vector<128x8xf32>
    %90 = vector.extract_strided_slice %87 {offsets = [0, 16], sizes = [128, 32], strides = [1, 1]} : vector<128x48xf32> to vector<128x32xf32>
    %c0_72 = arith.constant 0 : index
    %c0_73 = arith.constant 0 : index
    %91 = memref.load %arg9[%c0_72, %c0_73] : memref<1x1xf32, #tpu.memory_space<smem>>
    %92 = vector.extract_strided_slice %88 {offsets = [0, 0], sizes = [64, 8], strides = [1, 1]} : vector<128x8xf32> to vector<64x8xf32>
    %93 = vector.extract_strided_slice %89 {offsets = [0, 0], sizes = [64, 8], strides = [1, 1]} : vector<128x8xf32> to vector<64x8xf32>
    %cst_74 = arith.constant dense<0.000000e+00> : vector<64x64xf32>
    %94 = tpu.matmul %92, %93, %cst_74 {dimension_numbers = #tpu.dot_dimension_numbers<[1], [1], [0], [0], [0, 0, 1, 0], [], []>} : vector<64x8xf32>, vector<64x8xf32>, vector<64x64xf32> -> vector<64x64xf32>
    %cst_75 = arith.constant dense<0xFF800000> : vector<64xf32>
    %95 = vector.multi_reduction <maximumf>, %94, %cst_75 [1] : vector<64x64xf32> to vector<64xf32>
    %96 = vector.shape_cast %95 : vector<64xf32> to vector<64x1xf32>
    %97 = vector.broadcast %96 : vector<64x1xf32> to vector<64x64xf32>
    %98 = arith.subf %94, %97 : vector<64x64xf32>
    %99 = math.exp %98 : vector<64x64xf32>
    %cst_76 = arith.constant dense<0.000000e+00> : vector<64xf32>
    %100 = vector.multi_reduction <add>, %99, %cst_76 [1] : vector<64x64xf32> to vector<64xf32>
    %101 = vector.shape_cast %100 : vector<64xf32> to vector<64x1xf32>
    %102 = tpu.reciprocal %101 {approx = true} : vector<64x1xf32> -> vector<64x1xf32>
    %103 = vector.broadcast %102 : vector<64x1xf32> to vector<64x64xf32>
    %104 = arith.mulf %99, %103 : vector<64x64xf32>
    %105 = vector.extract_strided_slice %90 {offsets = [0, 0], sizes = [64, 32], strides = [1, 1]} : vector<128x32xf32> to vector<64x32xf32>
    %cst_77 = arith.constant dense<0.000000e+00> : vector<64x32xf32>
    %106 = tpu.matmul %104, %105, %cst_77 {dimension_numbers = #tpu.dot_dimension_numbers<[1], [0], [0], [1], [0, 0, 1, 1], [], []>} : vector<64x64xf32>, vector<64x32xf32>, vector<64x32xf32> -> vector<64x32xf32>
    %107 = vector.broadcast %91 : f32 to vector<64x32xf32>
    %108 = arith.mulf %107, %106 : vector<64x32xf32>
    %109 = vector.extract_strided_slice %82 {offsets = [0, 0], sizes = [64, 32], strides = [1, 1]} : vector<128x32xf32> to vector<64x32xf32>
    %110 = arith.addf %108, %109 : vector<64x32xf32>
    %c0_78 = arith.constant 0 : index
    %c0_79 = arith.constant 0 : index
    %111 = vector.load %arg10[%c0_78, %c0_79] : memref<128x32xf32, #tpu.memory_space<vmem>>, vector<64x32xf32>
    tpu.vector_store %arg10[%c0_78, %c0_79], %110 {strides = array<i32>} : memref<128x32xf32, #tpu.memory_space<vmem>>, vector<64x32xf32>,
    %112 = vector.extract_strided_slice %88 {offsets = [64, 0], sizes = [64, 8], strides = [1, 1]} : vector<128x8xf32> to vector<64x8xf32>
    %113 = vector.extract_strided_slice %89 {offsets = [64, 0], sizes = [64, 8], strides = [1, 1]} : vector<128x8xf32> to vector<64x8xf32>
    %cst_80 = arith.constant dense<0.000000e+00> : vector<64x64xf32>
    %114 = tpu.matmul %112, %113, %cst_80 {dimension_numbers = #tpu.dot_dimension_numbers<[1], [1], [0], [0], [0, 0, 1, 0], [], []>} : vector<64x8xf32>, vector<64x8xf32>, vector<64x64xf32> -> vector<64x64xf32>
    %cst_81 = arith.constant dense<0xFF800000> : vector<64xf32>
    %115 = vector.multi_reduction <maximumf>, %114, %cst_81 [1] : vector<64x64xf32> to vector<64xf32>
    %116 = vector.shape_cast %115 : vector<64xf32> to vector<64x1xf32>
    %117 = vector.broadcast %116 : vector<64x1xf32> to vector<64x64xf32>
    %118 = arith.subf %114, %117 : vector<64x64xf32>
    %119 = math.exp %118 : vector<64x64xf32>
    %cst_82 = arith.constant dense<0.000000e+00> : vector<64xf32>
    %120 = vector.multi_reduction <add>, %119, %cst_82 [1] : vector<64x64xf32> to vector<64xf32>
    %121 = vector.shape_cast %120 : vector<64xf32> to vector<64x1xf32>
    %122 = tpu.reciprocal %121 {approx = true} : vector<64x1xf32> -> vector<64x1xf32>
    %123 = vector.broadcast %122 : vector<64x1xf32> to vector<64x64xf32>
    %124 = arith.mulf %119, %123 : vector<64x64xf32>
    %125 = vector.extract_strided_slice %90 {offsets = [64, 0], sizes = [64, 32], strides = [1, 1]} : vector<128x32xf32> to vector<64x32xf32>
    %cst_83 = arith.constant dense<0.000000e+00> : vector<64x32xf32>
    %126 = tpu.matmul %124, %125, %cst_83 {dimension_numbers = #tpu.dot_dimension_numbers<[1], [0], [0], [1], [0, 0, 1, 1], [], []>} : vector<64x64xf32>, vector<64x32xf32>, vector<64x32xf32> -> vector<64x32xf32>
    %127 = vector.broadcast %91 : f32 to vector<64x32xf32>
    %128 = arith.mulf %127, %126 : vector<64x32xf32>
    %129 = vector.extract_strided_slice %82 {offsets = [64, 0], sizes = [64, 32], strides = [1, 1]} : vector<128x32xf32> to vector<64x32xf32>
    %130 = arith.addf %128, %129 : vector<64x32xf32>
    %c64 = arith.constant 64 : index
    %c0_84 = arith.constant 0 : index
    %131 = vector.load %arg10[%c64, %c0_84] : memref<128x32xf32, #tpu.memory_space<vmem>>, vector<64x32xf32>
    tpu.vector_store %arg10[%c64, %c0_84], %130 {strides = array<i32>} : memref<128x32xf32, #tpu.memory_space<vmem>>, vector<64x32xf32>,
    return
  }
  func.func @transform_0(%arg0: i32) -> (i32, i32, i32) {
    %c0_i32 = arith.constant 0 : i32
    %c0_i32_0 = arith.constant 0 : i32
    %c0_i32_1 = arith.constant 0 : i32
    %c0_i32_2 = arith.constant 0 : i32
    return %c0_i32, %c0_i32_0, %c0_i32_1 : i32, i32, i32
  }
  func.func @transform_1(%arg0: i32) -> (i32, i32, i32) {
    %c0_i32 = arith.constant 0 : i32
    %c0_i32_0 = arith.constant 0 : i32
    %c0_i32_1 = arith.constant 0 : i32
    %c0_i32_2 = arith.constant 0 : i32
    return %c0_i32, %c0_i32_0, %c0_i32_1 : i32, i32, i32
  }
  func.func @transform_2(%arg0: i32) -> (i32, i32) {
    %c0_i32 = arith.constant 0 : i32
    %c0_i32_0 = arith.constant 0 : i32
    %c0_i32_1 = arith.constant 0 : i32
    return %c0_i32, %c0_i32_0 : i32, i32
  }
  func.func @transform_3(%arg0: i32) -> (i32, i32) {
    %c0_i32 = arith.constant 0 : i32
    %c0_i32_0 = arith.constant 0 : i32
    %c0_i32_1 = arith.constant 0 : i32
    return %c0_i32, %c0_i32_0 : i32, i32
  }
  func.func @transform_4(%arg0: i32) -> (i32, i32) {
    %c0_i32 = arith.constant 0 : i32
    %c0_i32_0 = arith.constant 0 : i32
    %c0_i32_1 = arith.constant 0 : i32
    return %c0_i32, %c0_i32_0 : i32, i32
  }
  func.func @transform_5(%arg0: i32) -> (i32, i32) {
    %c0_i32 = arith.constant 0 : i32
    %c0_i32_0 = arith.constant 0 : i32
    %c0_i32_1 = arith.constant 0 : i32
    return %c0_i32, %c0_i32_0 : i32, i32
  }
  func.func @transform_6(%arg0: i32) -> (i32, i32) {
    %c0_i32 = arith.constant 0 : i32
    %c0_i32_0 = arith.constant 0 : i32
    %c0_i32_1 = arith.constant 0 : i32
    return %c0_i32, %c0_i32_0 : i32, i32
  }
  func.func @transform_7(%arg0: i32) -> (i32, i32) {
    %c0_i32 = arith.constant 0 : i32
    %c0_i32_0 = arith.constant 0 : i32
    %c0_i32_1 = arith.constant 0 : i32
    return %c0_i32, %c0_i32_0 : i32, i32
  }
  func.func @transform_8(%arg0: i32) -> (i32, i32) {
    %c0_i32 = arith.constant 0 : i32
    %c0_i32_0 = arith.constant 0 : i32
    %c0_i32_1 = arith.constant 0 : i32
    return %c0_i32, %c0_i32_0 : i32, i32
  }
  func.func @transform_9(%arg0: i32) -> (i32, i32) {
    %c0_i32 = arith.constant 0 : i32
    %c0_i32_0 = arith.constant 0 : i32
    %c0_i32_1 = arith.constant 0 : i32
    return %c0_i32, %c0_i32_0 : i32, i32
  }
}

module attributes {stable_mosaic.version = 11 : i64} {
  func.func @_final_conv_kernel(%arg0: i32, %arg1: memref<9x128x32xf32, #tpu.memory_space<vmem>>, %arg2: memref<9x32x32xf32, #tpu.memory_space<vmem>>, %arg3: memref<1x32xf32, #tpu.memory_space<vmem>>, %arg4: memref<1x32xf32, #tpu.memory_space<vmem>>, %arg5: memref<1x32xf32, #tpu.memory_space<vmem>>, %arg6: memref<128x32xf32, #tpu.memory_space<vmem>>) attributes {dimension_semantics = [#tpu.dimension_semantics<arbitrary>], iteration_bounds = array<i64: 1>, scalar_prefetch = 0 : i64, scratch_operands = 0 : i64, tpu.core_type = #tpu.core_type<tc>, window_params = [{pipeline_mode = #tpu.pipeline_mode<synchronous>, transform_indices = @transform_0, window_bounds = array<i64: 9, 128, 32>}, {pipeline_mode = #tpu.pipeline_mode<synchronous>, transform_indices = @transform_1, window_bounds = array<i64: 9, 32, 32>}, {pipeline_mode = #tpu.pipeline_mode<synchronous>, transform_indices = @transform_2, window_bounds = array<i64: 1, 32>}, {pipeline_mode = #tpu.pipeline_mode<synchronous>, transform_indices = @transform_3, window_bounds = array<i64: 1, 32>}, {pipeline_mode = #tpu.pipeline_mode<synchronous>, transform_indices = @transform_4, window_bounds = array<i64: 1, 32>}, {pipeline_mode = #tpu.pipeline_mode<synchronous>, transform_indices = @transform_5, window_bounds = array<i64: 128, 32>}]} {
    %c0 = arith.constant 0 : index
    %c0_0 = arith.constant 0 : index
    %c0_1 = arith.constant 0 : index
    %0 = vector.load %arg1[%c0, %c0_0, %c0_1] : memref<9x128x32xf32, #tpu.memory_space<vmem>>, vector<1x128x32xf32>
    %1 = vector.shape_cast %0 : vector<1x128x32xf32> to vector<128x32xf32>
    %c0_2 = arith.constant 0 : index
    %c0_3 = arith.constant 0 : index
    %c0_4 = arith.constant 0 : index
    %2 = vector.load %arg2[%c0_2, %c0_3, %c0_4] : memref<9x32x32xf32, #tpu.memory_space<vmem>>, vector<1x32x32xf32>
    %3 = vector.shape_cast %2 : vector<1x32x32xf32> to vector<32x32xf32>
    %cst = arith.constant dense<0.000000e+00> : vector<128x32xf32>
    %4 = tpu.matmul %1, %3, %cst {dimension_numbers = #tpu.dot_dimension_numbers<[1], [0], [0], [1], [0, 0, 1, 1], [], []>} : vector<128x32xf32>, vector<32x32xf32>, vector<128x32xf32> -> vector<128x32xf32>
    %c1 = arith.constant 1 : index
    %c0_5 = arith.constant 0 : index
    %c0_6 = arith.constant 0 : index
    %5 = vector.load %arg1[%c1, %c0_5, %c0_6] : memref<9x128x32xf32, #tpu.memory_space<vmem>>, vector<1x128x32xf32>
    %6 = vector.shape_cast %5 : vector<1x128x32xf32> to vector<128x32xf32>
    %c1_7 = arith.constant 1 : index
    %c0_8 = arith.constant 0 : index
    %c0_9 = arith.constant 0 : index
    %7 = vector.load %arg2[%c1_7, %c0_8, %c0_9] : memref<9x32x32xf32, #tpu.memory_space<vmem>>, vector<1x32x32xf32>
    %8 = vector.shape_cast %7 : vector<1x32x32xf32> to vector<32x32xf32>
    %cst_10 = arith.constant dense<0.000000e+00> : vector<128x32xf32>
    %9 = tpu.matmul %6, %8, %cst_10 {dimension_numbers = #tpu.dot_dimension_numbers<[1], [0], [0], [1], [0, 0, 1, 1], [], []>} : vector<128x32xf32>, vector<32x32xf32>, vector<128x32xf32> -> vector<128x32xf32>
    %10 = arith.addf %4, %9 : vector<128x32xf32>
    %c2 = arith.constant 2 : index
    %c0_11 = arith.constant 0 : index
    %c0_12 = arith.constant 0 : index
    %11 = vector.load %arg1[%c2, %c0_11, %c0_12] : memref<9x128x32xf32, #tpu.memory_space<vmem>>, vector<1x128x32xf32>
    %12 = vector.shape_cast %11 : vector<1x128x32xf32> to vector<128x32xf32>
    %c2_13 = arith.constant 2 : index
    %c0_14 = arith.constant 0 : index
    %c0_15 = arith.constant 0 : index
    %13 = vector.load %arg2[%c2_13, %c0_14, %c0_15] : memref<9x32x32xf32, #tpu.memory_space<vmem>>, vector<1x32x32xf32>
    %14 = vector.shape_cast %13 : vector<1x32x32xf32> to vector<32x32xf32>
    %cst_16 = arith.constant dense<0.000000e+00> : vector<128x32xf32>
    %15 = tpu.matmul %12, %14, %cst_16 {dimension_numbers = #tpu.dot_dimension_numbers<[1], [0], [0], [1], [0, 0, 1, 1], [], []>} : vector<128x32xf32>, vector<32x32xf32>, vector<128x32xf32> -> vector<128x32xf32>
    %16 = arith.addf %10, %15 : vector<128x32xf32>
    %c3 = arith.constant 3 : index
    %c0_17 = arith.constant 0 : index
    %c0_18 = arith.constant 0 : index
    %17 = vector.load %arg1[%c3, %c0_17, %c0_18] : memref<9x128x32xf32, #tpu.memory_space<vmem>>, vector<1x128x32xf32>
    %18 = vector.shape_cast %17 : vector<1x128x32xf32> to vector<128x32xf32>
    %c3_19 = arith.constant 3 : index
    %c0_20 = arith.constant 0 : index
    %c0_21 = arith.constant 0 : index
    %19 = vector.load %arg2[%c3_19, %c0_20, %c0_21] : memref<9x32x32xf32, #tpu.memory_space<vmem>>, vector<1x32x32xf32>
    %20 = vector.shape_cast %19 : vector<1x32x32xf32> to vector<32x32xf32>
    %cst_22 = arith.constant dense<0.000000e+00> : vector<128x32xf32>
    %21 = tpu.matmul %18, %20, %cst_22 {dimension_numbers = #tpu.dot_dimension_numbers<[1], [0], [0], [1], [0, 0, 1, 1], [], []>} : vector<128x32xf32>, vector<32x32xf32>, vector<128x32xf32> -> vector<128x32xf32>
    %22 = arith.addf %16, %21 : vector<128x32xf32>
    %c4 = arith.constant 4 : index
    %c0_23 = arith.constant 0 : index
    %c0_24 = arith.constant 0 : index
    %23 = vector.load %arg1[%c4, %c0_23, %c0_24] : memref<9x128x32xf32, #tpu.memory_space<vmem>>, vector<1x128x32xf32>
    %24 = vector.shape_cast %23 : vector<1x128x32xf32> to vector<128x32xf32>
    %c4_25 = arith.constant 4 : index
    %c0_26 = arith.constant 0 : index
    %c0_27 = arith.constant 0 : index
    %25 = vector.load %arg2[%c4_25, %c0_26, %c0_27] : memref<9x32x32xf32, #tpu.memory_space<vmem>>, vector<1x32x32xf32>
    %26 = vector.shape_cast %25 : vector<1x32x32xf32> to vector<32x32xf32>
    %cst_28 = arith.constant dense<0.000000e+00> : vector<128x32xf32>
    %27 = tpu.matmul %24, %26, %cst_28 {dimension_numbers = #tpu.dot_dimension_numbers<[1], [0], [0], [1], [0, 0, 1, 1], [], []>} : vector<128x32xf32>, vector<32x32xf32>, vector<128x32xf32> -> vector<128x32xf32>
    %28 = arith.addf %22, %27 : vector<128x32xf32>
    %c5 = arith.constant 5 : index
    %c0_29 = arith.constant 0 : index
    %c0_30 = arith.constant 0 : index
    %29 = vector.load %arg1[%c5, %c0_29, %c0_30] : memref<9x128x32xf32, #tpu.memory_space<vmem>>, vector<1x128x32xf32>
    %30 = vector.shape_cast %29 : vector<1x128x32xf32> to vector<128x32xf32>
    %c5_31 = arith.constant 5 : index
    %c0_32 = arith.constant 0 : index
    %c0_33 = arith.constant 0 : index
    %31 = vector.load %arg2[%c5_31, %c0_32, %c0_33] : memref<9x32x32xf32, #tpu.memory_space<vmem>>, vector<1x32x32xf32>
    %32 = vector.shape_cast %31 : vector<1x32x32xf32> to vector<32x32xf32>
    %cst_34 = arith.constant dense<0.000000e+00> : vector<128x32xf32>
    %33 = tpu.matmul %30, %32, %cst_34 {dimension_numbers = #tpu.dot_dimension_numbers<[1], [0], [0], [1], [0, 0, 1, 1], [], []>} : vector<128x32xf32>, vector<32x32xf32>, vector<128x32xf32> -> vector<128x32xf32>
    %34 = arith.addf %28, %33 : vector<128x32xf32>
    %c6 = arith.constant 6 : index
    %c0_35 = arith.constant 0 : index
    %c0_36 = arith.constant 0 : index
    %35 = vector.load %arg1[%c6, %c0_35, %c0_36] : memref<9x128x32xf32, #tpu.memory_space<vmem>>, vector<1x128x32xf32>
    %36 = vector.shape_cast %35 : vector<1x128x32xf32> to vector<128x32xf32>
    %c6_37 = arith.constant 6 : index
    %c0_38 = arith.constant 0 : index
    %c0_39 = arith.constant 0 : index
    %37 = vector.load %arg2[%c6_37, %c0_38, %c0_39] : memref<9x32x32xf32, #tpu.memory_space<vmem>>, vector<1x32x32xf32>
    %38 = vector.shape_cast %37 : vector<1x32x32xf32> to vector<32x32xf32>
    %cst_40 = arith.constant dense<0.000000e+00> : vector<128x32xf32>
    %39 = tpu.matmul %36, %38, %cst_40 {dimension_numbers = #tpu.dot_dimension_numbers<[1], [0], [0], [1], [0, 0, 1, 1], [], []>} : vector<128x32xf32>, vector<32x32xf32>, vector<128x32xf32> -> vector<128x32xf32>
    %40 = arith.addf %34, %39 : vector<128x32xf32>
    %c7 = arith.constant 7 : index
    %c0_41 = arith.constant 0 : index
    %c0_42 = arith.constant 0 : index
    %41 = vector.load %arg1[%c7, %c0_41, %c0_42] : memref<9x128x32xf32, #tpu.memory_space<vmem>>, vector<1x128x32xf32>
    %42 = vector.shape_cast %41 : vector<1x128x32xf32> to vector<128x32xf32>
    %c7_43 = arith.constant 7 : index
    %c0_44 = arith.constant 0 : index
    %c0_45 = arith.constant 0 : index
    %43 = vector.load %arg2[%c7_43, %c0_44, %c0_45] : memref<9x32x32xf32, #tpu.memory_space<vmem>>, vector<1x32x32xf32>
    %44 = vector.shape_cast %43 : vector<1x32x32xf32> to vector<32x32xf32>
    %cst_46 = arith.constant dense<0.000000e+00> : vector<128x32xf32>
    %45 = tpu.matmul %42, %44, %cst_46 {dimension_numbers = #tpu.dot_dimension_numbers<[1], [0], [0], [1], [0, 0, 1, 1], [], []>} : vector<128x32xf32>, vector<32x32xf32>, vector<128x32xf32> -> vector<128x32xf32>
    %46 = arith.addf %40, %45 : vector<128x32xf32>
    %c8 = arith.constant 8 : index
    %c0_47 = arith.constant 0 : index
    %c0_48 = arith.constant 0 : index
    %47 = vector.load %arg1[%c8, %c0_47, %c0_48] : memref<9x128x32xf32, #tpu.memory_space<vmem>>, vector<1x128x32xf32>
    %48 = vector.shape_cast %47 : vector<1x128x32xf32> to vector<128x32xf32>
    %c8_49 = arith.constant 8 : index
    %c0_50 = arith.constant 0 : index
    %c0_51 = arith.constant 0 : index
    %49 = vector.load %arg2[%c8_49, %c0_50, %c0_51] : memref<9x32x32xf32, #tpu.memory_space<vmem>>, vector<1x32x32xf32>
    %50 = vector.shape_cast %49 : vector<1x32x32xf32> to vector<32x32xf32>
    %cst_52 = arith.constant dense<0.000000e+00> : vector<128x32xf32>
    %51 = tpu.matmul %48, %50, %cst_52 {dimension_numbers = #tpu.dot_dimension_numbers<[1], [0], [0], [1], [0, 0, 1, 1], [], []>} : vector<128x32xf32>, vector<32x32xf32>, vector<128x32xf32> -> vector<128x32xf32>
    %52 = arith.addf %46, %51 : vector<128x32xf32>
    %c0_53 = arith.constant 0 : index
    %c0_54 = arith.constant 0 : index
    %53 = vector.load %arg3[%c0_53, %c0_54] : memref<1x32xf32, #tpu.memory_space<vmem>>, vector<1x32xf32>
    %54 = vector.broadcast %53 : vector<1x32xf32> to vector<128x32xf32>
    %55 = arith.addf %52, %54 : vector<128x32xf32>
    %cst_55 = arith.constant dense<0.000000e+00> : vector<32xf32>
    %56 = vector.multi_reduction <add>, %55, %cst_55 [0] : vector<128x32xf32> to vector<32xf32>
    %57 = vector.shape_cast %56 : vector<32xf32> to vector<1x32xf32>
    %cst_56 = arith.constant 1.280000e+02 : f32
    %58 = vector.broadcast %cst_56 : f32 to vector<1x32xf32>
    %59 = arith.divf %57, %58 : vector<1x32xf32>
    %60 = vector.broadcast %59 : vector<1x32xf32> to vector<128x32xf32>
    %61 = arith.subf %55, %60 : vector<128x32xf32>
    %62 = arith.mulf %61, %61 : vector<128x32xf32>
    %cst_57 = arith.constant dense<0.000000e+00> : vector<32xf32>
    %63 = vector.multi_reduction <add>, %62, %cst_57 [0] : vector<128x32xf32> to vector<32xf32>
    %64 = vector.shape_cast %63 : vector<32xf32> to vector<1x32xf32>
    %cst_58 = arith.constant 1.280000e+02 : f32
    %65 = vector.broadcast %cst_58 : f32 to vector<1x32xf32>
    %66 = arith.divf %64, %65 : vector<1x32xf32>
    %c0_59 = arith.constant 0 : index
    %c0_60 = arith.constant 0 : index
    %67 = vector.load %arg4[%c0_59, %c0_60] : memref<1x32xf32, #tpu.memory_space<vmem>>, vector<1x32xf32>
    %cst_61 = arith.constant 9.99999974E-6 : f32
    %68 = vector.broadcast %cst_61 : f32 to vector<1x32xf32>
    %69 = arith.addf %66, %68 : vector<1x32xf32>
    %70 = math.rsqrt %69 : vector<1x32xf32>
    %71 = arith.mulf %67, %70 : vector<1x32xf32>
    %c0_62 = arith.constant 0 : index
    %c0_63 = arith.constant 0 : index
    %72 = vector.load %arg5[%c0_62, %c0_63] : memref<1x32xf32, #tpu.memory_space<vmem>>, vector<1x32xf32>
    %73 = arith.mulf %59, %71 : vector<1x32xf32>
    %74 = arith.subf %72, %73 : vector<1x32xf32>
    %75 = vector.broadcast %71 : vector<1x32xf32> to vector<128x32xf32>
    %76 = arith.mulf %55, %75 : vector<128x32xf32>
    %77 = vector.broadcast %74 : vector<1x32xf32> to vector<128x32xf32>
    %78 = arith.addf %76, %77 : vector<128x32xf32>
    %cst_64 = arith.constant 0.000000e+00 : f32
    %79 = vector.broadcast %cst_64 : f32 to vector<128x32xf32>
    %80 = arith.maximumf %78, %79 : vector<128x32xf32>
    %c0_65 = arith.constant 0 : index
    %c0_66 = arith.constant 0 : index
    %81 = vector.load %arg6[%c0_65, %c0_66] : memref<128x32xf32, #tpu.memory_space<vmem>>, vector<128x32xf32>
    tpu.vector_store %arg6[%c0_65, %c0_66], %80 {strides = array<i32>} : memref<128x32xf32, #tpu.memory_space<vmem>>, vector<128x32xf32>,
    return
  }
  func.func @transform_0(%arg0: i32) -> (i32, i32, i32) {
    %c0_i32 = arith.constant 0 : i32
    %c0_i32_0 = arith.constant 0 : i32
    %c0_i32_1 = arith.constant 0 : i32
    %c0_i32_2 = arith.constant 0 : i32
    return %c0_i32, %c0_i32_0, %c0_i32_1 : i32, i32, i32
  }
  func.func @transform_1(%arg0: i32) -> (i32, i32, i32) {
    %c0_i32 = arith.constant 0 : i32
    %c0_i32_0 = arith.constant 0 : i32
    %c0_i32_1 = arith.constant 0 : i32
    %c0_i32_2 = arith.constant 0 : i32
    return %c0_i32, %c0_i32_0, %c0_i32_1 : i32, i32, i32
  }
  func.func @transform_2(%arg0: i32) -> (i32, i32) {
    %c0_i32 = arith.constant 0 : i32
    %c0_i32_0 = arith.constant 0 : i32
    %c0_i32_1 = arith.constant 0 : i32
    return %c0_i32, %c0_i32_0 : i32, i32
  }
  func.func @transform_3(%arg0: i32) -> (i32, i32) {
    %c0_i32 = arith.constant 0 : i32
    %c0_i32_0 = arith.constant 0 : i32
    %c0_i32_1 = arith.constant 0 : i32
    return %c0_i32, %c0_i32_0 : i32, i32
  }
  func.func @transform_4(%arg0: i32) -> (i32, i32) {
    %c0_i32 = arith.constant 0 : i32
    %c0_i32_0 = arith.constant 0 : i32
    %c0_i32_1 = arith.constant 0 : i32
    return %c0_i32, %c0_i32_0 : i32, i32
  }
  func.func @transform_5(%arg0: i32) -> (i32, i32) {
    %c0_i32 = arith.constant 0 : i32
    %c0_i32_0 = arith.constant 0 : i32
    %c0_i32_1 = arith.constant 0 : i32
    return %c0_i32, %c0_i32_0 : i32, i32
  }
}

</mosaic_0001>

<bundles_post_ra>
// kernel: attention_layer_forward.3
= control target key start
LH: loop header
LB: loop body
LE: loop exit
PB: predicated region body
PF: predicated region fallthrough
CT: control target
= control target key end

     0   :  { %vm63_vm0 = vcmask 261120   ;;  %s2932_s0 = inlined_call_operand.vmem [shape: f32[9,128,32], index: 0, kind: input, shape index: {}]   ;;  %s2933_s1 = inlined_call_operand.vmem [shape: f32[9,32,32], index: 1, kind: input, shape index: {}]   ;;  %s2934_s2 = inlined_call_operand.vmem [shape: f32[1,32], index: 2, kind: input, shape index: {}]   ;;  %s2935_s3 = inlined_call_operand.vmem [shape: f32[1,32], index: 3, kind: input, shape index: {}]   ;;  %s2936_s4 = inlined_call_operand.vmem [shape: f32[1,32], index: 4, kind: input, shape index: {}]   ;;  %s2937_s5 = inlined_call_operand.hbm [shape: f32[128,32], index: 5, kind: output, shape index: {}]  }
   0x1   :  { %v1605_v0 = vld [vmem:[%s2933_s1 + $0x38] sm:$0xff]  ;;  %v1604_v1 = vld [vmem:[%s2933_s1 + $0x30] sm:$0xff]  ;;  %v1603_v2 = vld [vmem:[%s2933_s1 + $0x28] sm:$0xff] }
   0x2   :  { %1890 = vmatpush.msra.mxu1 %v1605_v0  ;;  %1891 = vmatpush.msra.mxu2 %v1605_v0  ;;  %v1602_v3 = vld [vmem:[%s2933_s1 + $0x20] sm:$0xff]  ;;  %v1657_v6 = vld [vmem:[%s2933_s1 + $0x58] sm:$0xff]  ;;  %v1656_v10 = vld [vmem:[%s2933_s1 + $0x50] sm:$0xff] }
   0x3   :  { %1892 = vmatpush.msra.mxu3 %v1605_v0  ;;  %124 = vmatpush.msra.mxu0 %v1605_v0  ;;  %v1590_v4 = vld [vmem:[%s2932_s0 + $0xa0] sm:$0xff]  ;;  %v40_v8 = vld [vmem:[%s2933_s1 + $0x18] sm:$0xff]  ;;  %v39_v11 = vld [vmem:[%s2933_s1 + $0x10] sm:$0xff] }
   0x4   :  { %1893 = vmatpush.msra.mxu1 %v1604_v1  ;;  %1894 = vmatpush.msra.mxu2 %v1604_v1  ;;  %v1594_v5 = vld [vmem:[%s2932_s0 + $0xc0] sm:$0xff]  ;;  %v1693_v9 = vld [vmem:[%s2933_s1 + $0x78] sm:$0xff]  ;;  %v1692_v13 = vld [vmem:[%s2933_s1 + $0x70] sm:$0xff] }
   0x5   :  { %1895 = vmatpush.msra.mxu3 %v1604_v1  ;;  %125 = vmatpush.msra.mxu0 %v1604_v1  ;;  %v1598_v7 = vld [vmem:[%s2932_s0 + $0xe0] sm:$0xff]  ;;  %v1729_v14 = vld [vmem:[%s2933_s1 + $0x98] sm:$0xff]  ;;  %v1655_v15 = vld [vmem:[%s2933_s1 + $0x48] sm:$0xff] }
   0x6   :  { %1896 = vmatpush.msra.mxu1 %v1603_v2  ;;  %1897 = vmatpush.msra.mxu2 %v1603_v2  ;;  %v1586_v12 = vld [vmem:[%s2932_s0 + $0x80] sm:$0xff]  ;;  %v1691_v16 = vld [vmem:[%s2933_s1 + $0x68] sm:$0xff]  ;;  %v1728_v20 = vld [vmem:[%s2933_s1 + $0x90] sm:$0xff] }
   0x7   :  { %1898 = vmatpush.msra.mxu3 %v1603_v2  ;;  %126 = vmatpush.msra.mxu0 %v1603_v2  ;;  %v38_v17 = vld [vmem:[%s2933_s1 + $0x8] sm:$0xff]  ;;  %v1654_v21 = vld [vmem:[%s2933_s1 + $0x40] sm:$0xff] }
   0x8   :  { %1899 = vmatpush.msra.mxu1 %v1602_v3  ;;  %1900 = vmatpush.msra.mxu2 %v1602_v3  ;;  %v1591_v18 = vld [vmem:[%s2932_s0 + $0xa8] sm:$0xff] }
   0x9   :  { %1610 = vmatmul.msk.f32.vlgmr.msra.gmra.mxu1 %vm63_vm0, %v1590_v4  ;;  %1614 = vmatmul.msk.f32.vlgmr.msra.gmra.mxu2 %vm63_vm0, %v1594_v5  ;;  %v1595_v19 = vld [vmem:[%s2932_s0 + $0xc8] sm:$0xff] }
   0xa   :  { %372 = vmatpush.msrb.mxu2 %v1657_v6  ;;  %1901 = vmatpush.msra.mxu3 %v1602_v3 }
   0xb   :  { %1618 = vmatmul.msk.f32.vlgmr.msra.gmra.mxu3 %vm63_vm0, %v1598_v7  ;;  %237 = vmatpush.msrb.mxu1 %v40_v8 }
   0xc   :  { %523 = vmatpush.msrb.mxu3 %v1693_v9  ;;  %373 = vmatpush.msrb.mxu2 %v1656_v10 }
   0xd   :  { %127 = vmatpush.msra.mxu0 %v1602_v3  ;;  %238 = vmatpush.msrb.mxu1 %v39_v11 }
   0xe   :  { %1606 = vmatmul.msk.f32.vlgmr.msra.gmra.mxu0 %vm63_vm0, %v1586_v12  ;;  %524 = vmatpush.msrb.mxu3 %v1692_v13 }
   0xf   :  { %674 = vmatpush.msrb.mxu0 %v1729_v14  ;;  %374 = vmatpush.msrb.mxu2 %v1655_v15 }
  0x10   :  { %10 = vsyncpa [#allocation3], 0  ;;  %v1599_v22 = vld [vmem:[%s2932_s0 + $0xe8] sm:$0xff]  ;;  %525 = vmatpush.msrb.mxu3 %v1691_v16  ;;  %239 = vmatpush.msrb.mxu1 %v38_v17  ;;  %v37_v23 = vld [vmem:[%s2933_s1] sm:$0xff]  ;;  %s1574_s27 = sshll.u32 %s2937_s5, 4  ;;  %s1939_s28 = smov 128   ;;  %s1575_s27 = int_to_ptr.hbm [resolvable:$true] %s1574_s27 }
  0x11   :  { %1611 = vmatmul.msk.f32.gmra.mxu1 %vm63_vm0, %v1591_v18  ;;  %1615 = vmatmul.msk.f32.gmra.mxu2 %vm63_vm0, %v1595_v19  ;;  %v1690_v24 = vld [vmem:[%s2933_s1 + $0x60] sm:$0xff]  ;;  %v1727_v25 = vld [vmem:[%s2933_s1 + $0x88] sm:$0xff]  ;;  %v1801_v26 = vld [vmem:[%s2933_s1 + $0xd8] sm:$0xff]  ;;  %s1940_s29 = smov 8  }
  0x12   :  { %675 = vmatpush.msrb.mxu0 %v1728_v20  ;;  %375 = vmatpush.msrb.mxu2 %v1654_v21  ;;  %v1837_v27 = vld [vmem:[%s2933_s1 + $0xf8] sm:$0xff]  ;;  %v1587_v28 = vld [vmem:[%s2932_s0 + $0x88] sm:$0xff]  ;;  %v1726_v30 = vld [vmem:[%s2933_s1 + $0x80] sm:$0xff] }
  0x13   :  { %1619 = vmatmul.msk.f32.gmra.mxu3 %vm63_vm0, %v1599_v22  ;;  %240 = vmatpush.msrb.mxu1 %v37_v23  ;;  %v1765_v29 = vld [vmem:[%s2933_s1 + $0xb8] sm:$0xff]  ;;  %v1592_v32 = vld [vmem:[%s2932_s0 + $0xb0] sm:$0xff]  ;;  %v21_v40 = vld [vmem:[%s2932_s0] sm:$0xff] }
  0x14   :  { %526 = vmatpush.msrb.mxu3 %v1690_v24  ;;  %676 = vmatpush.msrb.mxu0 %v1727_v25  ;;  %v1873_v31 = vld [vmem:[%s2933_s1 + $0x118] sm:$0xff]  ;;  %v1596_v33 = vld [vmem:[%s2932_s0 + $0xd0] sm:$0xff]  ;;  %v1638_v41 = vld [vmem:[%s2932_s0 + $0x100] sm:$0xff] }
  0x15   :  { %976 = vmatpush.msra.mxu2 %v1801_v26  ;;  %825 = vmatpush.msra.mxu1 %v1765_v29  ;;  %v1600_v34 = vld [vmem:[%s2932_s0 + $0xf0] sm:$0xff]  ;;  %v1593_v36 = vld [vmem:[%s2932_s0 + $0xb8] sm:$0xff]  ;;  %v1674_v42 = vld [vmem:[%s2932_s0 + $0x180] sm:$0xff] }
  0x16   :  { %1127 = vmatpush.msra.mxu3 %v1837_v27  ;;  %1607 = vmatmul.msk.f32.gmra.mxu0 %vm63_vm0, %v1587_v28  ;;  %v1588_v35 = vld [vmem:[%s2932_s0 + $0x90] sm:$0xff]  ;;  %v1597_v37 = vld [vmem:[%s2932_s0 + $0xd8] sm:$0xff]  ;;  %v1710_v44 = vld [vmem:[%s2932_s0 + $0x200] sm:$0xff] }
  0x17   :  { %677 = vmatpush.msrb.mxu0 %v1726_v30  ;;  %v1601_v38 = vld [vmem:[%s2932_s0 + $0xf8] sm:$0xff]  ;;  %v1800_v43 = vld [vmem:[%s2933_s1 + $0xd0] sm:$0xff]  ;;  %v22_v47 = vld [vmem:[%s2932_s0 + $0x8] sm:$0xff] }
  0x18   :  { %v1589_v39 = vld [vmem:[%s2932_s0 + $0x98] sm:$0xff]  ;;  %977 = vmatpush.msra.mxu2 %v1800_v43  ;;  %v1836_v45 = vld [vmem:[%s2933_s1 + $0xf0] sm:$0xff]  ;;  %v1639_v48 = vld [vmem:[%s2932_s0 + $0x108] sm:$0xff] }
  0x19   :  { %1278 = vmatpush.msra.mxu0 %v1873_v31  ;;  %1612 = vmatmul.msk.f32.gmra.mxu1 %vm63_vm0, %v1592_v32  ;;  %v1764_v46 = vld [vmem:[%s2933_s1 + $0xb0] sm:$0xff]  ;;  %v1675_v49 = vld [vmem:[%s2932_s0 + $0x188] sm:$0xff]  ;;  %v24_v56 = vld [vmem:[%s2932_s0 + $0x18] sm:$0xff] }
  0x1a   :  { %1616 = vmatmul.msk.f32.gmra.mxu2 %vm63_vm0, %v1596_v33  ;;  %1128 = vmatpush.msra.mxu3 %v1836_v45  ;;  %v1711_v50 = vld [vmem:[%s2932_s0 + $0x208] sm:$0xff]  ;;  %v1872_v51 = vld [vmem:[%s2933_s1 + $0x110] sm:$0xff]  ;;  %v1641_v57 = vld [vmem:[%s2932_s0 + $0x118] sm:$0xff] }
  0x1b   :  { %1620 = vmatmul.msk.f32.gmra.mxu3 %vm63_vm0, %v1600_v34  ;;  %826 = vmatpush.msra.mxu1 %v1764_v46  ;;  %v23_v52 = vld [vmem:[%s2932_s0 + $0x10] sm:$0xff]  ;;  %v1677_v58 = vld [vmem:[%s2932_s0 + $0x198] sm:$0xff]  ;;  %v25_v60 = vld [vmem:[%s2932_s0 + $0x20] sm:$0xff] }
  0x1c   :  { %1279 = vmatpush.msra.mxu0 %v1872_v51  ;;  %v1640_v53 = vld [vmem:[%s2932_s0 + $0x110] sm:$0xff]  ;;  %v1713_v59 = vld [vmem:[%s2932_s0 + $0x218] sm:$0xff]  ;;  %v1642_v61 = vld [vmem:[%s2932_s0 + $0x120] sm:$0xff] }
  0x1d   :  { %v1676_v54 = vld [vmem:[%s2932_s0 + $0x190] sm:$0xff]  ;;  %v1678_v62 = vld [vmem:[%s2932_s0 + $0x1a0] sm:$0xff]  ;;  %v1799_v63 = vld [vmem:[%s2933_s1 + $0xc8] sm:$0xff] }
  0x1e   :  { %1608 = vmatmul.msk.f32.gmra.mxu0 %vm63_vm0, %v1588_v35  ;;  %v1712_v55 = vld [vmem:[%s2932_s0 + $0x210] sm:$0xff]  ;;  %978 = vmatpush.msra.mxu2 %v1799_v63  ;;  %v1714_v0 = vld [vmem:[%s2932_s0 + $0x220] sm:$0xff]  ;;  %v1835_v1 = vld [vmem:[%s2933_s1 + $0xe8] sm:$0xff] }
  0x1f   :  { %v1763_v2 = vld [vmem:[%s2933_s1 + $0xa8] sm:$0xff]  ;;  %1129 = vmatpush.msra.mxu3 %v1835_v1  ;;  %v27_v8 = vld [vmem:[%s2932_s0 + $0x30] sm:$0xff]  ;;  %v28_v12 = vld [vmem:[%s2932_s0 + $0x38] sm:$0xff] }
  0x20   :  { %827 = vmatpush.msra.mxu1 %v1763_v2  ;;  %v26_v3 = vld [vmem:[%s2932_s0 + $0x28] sm:$0xff]  ;;  %v1644_v9 = vld [vmem:[%s2932_s0 + $0x130] sm:$0xff]  ;;  %v1645_v13 = vld [vmem:[%s2932_s0 + $0x138] sm:$0xff] }
  0x21   :  { %1613 = vmatmul.msk.f32.gmra.mxu1 %vm63_vm0, %v1593_v36  ;;  %v1643_v4 = vld [vmem:[%s2932_s0 + $0x128] sm:$0xff]  ;;  %v1680_v10 = vld [vmem:[%s2932_s0 + $0x1b0] sm:$0xff]  ;;  %v1681_v14 = vld [vmem:[%s2932_s0 + $0x1b8] sm:$0xff] }
  0x22   :  { %1617 = vmatmul.msk.f32.gmra.mxu2 %vm63_vm0, %v1597_v37  ;;  %v1679_v5 = vld [vmem:[%s2932_s0 + $0x1a8] sm:$0xff]  ;;  %v1716_v11 = vld [vmem:[%s2932_s0 + $0x230] sm:$0xff]  ;;  %v1717_v15 = vld [vmem:[%s2932_s0 + $0x238] sm:$0xff] }
  0x23   :  { %1621 = vmatmul.msk.f32.gmra.mxu3 %vm63_vm0, %v1601_v38  ;;  %v1715_v6 = vld [vmem:[%s2932_s0 + $0x228] sm:$0xff]  ;;  %v29_v16 = vld [vmem:[%s2932_s0 + $0x40] sm:$0xff]  ;;  %v31_v28 = vld [vmem:[%s2932_s0 + $0x50] sm:$0xff] }
  0x24   :  { %v1871_v7 = vld [vmem:[%s2933_s1 + $0x108] sm:$0xff]  ;;  %v1646_v17 = vld [vmem:[%s2932_s0 + $0x140] sm:$0xff]  ;;  %v1648_v29 = vld [vmem:[%s2932_s0 + $0x150] sm:$0xff] }
  0x25   :  { %1280 = vmatpush.msra.mxu0 %v1871_v7  ;;  %v1682_v18 = vld [vmem:[%s2932_s0 + $0x1c0] sm:$0xff]  ;;  %v30_v23 = vld [vmem:[%s2932_s0 + $0x48] sm:$0xff]  ;;  %v1684_v30 = vld [vmem:[%s2932_s0 + $0x1d0] sm:$0xff] }
  0x26   :  { %1609 = vmatmul.msk.f32.gmra.mxu0 %vm63_vm0, %v1589_v39  ;;  %v1798_v19 = vld [vmem:[%s2933_s1 + $0xc0] sm:$0xff]  ;;  %v1647_v24 = vld [vmem:[%s2932_s0 + $0x148] sm:$0xff]  ;;  %v1720_v31 = vld [vmem:[%s2932_s0 + $0x250] sm:$0xff] }
  0x27   :  { %979 = vmatpush.msra.mxu2 %v1798_v19  ;;  %v1718_v20 = vld [vmem:[%s2932_s0 + $0x240] sm:$0xff]  ;;  %v1683_v25 = vld [vmem:[%s2932_s0 + $0x1c8] sm:$0xff]  ;;  %v32_v32 = vld [vmem:[%s2932_s0 + $0x58] sm:$0xff] }
  0x28   :  { %v1834_v21 = vld [vmem:[%s2933_s1 + $0xe0] sm:$0xff]  ;;  %v1719_v26 = vld [vmem:[%s2932_s0 + $0x248] sm:$0xff]  ;;  %v1649_v33 = vld [vmem:[%s2932_s0 + $0x158] sm:$0xff] }
  0x29   :  { %1622 = vmatmul.msk.f32.vlgmr.msrb.gmra.mxu1 %vm63_vm0, %v21_v40  ;;  %1130 = vmatpush.msra.mxu3 %v1834_v21  ;;  %v1762_v22 = vld [vmem:[%s2933_s1 + $0xa0] sm:$0xff]  ;;  %v1685_v34 = vld [vmem:[%s2932_s0 + $0x1d8] sm:$0xff]  ;;  %v34_v45 = vld [vmem:[%s2932_s0 + $0x68] sm:$0xff] }
  0x2a   :  { %1658 = vmatmul.msk.f32.vlgmr.msrb.gmra.mxu2 %vm63_vm0, %v1638_v41  ;;  %828 = vmatpush.msra.mxu1 %v1762_v22  ;;  %v1870_v27 = vld [vmem:[%s2933_s1 + $0x100] sm:$0xff]  ;;  %v1721_v35 = vld [vmem:[%s2932_s0 + $0x258] sm:$0xff]  ;;  %v1651_v46 = vld [vmem:[%s2932_s0 + $0x168] sm:$0xff] }
  0x2b   :  { %1694 = vmatmul.msk.f32.vlgmr.msrb.gmra.mxu3 %vm63_vm0, %v1674_v42  ;;  %1281 = vmatpush.msra.mxu0 %v1870_v27  ;;  %v33_v37 = vld [vmem:[%s2932_s0 + $0x60] sm:$0xff]  ;;  %v1689_v63 = vld [vmem:[%s2932_s0 + $0x1f8] sm:$0xff]  ;;  %v1855_v22 = vld [vmem:[%s2932_s0 + $0x408] sm:$0xff] }
  0x2c   :  { %v1650_v38 = vld [vmem:[%s2932_s0 + $0x160] sm:$0xff]  ;;  %v1725_v1 = vld [vmem:[%s2932_s0 + $0x278] sm:$0xff]  ;;  %v1748_v27 = vld [vmem:[%s2932_s0 + $0x290] sm:$0xff] }
  0x2d   :  { %v1686_v39 = vld [vmem:[%s2932_s0 + $0x1e0] sm:$0xff] }
  0x2e   :  { %1730 = vmatmul.msk.f32.vlgmr.msrb.gmra.mxu0 %vm63_vm0, %v1710_v44  ;;  %v1722_v41 = vld [vmem:[%s2932_s0 + $0x260] sm:$0xff] }
  0x2f   :  { %v1818_v7 = vld [vmem:[%s2932_s0 + $0x380] sm:$0xff] }
  0x31   :  { %1623 = vmatmul.msk.f32.gmra.mxu1 %vm63_vm0, %v22_v47  ;;  %v1687_v47 = vld [vmem:[%s2932_s0 + $0x1e8] sm:$0xff] }
  0x32   :  { %1659 = vmatmul.msk.f32.gmra.mxu2 %vm63_vm0, %v1639_v48 }
  0x33   :  { %1695 = vmatmul.msk.f32.gmra.mxu3 %vm63_vm0, %v1675_v49  ;;  %v1723_v49 = vld [vmem:[%s2932_s0 + $0x268] sm:$0xff] }
  0x36   :  { %1731 = vmatmul.msk.f32.gmra.mxu0 %vm63_vm0, %v1711_v50 }
  0x39   :  { %1624 = vmatmul.msk.f32.gmra.mxu1 %vm63_vm0, %v23_v52 }
  0x3a   :  { %1660 = vmatmul.msk.f32.gmra.mxu2 %vm63_vm0, %v1640_v53  ;;  %v35_v53 = vld [vmem:[%s2932_s0 + $0x70] sm:$0xff] }
  0x3b   :  { %1696 = vmatmul.msk.f32.gmra.mxu3 %vm63_vm0, %v1676_v54  ;;  %v1652_v54 = vld [vmem:[%s2932_s0 + $0x170] sm:$0xff] }
  0x3e   :  { %1732 = vmatmul.msk.f32.gmra.mxu0 %vm63_vm0, %v1712_v55  ;;  %v1688_v55 = vld [vmem:[%s2932_s0 + $0x1f0] sm:$0xff] }
  0x41   :  { %1625 = vmatmul.msk.f32.gmra.mxu1 %vm63_vm0, %v24_v56 }
  0x42   :  { %1661 = vmatmul.msk.f32.gmra.mxu2 %vm63_vm0, %v1641_v57  ;;  %v1724_v57 = vld [vmem:[%s2932_s0 + $0x270] sm:$0xff] }
  0x43   :  { %1697 = vmatmul.msk.f32.gmra.mxu3 %vm63_vm0, %v1677_v58 }
  0x46   :  { %1733 = vmatmul.msk.f32.gmra.mxu0 %vm63_vm0, %v1713_v59 }
  0x49   :  { %1626 = vmatmul.msk.f32.gmra.mxu1 %vm63_vm0, %v25_v60 }
  0x4a   :  { %1662 = vmatmul.msk.f32.gmra.mxu2 %vm63_vm0, %v1642_v61  ;;  %v36_v61 = vld [vmem:[%s2932_s0 + $0x78] sm:$0xff] }
  0x4b   :  { %1698 = vmatmul.msk.f32.gmra.mxu3 %vm63_vm0, %v1678_v62  ;;  %v1653_v62 = vld [vmem:[%s2932_s0 + $0x178] sm:$0xff] }
  0x4e   :  { %1734 = vmatmul.msk.f32.gmra.mxu0 %vm63_vm0, %v1714_v0 }
  0x51   :  { %1627 = vmatmul.msk.f32.gmra.mxu1 %vm63_vm0, %v26_v3 }
  0x52   :  { %1663 = vmatmul.msk.f32.gmra.mxu2 %vm63_vm0, %v1643_v4 }
  0x53   :  { %1699 = vmatmul.msk.f32.gmra.mxu3 %vm63_vm0, %v1679_v5  ;;  %v1746_v5 = vld [vmem:[%s2932_s0 + $0x280] sm:$0xff] }
  0x56   :  { %1735 = vmatmul.msk.f32.gmra.mxu0 %vm63_vm0, %v1715_v6  ;;  %v1782_v6 = vld [vmem:[%s2932_s0 + $0x300] sm:$0xff] }
  0x59   :  { %1628 = vmatmul.msk.f32.gmra.mxu1 %vm63_vm0, %v27_v8 }
  0x5a   :  { %1664 = vmatmul.msk.f32.gmra.mxu2 %vm63_vm0, %v1644_v9 }
  0x5b   :  { %1700 = vmatmul.msk.f32.gmra.mxu3 %vm63_vm0, %v1680_v10  ;;  %v1854_v10 = vld [vmem:[%s2932_s0 + $0x400] sm:$0xff] }
  0x5e   :  { %1736 = vmatmul.msk.f32.gmra.mxu0 %vm63_vm0, %v1716_v11 }
  0x61   :  { %1629 = vmatmul.msk.f32.gmra.mxu1 %vm63_vm0, %v28_v12 }
  0x62   :  { %1665 = vmatmul.msk.f32.gmra.mxu2 %vm63_vm0, %v1645_v13 }
  0x63   :  { %1701 = vmatmul.msk.f32.gmra.mxu3 %vm63_vm0, %v1681_v14 }
  0x66   :  { %1737 = vmatmul.msk.f32.gmra.mxu0 %vm63_vm0, %v1717_v15  ;;  %v1747_v15 = vld [vmem:[%s2932_s0 + $0x288] sm:$0xff] }
  0x69   :  { %1630 = vmatmul.msk.f32.gmra.mxu1 %vm63_vm0, %v29_v16  ;;  %v1783_v16 = vld [vmem:[%s2932_s0 + $0x308] sm:$0xff] }
  0x6a   :  { %1666 = vmatmul.msk.f32.gmra.mxu2 %vm63_vm0, %v1646_v17 }
  0x6b   :  { %1702 = vmatmul.msk.f32.gmra.mxu3 %vm63_vm0, %v1682_v18  ;;  %v1819_v18 = vld [vmem:[%s2932_s0 + $0x388] sm:$0xff] }
  0x6e   :  { %1738 = vmatmul.msk.f32.gmra.mxu0 %vm63_vm0, %v1718_v20 }
  0x71   :  { %1631 = vmatmul.msk.f32.gmra.mxu1 %vm63_vm0, %v30_v23 }
  0x72   :  { %1667 = vmatmul.msk.f32.gmra.mxu2 %vm63_vm0, %v1647_v24 }
  0x73   :  { %1703 = vmatmul.msk.f32.gmra.mxu3 %vm63_vm0, %v1683_v25 }
  0x76   :  { %1739 = vmatmul.msk.f32.gmra.mxu0 %vm63_vm0, %v1719_v26 }
  0x79   :  { %1632 = vmatmul.msk.f32.gmra.mxu1 %vm63_vm0, %v31_v28  ;;  %v1784_v28 = vld [vmem:[%s2932_s0 + $0x310] sm:$0xff] }
  0x7a   :  { %1668 = vmatmul.msk.f32.gmra.mxu2 %vm63_vm0, %v1648_v29 }
  0x7b   :  { %1704 = vmatmul.msk.f32.gmra.mxu3 %vm63_vm0, %v1684_v30  ;;  %v1820_v30 = vld [vmem:[%s2932_s0 + $0x390] sm:$0xff] }
  0x7e   :  { %1740 = vmatmul.msk.f32.gmra.mxu0 %vm63_vm0, %v1720_v31 }
  0x81   :  { %1633 = vmatmul.msk.f32.gmra.mxu1 %vm63_vm0, %v32_v32 }
  0x82   :  { %1669 = vmatmul.msk.f32.gmra.mxu2 %vm63_vm0, %v1649_v33 }
  0x83   :  { %1705 = vmatmul.msk.f32.gmra.mxu3 %vm63_vm0, %v1685_v34  ;;  %v1856_v34 = vld [vmem:[%s2932_s0 + $0x410] sm:$0xff] }
  0x86   :  { %v2334_v36 = vpop.f32.mrf.mxu1  ;;  %1741 = vmatmul.msk.f32.gmra.mxu0 %vm63_vm0, %v1721_v35 }
  0x89   :  { %1634 = vmatmul.msk.f32.gmra.mxu1 %vm63_vm0, %v33_v37 }
  0x8a   :  { %1670 = vmatmul.msk.f32.gmra.mxu2 %vm63_vm0, %v1650_v38 }
  0x8b   :  { %1706 = vmatmul.msk.f32.gmra.mxu3 %vm63_vm0, %v1686_v39  ;;  %v129_v40 = vpop.f32.mrf.mxu0 }
  0x8c   :  { %v2352_v42 = vpop.f32.mrf.mxu2 }
  0x8e   :  { %v2354_v43 = vpop.f32.mrf.mxu1  ;;  %v2356_v44 = vpop.f32.mrf.mxu3  ;;  %1742 = vmatmul.msk.f32.gmra.mxu0 %vm63_vm0, %v1722_v41  ;;  %v1785_v41 = vld [vmem:[%s2932_s0 + $0x318] sm:$0xff] }
  0x91   :  { %1635 = vmatmul.msk.f32.gmra.mxu1 %vm63_vm0, %v34_v45 }
  0x92   :  { %1671 = vmatmul.msk.f32.gmra.mxu2 %vm63_vm0, %v1651_v46  ;;  %v1821_v46 = vld [vmem:[%s2932_s0 + $0x398] sm:$0xff] }
  0x93   :  { %1707 = vmatmul.msk.f32.gmra.mxu3 %vm63_vm0, %v1687_v47  ;;  %v132_v48 = vpop.f32.mrf.mxu0 }
  0x94   :  { %v2374_v50 = vpop.f32.mrf.mxu2 }
  0x96   :  { %v2376_v51 = vpop.f32.mrf.mxu1  ;;  %v2378_v52 = vpop.f32.mrf.mxu3  ;;  %1743 = vmatmul.msk.f32.gmra.mxu0 %vm63_vm0, %v1723_v49 }
  0x99   :  { %1636 = vmatmul.msk.f32.gmra.mxu1 %vm63_vm0, %v35_v53  ;;  %v1857_v53 = vld [vmem:[%s2932_s0 + $0x418] sm:$0xff] }
  0x9a   :  { %1672 = vmatmul.msk.f32.gmra.mxu2 %vm63_vm0, %v1652_v54 }
  0x9b   :  { %1708 = vmatmul.msk.f32.gmra.mxu3 %vm63_vm0, %v1688_v55  ;;  %v135_v56 = vpop.f32.mrf.mxu0 }
  0x9d   :  { %v2396_v58 = vpop.f32.mrf.mxu2 }
  0x9e   :  { %v2398_v59 = vpop.f32.mrf.mxu1  ;;  %v2400_v60 = vpop.f32.mrf.mxu3  ;;  %1744 = vmatmul.msk.f32.gmra.mxu0 %vm63_vm0, %v1724_v57 }
  0xa1   :  { %1637 = vmatmul.msk.f32.gmra.mxu1 %vm63_vm0, %v36_v61  ;;  %v1750_v61 = vld [vmem:[%s2932_s0 + $0x2a0] sm:$0xff] }
  0xa2   :  { %1673 = vmatmul.msk.f32.gmra.mxu2 %vm63_vm0, %v1653_v62  ;;  %v1786_v62 = vld [vmem:[%s2932_s0 + $0x320] sm:$0xff] }
  0xa3   :  { %1709 = vmatmul.msk.f32.gmra.mxu3 %vm63_vm0, %v1689_v63  ;;  %v138_v0 = vpop.f32.mrf.mxu0 }
  0xa5   :  { %v2418_v2 = vpop.f32.mrf.mxu2 }
  0xa6   :  { %v2420_v3 = vpop.f32.mrf.mxu3  ;;  %v242_v4 = vpop.f32.mrf.mxu1  ;;  %1745 = vmatmul.msk.f32.gmra.mxu0 %vm63_vm0, %v1725_v1 }
  0xa7   :  { %v243_v8 = vadd.f32 %v242_v4, %v129_v40  ;;  %v1749_v40 = vld [vmem:[%s2932_s0 + $0x298] sm:$0xff] }
  0xa9   :  { %1766 = vmatmul.msk.f32.vlgmr.msra.gmra.mxu1 %vm63_vm0, %v1746_v5 }
  0xaa   :  { %1802 = vmatmul.msk.f32.vlgmr.msra.gmra.mxu2 %vm63_vm0, %v1782_v6  ;;  %v1858_v6 = vld [vmem:[%s2932_s0 + $0x420] sm:$0xff] }
  0xab   :  { %1838 = vmatmul.msk.f32.vlgmr.msra.gmra.mxu3 %vm63_vm0, %v1818_v7  ;;  %v679_v9 = vpop.f32.mrf.mxu0 }
  0xad   :  { %v377_v11 = vpop.f32.mrf.mxu2 }
  0xae   :  { %v425_v12 = vadd.f32 %v377_v11, %v243_v8  ;;  %v245_v13 = vpop.f32.mrf.mxu1  ;;  %v528_v14 = vpop.f32.mrf.mxu3  ;;  %1874 = vmatmul.msk.f32.vlgmr.msra.gmra.mxu0 %vm63_vm0, %v1854_v10  ;;  %v1751_v11 = vld [vmem:[%s2932_s0 + $0x2a8] sm:$0xff] }
  0xaf   :  { %v246_v20 = vadd.f32 %v245_v13, %v132_v48  ;;  %v1823_v13 = vld [vmem:[%s2932_s0 + $0x3a8] sm:$0xff] }
  0xb0   :  { %v576_v17 = vadd.f32 %v528_v14, %v425_v12  ;;  %v1787_v12 = vld [vmem:[%s2932_s0 + $0x328] sm:$0xff] }
  0xb1   :  { %1767 = vmatmul.msk.f32.gmra.mxu1 %vm63_vm0, %v1747_v15 }
  0xb2   :  { %v2448_v19 = vadd.f32 %v679_v9, %v576_v17  ;;  %1803 = vmatmul.msk.f32.gmra.mxu2 %vm63_vm0, %v1783_v16  ;;  %v1859_v17 = vld [vmem:[%s2932_s0 + $0x428] sm:$0xff] }
  0xb3   :  { %1839 = vmatmul.msk.f32.gmra.mxu3 %vm63_vm0, %v1819_v18  ;;  %v682_v21 = vpop.f32.mrf.mxu0 }
  0xb5   :  { %v380_v23 = vpop.f32.mrf.mxu2 }
  0xb6   :  { %v426_v24 = vadd.f32 %v380_v23, %v246_v20  ;;  %v248_v25 = vpop.f32.mrf.mxu1  ;;  %v531_v26 = vpop.f32.mrf.mxu3  ;;  %1875 = vmatmul.msk.f32.gmra.mxu0 %vm63_vm0, %v1855_v22  ;;  %v1752_v23 = vld [vmem:[%s2932_s0 + $0x2b0] sm:$0xff] }
  0xb7   :  { %v249_v32 = vadd.f32 %v248_v25, %v135_v56  ;;  %v1824_v25 = vld [vmem:[%s2932_s0 + $0x3b0] sm:$0xff] }
  0xb8   :  { %v577_v29 = vadd.f32 %v531_v26, %v426_v24  ;;  %v1788_v24 = vld [vmem:[%s2932_s0 + $0x330] sm:$0xff] }
  0xb9   :  { %1768 = vmatmul.msk.f32.gmra.mxu1 %vm63_vm0, %v1748_v27 }
  0xba   :  { %v2466_v31 = vadd.f32 %v682_v21, %v577_v29  ;;  %1804 = vmatmul.msk.f32.gmra.mxu2 %vm63_vm0, %v1784_v28  ;;  %v1860_v29 = vld [vmem:[%s2932_s0 + $0x430] sm:$0xff] }
  0xbb   :  { %1840 = vmatmul.msk.f32.gmra.mxu3 %vm63_vm0, %v1820_v30  ;;  %v685_v33 = vpop.f32.mrf.mxu0 }
  0xbd   :  { %v383_v35 = vpop.f32.mrf.mxu2 }
  0xbe   :  { %v427_v37 = vadd.f32 %v383_v35, %v249_v32  ;;  %v251_v38 = vpop.f32.mrf.mxu1  ;;  %v534_v39 = vpop.f32.mrf.mxu3  ;;  %1876 = vmatmul.msk.f32.gmra.mxu0 %vm63_vm0, %v1856_v34  ;;  %v1753_v35 = vld [vmem:[%s2932_s0 + $0x2b8] sm:$0xff] }
  0xbf   :  { %v252_v48 = vadd.f32 %v251_v38, %v138_v0  ;;  %v1822_v0 = vld [vmem:[%s2932_s0 + $0x3a0] sm:$0xff]  ;;  %v1825_v38 = vld [vmem:[%s2932_s0 + $0x3b8] sm:$0xff] }
  0xc0   :  { %v578_v45 = vadd.f32 %v534_v39, %v427_v37  ;;  %v1789_v37 = vld [vmem:[%s2932_s0 + $0x338] sm:$0xff] }
  0xc1   :  { %1769 = vmatmul.msk.f32.gmra.mxu1 %vm63_vm0, %v1749_v40 }
  0xc2   :  { %v2484_v47 = vadd.f32 %v685_v33, %v578_v45  ;;  %1805 = vmatmul.msk.f32.gmra.mxu2 %vm63_vm0, %v1785_v41  ;;  %v1861_v45 = vld [vmem:[%s2932_s0 + $0x438] sm:$0xff] }
  0xc3   :  { %1841 = vmatmul.msk.f32.gmra.mxu3 %vm63_vm0, %v1821_v46  ;;  %v688_v49 = vpop.f32.mrf.mxu0 }
  0xc5   :  { %v386_v54 = vpop.f32.mrf.mxu2 }
  0xc6   :  { %v428_v55 = vadd.f32 %v386_v54, %v252_v48  ;;  %v254_v56 = vpop.f32.mrf.mxu1  ;;  %v537_v57 = vpop.f32.mrf.mxu3  ;;  %1877 = vmatmul.msk.f32.gmra.mxu0 %vm63_vm0, %v1857_v53  ;;  %v1754_v54 = vld [vmem:[%s2932_s0 + $0x2c0] sm:$0xff] }
  0xc7   :  { %v255_v4 = vadd.f32 %v254_v56, %v2334_v36  ;;  %v1826_v56 = vld [vmem:[%s2932_s0 + $0x3c0] sm:$0xff] }
  0xc8   :  { %v579_v63 = vadd.f32 %v537_v57, %v428_v55  ;;  %v1790_v55 = vld [vmem:[%s2932_s0 + $0x340] sm:$0xff] }
  0xc9   :  { %1770 = vmatmul.msk.f32.gmra.mxu1 %vm63_vm0, %v1750_v61 }
  0xca   :  { %v2502_v1 = vadd.f32 %v688_v49, %v579_v63  ;;  %1806 = vmatmul.msk.f32.gmra.mxu2 %vm63_vm0, %v1786_v62  ;;  %v1862_v63 = vld [vmem:[%s2932_s0 + $0x440] sm:$0xff] }
  0xcb   :  { %1842 = vmatmul.msk.f32.gmra.mxu3 %vm63_vm0, %v1822_v0  ;;  %v691_v5 = vpop.f32.mrf.mxu0 }
  0xcd   :  { %v389_v7 = vpop.f32.mrf.mxu2 }
  0xce   :  { %v429_v8 = vadd.f32 %v389_v7, %v255_v4  ;;  %v257_v9 = vpop.f32.mrf.mxu1  ;;  %v540_v10 = vpop.f32.mrf.mxu3  ;;  %1878 = vmatmul.msk.f32.gmra.mxu0 %vm63_vm0, %v1858_v6  ;;  %v1755_v7 = vld [vmem:[%s2932_s0 + $0x2c8] sm:$0xff] }
  0xcf   :  { %v258_v15 = vadd.f32 %v257_v9, %v2354_v43  ;;  %v1827_v9 = vld [vmem:[%s2932_s0 + $0x3c8] sm:$0xff] }
  0xd0   :  { %v580_v36 = vadd.f32 %v540_v10, %v429_v8  ;;  %v1791_v8 = vld [vmem:[%s2932_s0 + $0x348] sm:$0xff] }
  0xd1   :  { %1771 = vmatmul.msk.f32.gmra.mxu1 %vm63_vm0, %v1751_v11 }
  0xd2   :  { %v2521_v14 = vadd.f32 %v691_v5, %v580_v36  ;;  %1807 = vmatmul.msk.f32.gmra.mxu2 %vm63_vm0, %v1787_v12  ;;  %v1863_v36 = vld [vmem:[%s2932_s0 + $0x448] sm:$0xff] }
  0xd3   :  { %1843 = vmatmul.msk.f32.gmra.mxu3 %vm63_vm0, %v1823_v13  ;;  %v694_v16 = vpop.f32.mrf.mxu0 }
  0xd5   :  { %v392_v18 = vpop.f32.mrf.mxu2 }
  0xd6   :  { %v430_v20 = vadd.f32 %v392_v18, %v258_v15  ;;  %v260_v21 = vpop.f32.mrf.mxu1  ;;  %v543_v22 = vpop.f32.mrf.mxu3  ;;  %1879 = vmatmul.msk.f32.gmra.mxu0 %vm63_vm0, %v1859_v17  ;;  %v1756_v18 = vld [vmem:[%s2932_s0 + $0x2d0] sm:$0xff] }
  0xd7   :  { %v261_v27 = vadd.f32 %v260_v21, %v2376_v51  ;;  %v1828_v21 = vld [vmem:[%s2932_s0 + $0x3d0] sm:$0xff] }
  0xd8   :  { %v581_v43 = vadd.f32 %v543_v22, %v430_v20  ;;  %v1792_v20 = vld [vmem:[%s2932_s0 + $0x350] sm:$0xff] }
  0xd9   :  { %1772 = vmatmul.msk.f32.gmra.mxu1 %vm63_vm0, %v1752_v23 }
  0xda   :  { %v2540_v26 = vadd.f32 %v694_v16, %v581_v43  ;;  %1808 = vmatmul.msk.f32.gmra.mxu2 %vm63_vm0, %v1788_v24  ;;  %v1864_v43 = vld [vmem:[%s2932_s0 + $0x450] sm:$0xff] }
  0xdb   :  { %1844 = vmatmul.msk.f32.gmra.mxu3 %vm63_vm0, %v1824_v25  ;;  %v697_v28 = vpop.f32.mrf.mxu0 }
  0xdd   :  { %v395_v30 = vpop.f32.mrf.mxu2 }
  0xde   :  { %v431_v32 = vadd.f32 %v395_v30, %v261_v27  ;;  %v263_v33 = vpop.f32.mrf.mxu1  ;;  %v546_v34 = vpop.f32.mrf.mxu3  ;;  %1880 = vmatmul.msk.f32.gmra.mxu0 %vm63_vm0, %v1860_v29  ;;  %v1757_v30 = vld [vmem:[%s2932_s0 + $0x2d8] sm:$0xff] }
  0xdf   :  { %v264_v40 = vadd.f32 %v263_v33, %v2398_v59  ;;  %v1829_v33 = vld [vmem:[%s2932_s0 + $0x3d8] sm:$0xff] }
  0xe0   :  { %v582_v51 = vadd.f32 %v546_v34, %v431_v32  ;;  %v1793_v32 = vld [vmem:[%s2932_s0 + $0x358] sm:$0xff] }
  0xe1   :  { %1773 = vmatmul.msk.f32.gmra.mxu1 %vm63_vm0, %v1753_v35 }
  0xe2   :  { %v2559_v39 = vadd.f32 %v697_v28, %v582_v51  ;;  %1809 = vmatmul.msk.f32.gmra.mxu2 %vm63_vm0, %v1789_v37  ;;  %v1865_v51 = vld [vmem:[%s2932_s0 + $0x458] sm:$0xff] }
  0xe3   :  { %1845 = vmatmul.msk.f32.gmra.mxu3 %vm63_vm0, %v1825_v38  ;;  %v700_v41 = vpop.f32.mrf.mxu0 }
  0xe5   :  { %v398_v46 = vpop.f32.mrf.mxu2 }
  0xe6   :  { %v432_v48 = vadd.f32 %v398_v46, %v264_v40  ;;  %v266_v49 = vpop.f32.mrf.mxu1  ;;  %v549_v53 = vpop.f32.mrf.mxu3  ;;  %1881 = vmatmul.msk.f32.gmra.mxu0 %vm63_vm0, %v1861_v45  ;;  %v1758_v46 = vld [vmem:[%s2932_s0 + $0x2e0] sm:$0xff] }
  0xe7   :  { %v267_v61 = vadd.f32 %v266_v49, %v2352_v42  ;;  %v1830_v49 = vld [vmem:[%s2932_s0 + $0x3e0] sm:$0xff] }
  0xe8   :  { %v583_v59 = vadd.f32 %v549_v53, %v432_v48  ;;  %v1794_v48 = vld [vmem:[%s2932_s0 + $0x360] sm:$0xff] }
  0xe9   :  { %1774 = vmatmul.msk.f32.gmra.mxu1 %vm63_vm0, %v1754_v54 }
  0xea   :  { %v2578_v57 = vadd.f32 %v700_v41, %v583_v59  ;;  %1810 = vmatmul.msk.f32.gmra.mxu2 %vm63_vm0, %v1790_v55  ;;  %v1866_v59 = vld [vmem:[%s2932_s0 + $0x460] sm:$0xff] }
  0xeb   :  { %1846 = vmatmul.msk.f32.gmra.mxu3 %vm63_vm0, %v1826_v56  ;;  %v703_v62 = vpop.f32.mrf.mxu0 }
  0xed   :  { %v401_v0 = vpop.f32.mrf.mxu2 }
  0xee   :  { %v433_v4 = vadd.f32 %v401_v0, %v267_v61  ;;  %v269_v5 = vpop.f32.mrf.mxu1  ;;  %v552_v6 = vpop.f32.mrf.mxu3  ;;  %1882 = vmatmul.msk.f32.gmra.mxu0 %vm63_vm0, %v1862_v63  ;;  %v1759_v0 = vld [vmem:[%s2932_s0 + $0x2e8] sm:$0xff] }
  0xef   :  { %v270_v11 = vadd.f32 %v269_v5, %v2374_v50  ;;  %v1831_v5 = vld [vmem:[%s2932_s0 + $0x3e8] sm:$0xff] }
  0xf0   :  { %v584_v42 = vadd.f32 %v552_v6, %v433_v4  ;;  %v1795_v4 = vld [vmem:[%s2932_s0 + $0x368] sm:$0xff] }
  0xf1   :  { %1775 = vmatmul.msk.f32.gmra.mxu1 %vm63_vm0, %v1755_v7 }
  0xf2   :  { %v2597_v10 = vadd.f32 %v703_v62, %v584_v42  ;;  %1811 = vmatmul.msk.f32.gmra.mxu2 %vm63_vm0, %v1791_v8  ;;  %v1867_v42 = vld [vmem:[%s2932_s0 + $0x468] sm:$0xff] }
  0xf3   :  { %1847 = vmatmul.msk.f32.gmra.mxu3 %vm63_vm0, %v1827_v9  ;;  %v706_v12 = vpop.f32.mrf.mxu0 }
  0xf5   :  { %v404_v13 = vpop.f32.mrf.mxu2 }
  0xf6   :  { %v434_v15 = vadd.f32 %v404_v13, %v270_v11  ;;  %v272_v16 = vpop.f32.mrf.mxu1  ;;  %v555_v17 = vpop.f32.mrf.mxu3  ;;  %1883 = vmatmul.msk.f32.gmra.mxu0 %vm63_vm0, %v1863_v36  ;;  %v1760_v13 = vld [vmem:[%s2932_s0 + $0x2f0] sm:$0xff] }
  0xf7   :  { %v273_v23 = vadd.f32 %v272_v16, %v2396_v58  ;;  %v1832_v16 = vld [vmem:[%s2932_s0 + $0x3f0] sm:$0xff] }
  0xf8   :  { %v585_v50 = vadd.f32 %v555_v17, %v434_v15  ;;  %v1796_v15 = vld [vmem:[%s2932_s0 + $0x370] sm:$0xff] }
  0xf9   :  { %1776 = vmatmul.msk.f32.gmra.mxu1 %vm63_vm0, %v1756_v18 }
  0xfa   :  { %v2616_v22 = vadd.f32 %v706_v12, %v585_v50  ;;  %1812 = vmatmul.msk.f32.gmra.mxu2 %vm63_vm0, %v1792_v20  ;;  %v1868_v50 = vld [vmem:[%s2932_s0 + $0x470] sm:$0xff] }
  0xfb   :  { %1848 = vmatmul.msk.f32.gmra.mxu3 %vm63_vm0, %v1828_v21  ;;  %v709_v24 = vpop.f32.mrf.mxu0 }
  0xfd   :  { %v407_v25 = vpop.f32.mrf.mxu2 }
  0xfe   :  { %v435_v27 = vadd.f32 %v407_v25, %v273_v23  ;;  %v275_v28 = vpop.f32.mrf.mxu1  ;;  %v558_v29 = vpop.f32.mrf.mxu3  ;;  %1884 = vmatmul.msk.f32.gmra.mxu0 %vm63_vm0, %v1864_v43  ;;  %v1761_v25 = vld [vmem:[%s2932_s0 + $0x2f8] sm:$0xff] }
  0xff   :  { %v276_v35 = vadd.f32 %v275_v28, %v2418_v2  ;;  %v1833_v28 = vld [vmem:[%s2932_s0 + $0x3f8] sm:$0xff] }
 0x100   :  { %v586_v58 = vadd.f32 %v558_v29, %v435_v27  ;;  %v1797_v27 = vld [vmem:[%s2932_s0 + $0x378] sm:$0xff] }
 0x101   :  { %1777 = vmatmul.msk.f32.gmra.mxu1 %vm63_vm0, %v1757_v30 }
 0x102   :  { %v2635_v34 = vadd.f32 %v709_v24, %v586_v58  ;;  %1813 = vmatmul.msk.f32.gmra.mxu2 %vm63_vm0, %v1793_v32  ;;  %v1869_v58 = vld [vmem:[%s2932_s0 + $0x478] sm:$0xff] }
 0x103   :  { %1849 = vmatmul.msk.f32.gmra.mxu3 %vm63_vm0, %v1829_v33  ;;  %v712_v37 = vpop.f32.mrf.mxu0 }
 0x105   :  { %v410_v38 = vpop.f32.mrf.mxu2 }
 0x106   :  { %v436_v40 = vadd.f32 %v410_v38, %v276_v35  ;;  %v278_v41 = vpop.f32.mrf.mxu1  ;;  %v561_v45 = vpop.f32.mrf.mxu3  ;;  %1885 = vmatmul.msk.f32.gmra.mxu0 %vm63_vm0, %v1865_v51 }
 0x107   :  { %v279_v54 = vadd.f32 %v278_v41, %v2356_v44 }
 0x108   :  { %v587_v2 = vadd.f32 %v561_v45, %v436_v40 }
 0x109   :  { %1778 = vmatmul.msk.f32.gmra.mxu1 %vm63_vm0, %v1758_v46 }
 0x10a   :  { %v2654_v53 = vadd.f32 %v712_v37, %v587_v2  ;;  %1814 = vmatmul.msk.f32.gmra.mxu2 %vm63_vm0, %v1794_v48 }
 0x10b   :  { %1850 = vmatmul.msk.f32.gmra.mxu3 %vm63_vm0, %v1830_v49  ;;  %v715_v55 = vpop.f32.mrf.mxu0 }
 0x10d   :  { %v413_v56 = vpop.f32.mrf.mxu2 }
 0x10e   :  { %v437_v61 = vadd.f32 %v413_v56, %v279_v54  ;;  %v281_v62 = vpop.f32.mrf.mxu1  ;;  %v564_v63 = vpop.f32.mrf.mxu3  ;;  %1886 = vmatmul.msk.f32.gmra.mxu0 %vm63_vm0, %v1866_v59 }
 0x10f   :  { %v282_v7 = vadd.f32 %v281_v62, %v2378_v52 }
 0x110   :  { %v588_v44 = vadd.f32 %v564_v63, %v437_v61 }
 0x111   :  { %1779 = vmatmul.msk.f32.gmra.mxu1 %vm63_vm0, %v1759_v0 }
 0x112   :  { %v2673_v6 = vadd.f32 %v715_v55, %v588_v44  ;;  %1815 = vmatmul.msk.f32.gmra.mxu2 %vm63_vm0, %v1795_v4 }
 0x113   :  { %1851 = vmatmul.msk.f32.gmra.mxu3 %vm63_vm0, %v1831_v5  ;;  %v718_v8 = vpop.f32.mrf.mxu0 }
 0x115   :  { %v416_v9 = vpop.f32.mrf.mxu2 }
 0x116   :  { %v438_v11 = vadd.f32 %v416_v9, %v282_v7  ;;  %v284_v12 = vpop.f32.mrf.mxu1  ;;  %v567_v36 = vpop.f32.mrf.mxu3  ;;  %1887 = vmatmul.msk.f32.gmra.mxu0 %vm63_vm0, %v1867_v42 }
 0x117   :  { %v285_v18 = vadd.f32 %v284_v12, %v2400_v60 }
 0x118   :  { %v589_v52 = vadd.f32 %v567_v36, %v438_v11 }
 0x119   :  { %1780 = vmatmul.msk.f32.gmra.mxu1 %vm63_vm0, %v1760_v13 }
 0x11a   :  { %v2692_v17 = vadd.f32 %v718_v8, %v589_v52  ;;  %1816 = vmatmul.msk.f32.gmra.mxu2 %vm63_vm0, %v1796_v15 }
 0x11b   :  { %1852 = vmatmul.msk.f32.gmra.mxu3 %vm63_vm0, %v1832_v16  ;;  %v721_v20 = vpop.f32.mrf.mxu0 }
 0x11d   :  { %v419_v21 = vpop.f32.mrf.mxu2 }
 0x11e   :  { %v439_v23 = vadd.f32 %v419_v21, %v285_v18  ;;  %v287_v24 = vpop.f32.mrf.mxu1  ;;  %v570_v43 = vpop.f32.mrf.mxu3  ;;  %1888 = vmatmul.msk.f32.gmra.mxu0 %vm63_vm0, %v1868_v50 }
 0x11f   :  { %v288_v30 = vadd.f32 %v287_v24, %v2420_v3 }
 0x120   :  { %v590_v60 = vadd.f32 %v570_v43, %v439_v23 }
 0x121   :  { %1781 = vmatmul.msk.f32.gmra.mxu1 %vm63_vm0, %v1761_v25 }
 0x122   :  { %v2711_v29 = vadd.f32 %v721_v20, %v590_v60  ;;  %1817 = vmatmul.msk.f32.gmra.mxu2 %vm63_vm0, %v1797_v27 }
 0x123   :  { %1853 = vmatmul.msk.f32.gmra.mxu3 %vm63_vm0, %v1833_v28  ;;  %v724_v32 = vpop.f32.mrf.mxu0 }
 0x125   :  { %v422_v33 = vpop.f32.mrf.mxu2 }
 0x126   :  { %v440_v35 = vadd.f32 %v422_v33, %v288_v30  ;;  %v573_v37 = vpop.f32.mrf.mxu3  ;;  %v830_v51 = vpop.f32.mrf.mxu1  ;;  %1889 = vmatmul.msk.f32.gmra.mxu0 %vm63_vm0, %v1869_v58 }
 0x127   :  { %v878_v40 = vadd.f32 %v830_v51, %v2448_v19 }
 0x128   :  { %v591_v38 = vadd.f32 %v573_v37, %v440_v35 }
 0x12a   :  { %v2722_v41 = vadd.f32 %v724_v32, %v591_v38 }
 0x12b   :  { %v1283_v45 = vpop.f32.mrf.mxu0 }
 0x12d   :  { %v981_v3 = vpop.f32.mrf.mxu2 }
 0x12e   :  { %v1029_v46 = vadd.f32 %v981_v3, %v878_v40  ;;  %v833_v48 = vpop.f32.mrf.mxu1  ;;  %v1132_v2 = vpop.f32.mrf.mxu3 }
 0x12f   :  { %v879_v49 = vadd.f32 %v833_v48, %v2466_v31 }
 0x130   :  { %v1180_v54 = vadd.f32 %v1132_v2, %v1029_v46 }
 0x132   :  { %v2725_v55 = vadd.f32 %v1283_v45, %v1180_v54 }
 0x133   :  { %v1286_v59 = vpop.f32.mrf.mxu0 }
 0x135   :  { %v984_v56 = vpop.f32.mrf.mxu2 }
 0x136   :  { %v1030_v61 = vadd.f32 %v984_v56, %v879_v49  ;;  %v836_v62 = vpop.f32.mrf.mxu1  ;;  %v1135_v63 = vpop.f32.mrf.mxu3 }
 0x137   :  { %v880_v0 = vadd.f32 %v836_v62, %v2484_v47 }
 0x138   :  { %v1181_v19 = vadd.f32 %v1135_v63, %v1030_v61 }
 0x13a   :  { %v1332_v4 = vadd.f32 %v1286_v59, %v1181_v19 }
 0x13b   :  { %v1289_v44 = vpop.f32.mrf.mxu0 }
 0x13d   :  { %v987_v5 = vpop.f32.mrf.mxu2 }
 0x13e   :  { %v1031_v7 = vadd.f32 %v987_v5, %v880_v0  ;;  %v839_v8 = vpop.f32.mrf.mxu1  ;;  %v1138_v42 = vpop.f32.mrf.mxu3 }
 0x13f   :  { %v881_v9 = vadd.f32 %v839_v8, %v2502_v1  ;;  %v2741_v8 = vld [vmem:[%s2934_s2] ss:$0 sm:$0xff] }
 0x140   :  { %v1182_v31 = vadd.f32 %v1138_v42, %v1031_v7 }
 0x142   :  { %v1333_v11 = vadd.f32 %v1289_v44, %v1182_v31 }
 0x143   :  { %v1292_v12 = vpop.f32.mrf.mxu0 }
 0x145   :  { %v990_v36 = vpop.f32.mrf.mxu2 }
 0x146   :  { %v1032_v13 = vadd.f32 %v990_v36, %v881_v9  ;;  %v842_v15 = vpop.f32.mrf.mxu1  ;;  %v1141_v52 = vpop.f32.mrf.mxu3  ;;  %v2746_v36 = vadd.f32 %v2741_v8, %v1332_v4 }
 0x147   :  { %v882_v16 = vadd.f32 %v842_v15, %v2521_v14  ;;  %v2750_v15 = vadd.f32 %v2741_v8, %v2725_v55 }
 0x148   :  { %v1183_v18 = vadd.f32 %v1141_v52, %v1032_v13 }
 0x14a   :  { %v1334_v47 = vadd.f32 %v1292_v12, %v1183_v18 }
 0x14b   :  { %v1295_v20 = vpop.f32.mrf.mxu0 }
 0x14d   :  { %v993_v50 = vpop.f32.mrf.mxu2 }
 0x14e   :  { %v1033_v21 = vadd.f32 %v993_v50, %v882_v16  ;;  %v845_v23 = vpop.f32.mrf.mxu1  ;;  %v1144_v24 = vpop.f32.mrf.mxu3  ;;  %v2753_v16 = vadd.f32 %v2741_v8, %v1333_v11  ;;  %v1367_v11 = vsel %vm63_vm0, %v2750_v15, 0.0 }
 0x14f   :  { %v883_v0 = vadd.f32 %v845_v23, %v2540_v26 }
 0x150   :  { %v1184_v43 = vadd.f32 %v1144_v24, %v1033_v21  ;;  %v1368_v21 = vsel %vm63_vm0, %v2746_v36, 0.0 }
 0x152   :  { %v1335_v25 = vadd.f32 %v1295_v20, %v1184_v43  ;;  %v2757_v20 = vadd.f32 %v2741_v8, %v1334_v47  ;;  %v1370_v47 = vsel %vm63_vm0, %v2753_v16, 0.0 }
 0x153   :  { %v1298_v27 = vpop.f32.mrf.mxu0 }
 0x154   :  { %v2765_v43 = vadd.f32 %v2741_v8, %v1335_v25 }
 0x155   :  { %v996_v1 = vpop.f32.mrf.mxu2 }
 0x156   :  { %v848_v60 = vpop.f32.mrf.mxu1  ;;  %v1147_v28 = vpop.f32.mrf.mxu3  ;;  %v1034_v5 = vadd.f32 %v996_v1, %v883_v0 }
 0x157   :  { %v884_v7 = vadd.f32 %v848_v60, %v2559_v39 }
 0x158   :  { %v1185_v26 = vadd.f32 %v1147_v28, %v1034_v5 }
 0x15a   :  { %v1336_v23 = vadd.f32 %v1298_v27, %v1185_v26  ;;  %v1372_v27 = vsel %vm63_vm0, %v2757_v20, 0.0 }
 0x15b   :  { %v1301_v30 = vpop.f32.mrf.mxu0 }
 0x15d   :  { %v999_v32 = vpop.f32.mrf.mxu2 }
 0x15e   :  { %v851_v58 = vpop.f32.mrf.mxu1  ;;  %v1150_v33 = vpop.f32.mrf.mxu3  ;;  %v1035_v9 = vadd.f32 %v999_v32, %v884_v7  ;;  %v1369_v32 = vadd.f32 %v1368_v21, %v1367_v11  ;;  %v1937_v11 = vmov 128.0  }
 0x15f   :  { %v885_v42 = vadd.f32 %v851_v58, %v2578_v57  ;;  %1907 = vrcp.f32 %v1937_v11 }
 0x160   :  { %v1186_v18 = vadd.f32 %v1150_v33, %v1035_v9 }
 0x162   :  { %v1337_v1 = vadd.f32 %v1301_v30, %v1186_v18  ;;  %v1374_v30 = vsel %vm63_vm0, %v2765_v43, 0.0 }
 0x163   :  { %v1304_v35 = vpop.f32.mrf.mxu0 }
 0x165   :  { %v1002_v37 = vpop.f32.mrf.mxu2 }
 0x166   :  { %v854_v14 = vpop.f32.mrf.mxu1  ;;  %v1153_v51 = vpop.f32.mrf.mxu3  ;;  %v1036_v31 = vadd.f32 %v1002_v37, %v885_v42 }
 0x167   :  { %v886_v12 = vadd.f32 %v854_v14, %v2597_v10 }
 0x168   :  { %v1187_v10 = vadd.f32 %v1153_v51, %v1036_v31  ;;  %v1371_v51 = vadd.f32 %v1370_v47, %v1369_v32 }
 0x16a   :  { %v1338_v58 = vadd.f32 %v1304_v35, %v1187_v10 }
 0x16b   :  { %v1307_v38 = vpop.f32.mrf.mxu0 }
 0x16d   :  { %v1005_v40 = vpop.f32.mrf.mxu2 }
 0x16e   :  { %v857_v45 = vpop.f32.mrf.mxu1  ;;  %v1156_v3 = vpop.f32.mrf.mxu3  ;;  %v1037_v39 = vadd.f32 %v1005_v40, %v886_v12 }
 0x16f   :  { %v887_v57 = vadd.f32 %v857_v45, %v2616_v22 }
 0x170   :  { %v1188_v22 = vadd.f32 %v1156_v3, %v1037_v39 }
 0x172   :  { %v1339_v40 = vadd.f32 %v1307_v38, %v1188_v22 }
 0x173   :  { %v2730_v46 = vpop.f32.mrf.mxu0 }
 0x174   :  { %v2789_v5 = vadd.f32 %v2741_v8, %v1339_v40 }
 0x175   :  { %v1008_v48 = vpop.f32.mrf.mxu2 }
 0x176   :  { %v860_v2 = vpop.f32.mrf.mxu1  ;;  %v1159_v49 = vpop.f32.mrf.mxu3  ;;  %v1038_v55 = vadd.f32 %v1008_v48, %v887_v57  ;;  %v1382_v39 = vsel %vm63_vm0, %v2789_v5, 0.0 }
 0x177   :  { %v888_v24 = vadd.f32 %v860_v2, %v2635_v34  ;;  %v2773_v34 = vadd.f32 %v2741_v8, %v1336_v23  ;;  %v1373_v2 = vadd.f32 %v1372_v27, %v1371_v51 }
 0x178   :  { %v1189_v33 = vadd.f32 %v1159_v49, %v1038_v55  ;;  %v2783_v49 = vadd.f32 %v2741_v8, %v1338_v58 }
 0x17a   :  { %v1380_v9 = vsel %vm63_vm0, %v2783_v49, 0.0 }
 0x17b   :  { %v2732_v54 = vpop.f32.mrf.mxu0 }
 0x17d   :  { %v1011_v59 = vpop.f32.mrf.mxu2 }
 0x17e   :  { %v863_v56 = vpop.f32.mrf.mxu1  ;;  %v1162_v61 = vpop.f32.mrf.mxu3  ;;  %v1039_v60 = vadd.f32 %v1011_v59, %v888_v24 }
 0x17f   :  { %v889_v28 = vadd.f32 %v863_v56, %v2654_v53  ;;  %v2779_v53 = vadd.f32 %v2741_v8, %v1337_v1  ;;  %v1376_v56 = vsel %vm63_vm0, %v2773_v34, 0.0 }
 0x180   :  { %v1190_v3 = vadd.f32 %v1162_v61, %v1039_v60 }
 0x182   :  { %v1341_v61 = vadd.f32 %v2732_v54, %v1190_v3 }
 0x183   :  { %v2734_v62 = vpop.f32.mrf.mxu0 }
 0x184   :  { %v2804_v54 = vadd.f32 %v2741_v8, %v1341_v61 }
 0x185   :  { %v1014_v63 = vpop.f32.mrf.mxu2 }
 0x186   :  { %v866_v19 = vpop.f32.mrf.mxu1  ;;  %v1165_v44 = vpop.f32.mrf.mxu3  ;;  %v1040_v37 = vadd.f32 %v1014_v63, %v889_v28  ;;  %v1340_v63 = vadd.f32 %v2730_v46, %v1189_v33  ;;  %v1386_v22 = vsel %vm63_vm0, %v2804_v54, 0.0 }
 0x187   :  { %v890_v25 = vadd.f32 %v866_v19, %v2673_v6  ;;  %v1375_v19 = vadd.f32 %v1374_v30, %v1373_v2 }
 0x188   :  { %v1191_v38 = vadd.f32 %v1165_v44, %v1040_v37  ;;  %v2797_v31 = vadd.f32 %v2741_v8, %v1340_v63 }
 0x189   :  { %v1377_v42 = vadd.f32 %v1376_v56, %v1375_v19 }
 0x18a   :  { %v1342_v46 = vadd.f32 %v2734_v62, %v1191_v38  ;;  %v1384_v21 = vsel %vm63_vm0, %v2797_v31, 0.0 }
 0x18b   :  { %v1319_v13 = vpop.f32.mrf.mxu0 }
 0x18c   :  { %v2809_v62 = vadd.f32 %v2741_v8, %v1342_v46 }
 0x18d   :  { %v1017_v52 = vpop.f32.mrf.mxu2 }
 0x18e   :  { %v869_v4 = vpop.f32.mrf.mxu1  ;;  %v1168_v50 = vpop.f32.mrf.mxu3  ;;  %v1041_v48 = vadd.f32 %v1017_v52, %v890_v25  ;;  %v1388_v60 = vsel %vm63_vm0, %v2809_v62, 0.0 }
 0x18f   :  { %v891_v35 = vadd.f32 %v869_v4, %v2692_v17  ;;  %v1378_v17 = vsel %vm63_vm0, %v2779_v53, 0.0 }
 0x190   :  { %v1192_v7 = vadd.f32 %v1168_v50, %v1041_v48  ;;  %v1379_v26 = vadd.f32 %v1378_v17, %v1377_v42 }
 0x192   :  { %v1343_v57 = vadd.f32 %v1319_v13, %v1192_v7  ;;  %v1381_v4 = vadd.f32 %v1380_v9, %v1379_v26 }
 0x193   :  { %v1322_v14 = vpop.f32.mrf.mxu0 }
 0x194   :  { %v1383_v55 = vadd.f32 %v1382_v39, %v1381_v4  ;;  %v2814_v13 = vadd.f32 %v2741_v8, %v1343_v57 }
 0x195   :  { %v1020_v45 = vpop.f32.mrf.mxu2 }
 0x196   :  { %v872_v59 = vpop.f32.mrf.mxu1  ;;  %v1171_v6 = vpop.f32.mrf.mxu3  ;;  %v1042_v0 = vadd.f32 %v1020_v45, %v891_v35  ;;  %v1385_v1 = vadd.f32 %v1384_v21, %v1383_v55  ;;  %v1390_v33 = vsel %vm63_vm0, %v2814_v13, 0.0 }
 0x197   :  { %v892_v44 = vadd.f32 %v872_v59, %v2711_v29 }
 0x198   :  { %v1193_v12 = vadd.f32 %v1171_v6, %v1042_v0  ;;  %v1387_v27 = vadd.f32 %v1386_v22, %v1385_v1 }
 0x19a   :  { %v1344_v29 = vadd.f32 %v1322_v14, %v1193_v12  ;;  %v1908_v14 = vpop.eup %1907  ;;  %v1389_v51 = vadd.f32 %v1388_v60, %v1387_v27 }
 0x19b   :  { %v1325_v18 = vpop.f32.mrf.mxu0  ;;  %v1405_v2 = vmul.f32 128.0, %v1908_v14  ;;  %vm1409_vm1 = vweird.f32 %v1908_v14 }
 0x19c   :  { %v2819_v28 = vadd.f32 %v2741_v8, %v1344_v29  ;;  %v1391_v48 = vadd.f32 %v1390_v33, %v1389_v51 }
 0x19d   :  { %v1023_v52 = vpop.f32.mrf.mxu2  ;;  %v1406_v38 = vsub.f32 1.0, %v1405_v2 }
 0x19e   :  { %v1043_v10 = vadd.f32 %v1023_v52, %v892_v44  ;;  %v1174_v50 = vpop.f32.mrf.mxu3  ;;  %v875_v24 = vpop.f32.mrf.mxu1  ;;  %v1392_v45 = vsel %vm63_vm0, %v2819_v28, 0.0 }
 0x19f   :  { %v893_v32 = vadd.f32 %v875_v24, %v2722_v41  ;;  %v1393_v59 = vadd.f32 %v1392_v45, %v1391_v48  ;;  %v1407_v17 = vmul.f32 %v1908_v14, %v1406_v38 }
 0x1a0   :  { %v1194_v23 = vadd.f32 %v1174_v50, %v1043_v10 }
 0x1a1   :  { %v1408_v42 = vadd.f32 %v1908_v14, %v1407_v17 }
 0x1a2   :  { %v1345_v47 = vadd.f32 %v1325_v18, %v1194_v23 }
 0x1a3   :  { %v1328_v40 = vpop.f32.mrf.mxu0  ;;  %v2836_v44 = vsel %vm1409_vm1, %v1908_v14, %v1408_v42 }
 0x1a4   :  { %v2825_v37 = vadd.f32 %v2741_v8, %v1345_v47 }
 0x1a5   :  { %v1026_v58 = vpop.f32.mrf.mxu2 }
 0x1a6   :  { %v1044_v25 = vadd.f32 %v1026_v58, %v893_v32  ;;  %v1177_v30 = vpop.f32.mrf.mxu3  ;;  %v1394_v41 = vsel %vm63_vm0, %v2825_v37, 0.0 }
 0x1a7   :  { %v1395_v56 = vadd.f32 %v1394_v41, %v1393_v59 }
 0x1a8   :  { %v1195_v3 = vadd.f32 %v1177_v30, %v1044_v25 }
 0x1aa   :  { %v1346_v35 = vadd.f32 %v1328_v40, %v1195_v3 }
 0x1ac   :  { %v2832_v6 = vadd.f32 %v2741_v8, %v1346_v35 }
 0x1ae   :  { %v1396_v63 = vsel %vm63_vm0, %v2832_v6, 0.0 }
 0x1af   :  { %v1397_v0 = vadd.f32 %v1396_v63, %v1395_v56 }
 0x1b1   :  { %v1398_v19 = vrot.slane %v1397_v0, 4 }
 0x1b3   :  { %v1399_v61 = vadd.f32 %v1398_v19, %v1397_v0 }
 0x1b5   :  { %v1400_v7 = vrot.slane %v1399_v61, 2 }
 0x1b7   :  { %v1401_v9 = vadd.f32 %v1400_v7, %v1399_v61 }
 0x1b9   :  { %v1402_v46 = vrot.slane %v1401_v9, 1 }
 0x1bb   :  { %v1403_v12 = vadd.f32 %v1402_v46, %v1401_v9 }
 0x1bd   :  { %v2839_v8 = vmul.f32 %v2836_v44, %v1403_v12 }
 0x1bf   :  { %v1412_v26 = vsub.f32 %v2750_v15, %v2839_v8  ;;  %v1413_v39 = vsub.f32 %v2746_v36, %v2839_v8  ;;  %v1414_v52 = vsub.f32 %v2753_v16, %v2839_v8  ;;  %v1415_v18 = vsub.f32 %v2757_v20, %v2839_v8 }
 0x1c0   :  { %v1416_v4 = vsub.f32 %v2765_v43, %v2839_v8  ;;  %v1417_v21 = vsub.f32 %v2773_v34, %v2839_v8  ;;  %v1418_v11 = vsub.f32 %v2779_v53, %v2839_v8  ;;  %v1419_v60 = vsub.f32 %v2783_v49, %v2839_v8 }
 0x1c1   :  { %v1428_v57 = vmul.f32 %v1412_v26, %v1412_v26  ;;  %v1429_v10 = vmul.f32 %v1413_v39, %v1413_v39  ;;  %v1430_v50 = vmul.f32 %v1414_v52, %v1414_v52  ;;  %v1431_v29 = vmul.f32 %v1415_v18, %v1415_v18 }
 0x1c2   :  { %v1432_v22 = vmul.f32 %v1416_v4, %v1416_v4  ;;  %v1433_v32 = vmul.f32 %v1417_v21, %v1417_v21  ;;  %v1420_v33 = vsub.f32 %v2789_v5, %v2839_v8  ;;  %v1434_v25 = vmul.f32 %v1418_v11, %v1418_v11 }
 0x1c3   :  { %v1444_v23 = vsel %vm63_vm0, %v1428_v57, 0.0  ;;  %v1445_v55 = vsel %vm63_vm0, %v1429_v10, 0.0  ;;  %v1447_v47 = vsel %vm63_vm0, %v1430_v50, 0.0  ;;  %v1449_v27 = vsel %vm63_vm0, %v1431_v29, 0.0 }
 0x1c4   :  { %v1446_v24 = vadd.f32 %v1445_v55, %v1444_v23  ;;  %v1451_v14 = vsel %vm63_vm0, %v1432_v22, 0.0  ;;  %v1421_v30 = vsub.f32 %v2797_v31, %v2839_v8  ;;  %v1435_v40 = vmul.f32 %v1419_v60, %v1419_v60 }
 0x1c5   :  { %v1453_v45 = vsel %vm63_vm0, %v1433_v32, 0.0  ;;  %v1422_v48 = vsub.f32 %v2804_v54, %v2839_v8  ;;  %v1436_v41 = vmul.f32 %v1420_v33, %v1420_v33  ;;  %v1455_v35 = vsel %vm63_vm0, %v1434_v25, 0.0 }
 0x1c6   :  { %v1448_v1 = vadd.f32 %v1447_v47, %v1446_v24  ;;  %v1423_v59 = vsub.f32 %v2809_v62, %v2839_v8  ;;  %v1437_v56 = vmul.f32 %v1421_v30, %v1421_v30  ;;  %v1457_v63 = vsel %vm63_vm0, %v1435_v40, 0.0 }
 0x1c7   :  { %v1424_v0 = vsub.f32 %v2814_v13, %v2839_v8  ;;  %v1438_v19 = vmul.f32 %v1422_v48, %v1422_v48  ;;  %v1459_v17 = vsel %vm63_vm0, %v1436_v41, 0.0  ;;  %v1425_v7 = vsub.f32 %v2819_v28, %v2839_v8  ;;  %v1482_v41 = vld [vmem:[%s2935_s3] sm:$0x1]  ;;  %s1938_s3 = smov [#allocation2]  }
 0x1c8   :  { %v1450_v58 = vadd.f32 %v1449_v27, %v1448_v1  ;;  %v1439_v42 = vmul.f32 %v1423_v59, %v1423_v59  ;;  %v1461_v9 = vsel %vm63_vm0, %v1437_v56, 0.0  ;;  %v1426_v12 = vsub.f32 %v2825_v37, %v2839_v8 }
 0x1c9   :  { %v1440_v26 = vmul.f32 %v1424_v0, %v1424_v0  ;;  %v1463_v39 = vsel %vm63_vm0, %v1438_v19, 0.0  ;;  %v1427_v18 = vsub.f32 %v2832_v6, %v2839_v8  ;;  %v1441_v57 = vmul.f32 %v1425_v7, %v1425_v7 }
 0x1ca   :  { %v1452_v51 = vadd.f32 %v1451_v14, %v1450_v58  ;;  %v1465_v10 = vsel %vm63_vm0, %v1439_v42, 0.0  ;;  %v1442_v50 = vmul.f32 %v1426_v12, %v1426_v12 }
 0x1cb   :  { %v1467_v21 = vsel %vm63_vm0, %v1440_v26, 0.0  ;;  %v1443_v23 = vmul.f32 %v1427_v18, %v1427_v18  ;;  %v1469_v55 = vsel %vm63_vm0, %v1441_v57, 0.0 }
 0x1cc   :  { %v1454_v3 = vadd.f32 %v1453_v45, %v1452_v51  ;;  %v1471_v11 = vsel %vm63_vm0, %v1442_v50, 0.0 }
 0x1cd   :  { %v1473_v47 = vsel %vm63_vm0, %v1443_v23, 0.0 }
 0x1ce   :  { %v1456_v2 = vadd.f32 %v1455_v35, %v1454_v3 }
 0x1d0   :  { %v1458_v38 = vadd.f32 %v1457_v63, %v1456_v2 }
 0x1d2   :  { %v1460_v61 = vadd.f32 %v1459_v17, %v1458_v38 }
 0x1d4   :  { %v1462_v46 = vadd.f32 %v1461_v9, %v1460_v61 }
 0x1d6   :  { %v1464_v52 = vadd.f32 %v1463_v39, %v1462_v46 }
 0x1d8   :  { %v1466_v4 = vadd.f32 %v1465_v10, %v1464_v52 }
 0x1da   :  { %v1468_v29 = vadd.f32 %v1467_v21, %v1466_v4 }
 0x1dc   :  { %v1470_v24 = vadd.f32 %v1469_v55, %v1468_v29 }
 0x1de   :  { %v1472_v22 = vadd.f32 %v1471_v11, %v1470_v24 }
 0x1e0   :  { %v1474_v1 = vadd.f32 %v1473_v47, %v1472_v22 }
 0x1e2   :  { %v1475_v60 = vrot.slane %v1474_v1, 4 }
 0x1e4   :  { %v1476_v32 = vadd.f32 %v1475_v60, %v1474_v1 }
 0x1e6   :  { %v1477_v27 = vrot.slane %v1476_v32, 2 }
 0x1e8   :  { %v1478_v58 = vadd.f32 %v1477_v27, %v1476_v32 }
 0x1ea   :  { %v1479_v33 = vrot.slane %v1478_v58, 1 }
 0x1ec   :  { %v1480_v25 = vadd.f32 %v1479_v33, %v1478_v58 }
 0x1ee   :  { %v1481_v14 = vmul.f32 %v1480_v25, %v2836_v44  ;;  %v1495_v44 = vld [vmem:[%s2936_s4] sm:$0x1]  ;;  %s1572_s4 = sshll.u32 %s1938_s3, 4  ;;  %s1573_s4 = int_to_ptr.vmem [resolvable:$true] %s1572_s4 }
 0x1f0   :  { %v1483_v51 = vadd.f32 1e-05, %v1481_v14 }
 0x1f2   :  { %1909 = vrsqrt.f32 %v1483_v51  ;;  %vm1490_vm3 = vweird.f32 %v1483_v51 }
 0x1f8   :  { %v1910_v30 = vpop.eup %1909 }
 0x1f9   :  { %v1485_v40 = vmul.f32 %v1910_v30, %v1483_v51  ;;  %vm1491_vm2 = vweird.f32 %v1910_v30 }
 0x1fa   :  { %vm1492_vm4 = vmor %vm1490_vm3, %vm1491_vm2 }
 0x1fb   :  { %v1486_v45 = vmul.f32 %v1910_v30, %v1485_v40 }
 0x1fd   :  { %v1487_v3 = vmul.f32 0.5, %v1486_v45 }
 0x1ff   :  { %v1488_v48 = vsub.f32 1.5, %v1487_v3 }
 0x201   :  { %v1489_v35 = vmul.f32 %v1910_v30, %v1488_v48 }
 0x203   :  { %v1493_v2 = vsel %vm1492_vm4, %v1910_v30, %v1489_v35 }
 0x204   :  { %v1494_v59 = vmul.f32 %v1493_v2, %v1482_v41 }
 0x206   :  { %v1496_v56 = vmul.f32 %v1494_v59, %v2839_v8  ;;  %v1499_v63 = vperm.slane %v1494_v59, 0 }
 0x208   :  { %v1497_v38 = vsub.f32 %v1495_v44, %v1496_v56  ;;  %v1516_v0 = vmul.f32 %v1499_v63, %v2832_v6  ;;  %v1501_v17 = vmul.f32 %v1499_v63, %v2750_v15  ;;  %v1502_v61 = vmul.f32 %v1499_v63, %v2746_v36 }
 0x209   :  { %v1503_v7 = vmul.f32 %v1499_v63, %v2753_v16  ;;  %v1504_v42 = vmul.f32 %v1499_v63, %v2757_v20  ;;  %v1505_v46 = vmul.f32 %v1499_v63, %v2765_v43  ;;  %v1506_v26 = vmul.f32 %v1499_v63, %v2773_v34 }
 0x20a   :  { %v1518_v19 = vperm.slane %v1497_v38, 0  ;;  %v1507_v6 = vmul.f32 %v1499_v63, %v2779_v53  ;;  %v1508_v15 = vmul.f32 %v1499_v63, %v2783_v49  ;;  %v1509_v16 = vmul.f32 %v1499_v63, %v2789_v5 }
 0x20b   :  { %v1510_v20 = vmul.f32 %v1499_v63, %v2797_v31  ;;  %v1511_v29 = vmul.f32 %v1499_v63, %v2804_v54  ;;  %v1512_v49 = vmul.f32 %v1499_v63, %v2809_v62  ;;  %v1513_v5 = vmul.f32 %v1499_v63, %v2814_v13 }
 0x20c   :  { %v1535_v9 = vadd.f32 %v1518_v19, %v1516_v0  ;;  %v1520_v12 = vadd.f32 %v1518_v19, %v1501_v17  ;;  %v1521_v8 = vadd.f32 %v1518_v19, %v1502_v61  ;;  %v1522_v39 = vadd.f32 %v1518_v19, %v1503_v7 }
 0x20d   :  { %v1523_v52 = vadd.f32 %v1518_v19, %v1504_v42  ;;  %v1524_v57 = vadd.f32 %v1518_v19, %v1505_v46  ;;  %v1525_v36 = vadd.f32 %v1518_v19, %v1506_v26  ;;  %v1526_v43 = vadd.f32 %v1518_v19, %v1507_v6 }
 0x20e   :  { %v1551_v18 = vmax.f32 %v1535_v9, 0.0  ;;  %v1536_v10 = vmax.f32 %v1520_v12, 0.0  ;;  %v1527_v4 = vadd.f32 %v1518_v19, %v1508_v15  ;;  %v1537_v34 = vmax.f32 %v1521_v8, 0.0 }
 0x20f   :  { %v1538_v50 = vmax.f32 %v1522_v39, 0.0  ;;  %v1539_v21 = vmax.f32 %v1523_v52, 0.0  ;;  %v1528_v23 = vadd.f32 %v1518_v19, %v1509_v16  ;;  %v1540_v53 = vmax.f32 %v1524_v57, 0.0 }
 0x210   :  { %1567 = vst.msk [vmem:[#allocation2 + $0x78] sm:$0xff] %vm63_vm0, %v1551_v18  ;;  %v1529_v55 = vadd.f32 %v1518_v19, %v1510_v20  ;;  %v1541_v24 = vmax.f32 %v1525_v36, 0.0  ;;  %v1530_v31 = vadd.f32 %v1518_v19, %v1511_v29  ;;  %v1542_v11 = vmax.f32 %v1526_v43, 0.0 }
 0x211   :  { %1552 = vst.msk [vmem:[#allocation2] sm:$0xff] %vm63_vm0, %v1536_v10  ;;  %v1514_v22 = vmul.f32 %v1499_v63, %v2819_v28  ;;  %v1531_v47 = vadd.f32 %v1518_v19, %v1512_v49  ;;  %v1543_v54 = vmax.f32 %v1527_v4, 0.0  ;;  %v1515_v1 = vmul.f32 %v1499_v63, %v2825_v37 }
 0x212   :  { %1553 = vst.msk [vmem:[#allocation2 + $0x8] sm:$0xff] %vm63_vm0, %v1537_v34  ;;  %v1532_v60 = vadd.f32 %v1518_v19, %v1513_v5  ;;  %v1544_v62 = vmax.f32 %v1528_v23, 0.0  ;;  %v1545_v27 = vmax.f32 %v1529_v55, 0.0  ;;  %v1546_v58 = vmax.f32 %v1530_v31, 0.0 }
 0x213   :  { %1554 = vst.msk [vmem:[#allocation2 + $0x10] sm:$0xff] %vm63_vm0, %v1538_v50  ;;  %v1533_v32 = vadd.f32 %v1518_v19, %v1514_v22  ;;  %v1534_v13 = vadd.f32 %v1518_v19, %v1515_v1  ;;  %v1547_v33 = vmax.f32 %v1531_v47, 0.0 }
 0x214   :  { %1555 = vst.msk [vmem:[#allocation2 + $0x18] sm:$0xff] %vm63_vm0, %v1539_v21  ;;  %v1548_v28 = vmax.f32 %v1532_v60, 0.0 }
 0x215   :  { %1556 = vst.msk [vmem:[#allocation2 + $0x20] sm:$0xff] %vm63_vm0, %v1540_v53  ;;  %v1549_v37 = vmax.f32 %v1533_v32, 0.0  ;;  %v1550_v25 = vmax.f32 %v1534_v13, 0.0 }
 0x216   :  { %1557 = vst.msk [vmem:[#allocation2 + $0x28] sm:$0xff] %vm63_vm0, %v1541_v24 }
 0x217   :  { %1558 = vst.msk [vmem:[#allocation2 + $0x30] sm:$0xff] %vm63_vm0, %v1542_v11 }
 0x218   :  { %1559 = vst.msk [vmem:[#allocation2 + $0x38] sm:$0xff] %vm63_vm0, %v1543_v54 }
 0x219   :  { %1560 = vst.msk [vmem:[#allocation2 + $0x40] sm:$0xff] %vm63_vm0, %v1544_v62 }
 0x21a   :  { %1561 = vst.msk [vmem:[#allocation2 + $0x48] sm:$0xff] %vm63_vm0, %v1545_v27 }
 0x21b   :  { %1562 = vst.msk [vmem:[#allocation2 + $0x50] sm:$0xff] %vm63_vm0, %v1546_v58 }
 0x21c   :  { %1563 = vst.msk [vmem:[#allocation2 + $0x58] sm:$0xff] %vm63_vm0, %v1547_v33 }
 0x21d   :  { %1564 = vst.msk [vmem:[#allocation2 + $0x60] sm:$0xff] %vm63_vm0, %v1548_v28 }
 0x21e   :  { %1565 = vst.msk [vmem:[#allocation2 + $0x68] sm:$0xff] %vm63_vm0, %v1549_v37 }
 0x21f   :  { %1566 = vst.msk [vmem:[#allocation2 + $0x70] sm:$0xff] %vm63_vm0, %v1550_v25 }
 0x220   :  { %1580 = dma.vmem_to_hbm [thread:$0]  %s1573_s4, 2048, %s1575_s27, [#allocation3], %s1939_s28, %s1939_s28, %s1940_s29  }
 0x221   :  { %1935 = dma.done.wait [#allocation3], 2048  }
 0x222   :  { %1936 = vsyncadd [#allocation3], 4294965248 }
 0x223   :  { %1585 = vsyncpa [#allocation3], 1 }

// kernel: attention_layer_forward.2
= control target key start
LH: loop header
LB: loop body
LE: loop exit
PB: predicated region body
PF: predicated region fallthrough
CT: control target
= control target key end

     0   :  { %vm118_vm0 = vcmask 1043456   ;;  %vm69_vm1 = vcmask 31744   ;;  %vm1380_vm2 = vcmask 261120   ;;  %s2790_s10 = smov 120   ;;  %vm1744_vm7 = vcmask 64512   ;;  %s4416_s1 = inlined_call_operand.vmem [shape: f32[9,4,32], index: 1, kind: input, shape index: {}]   ;;  %s4417_s0 = inlined_call_operand.vmem [shape: f32[9,128,4], index: 0, kind: input, shape index: {}]   ;;  %s4418_s2 = inlined_call_operand.vmem [shape: f32[1,32], index: 2, kind: input, shape index: {}]   ;;  %s4419_s6 = inlined_call_operand.vmem [shape: f32[32,48], index: 6, kind: input, shape index: {}]   ;;  %s4420_s3 = inlined_call_operand.vmem [shape: f32[1,32], index: 3, kind: input, shape index: {}]   ;;  %s4421_s4 = inlined_call_operand.vmem [shape: f32[1,32], index: 4, kind: input, shape index: {}]   ;;  %s4422_s5 = inlined_call_operand.vmem [shape: f32[128,32], index: 5, kind: input, shape index: {}]   ;;  %s4423_s7 = inlined_call_operand.vmem [shape: f32[1,48], index: 7, kind: input, shape index: {}]   ;;  %s4424_s8 = inlined_call_operand.<no memory space> [shape: f32[1,1], index: 8, kind: input, shape index: {}]   ;;  %s4425_s9 = inlined_call_operand.vmem [shape: f32[128,32], index: 9, kind: output, shape index: {}]  }
   0x1   :  { %v2339_v0 = vld [vmem:[%s4416_s1 + $0x4] sm:$0xf]  ;;  %v49_v1 = vld [vmem:[%s4416_s1] sm:$0xf]  ;;  %v2390_v2 = vld [vmem:[%s4416_s1 + $0x8] sm:$0xf] }
   0x2   :  { %2340 = vmatpush.msk.msra.mxu0 %vm118_vm0, %v2339_v0  ;;  %2357 = vmatpush.msk.msra.mxu1 %vm118_vm0, %v49_v1  ;;  %v2323_v3 = vld [vmem:[%s4417_s0 + $0x80] sm:$0xff]  ;;  %v2424_v6 = vld [vmem:[%s4416_s1 + $0xc] sm:$0xf]  ;;  %v2325_v12 = vld [vmem:[%s4417_s0 + $0x90] sm:$0xff]  ;;  %vm1818_vm8 = vcmask 523264  }
   0x3   :  { %v33_v4 = vld [vmem:[%s4417_s0] sm:$0xff]  ;;  %2391 = vmatpush.msk.msra.mxu2 %vm118_vm0, %v2390_v2  ;;  %2341 = vmatmul.msk.f32.vlgmr.msra.gmra.mxu0 %vm69_vm1, %v2323_v3  ;;  %v2324_v8 = vld [vmem:[%s4417_s0 + $0x88] sm:$0xff]  ;;  %v35_v13 = vld [vmem:[%s4417_s0 + $0x10] sm:$0xff] }
   0x4   :  { %v2374_v5 = vld [vmem:[%s4417_s0 + $0x100] sm:$0xff]  ;;  %2358 = vmatmul.msk.f32.vlgmr.msra.gmra.mxu1 %vm69_vm1, %v33_v4  ;;  %2425 = vmatpush.msk.msra.mxu3 %vm118_vm0, %v2424_v6  ;;  %v34_v9 = vld [vmem:[%s4417_s0 + $0x8] sm:$0xff]  ;;  %v2376_v14 = vld [vmem:[%s4417_s0 + $0x110] sm:$0xff] }
   0x5   :  { %v2408_v7 = vld [vmem:[%s4417_s0 + $0x180] sm:$0xff]  ;;  %2392 = vmatmul.msk.f32.vlgmr.msra.gmra.mxu2 %vm69_vm1, %v2374_v5  ;;  %v2375_v10 = vld [vmem:[%s4417_s0 + $0x108] sm:$0xff]  ;;  %v2410_v15 = vld [vmem:[%s4417_s0 + $0x190] sm:$0xff] }
   0x6   :  { %2426 = vmatmul.msk.f32.vlgmr.msra.gmra.mxu3 %vm69_vm1, %v2408_v7  ;;  %v2409_v11 = vld [vmem:[%s4417_s0 + $0x188] sm:$0xff]  ;;  %v2326_v16 = vld [vmem:[%s4417_s0 + $0x98] sm:$0xff]  ;;  %v2327_v20 = vld [vmem:[%s4417_s0 + $0xa0] sm:$0xff] }
   0x7   :  { %v36_v17 = vld [vmem:[%s4417_s0 + $0x18] sm:$0xff]  ;;  %v37_v21 = vld [vmem:[%s4417_s0 + $0x20] sm:$0xff]  ;;  %v2328_v24 = vld [vmem:[%s4417_s0 + $0xa8] sm:$0xff] }
   0x8   :  { %v2377_v18 = vld [vmem:[%s4417_s0 + $0x118] sm:$0xff]  ;;  %v2378_v22 = vld [vmem:[%s4417_s0 + $0x120] sm:$0xff]  ;;  %v38_v25 = vld [vmem:[%s4417_s0 + $0x28] sm:$0xff] }
   0x9   :  { %v2411_v19 = vld [vmem:[%s4417_s0 + $0x198] sm:$0xff]  ;;  %v2412_v23 = vld [vmem:[%s4417_s0 + $0x1a0] sm:$0xff]  ;;  %v2379_v26 = vld [vmem:[%s4417_s0 + $0x128] sm:$0xff] }
   0xa   :  { %v2413_v27 = vld [vmem:[%s4417_s0 + $0x1a8] sm:$0xff]  ;;  %v2329_v28 = vld [vmem:[%s4417_s0 + $0xb0] sm:$0xff]  ;;  %v2330_v32 = vld [vmem:[%s4417_s0 + $0xb8] sm:$0xff] }
   0xb   :  { %2342 = vmatmul.msk.f32.gmra.mxu0 %vm69_vm1, %v2324_v8  ;;  %v39_v29 = vld [vmem:[%s4417_s0 + $0x30] sm:$0xff]  ;;  %v40_v33 = vld [vmem:[%s4417_s0 + $0x38] sm:$0xff]  ;;  %v2331_v37 = vld [vmem:[%s4417_s0 + $0xc0] sm:$0xff] }
   0xc   :  { %2359 = vmatmul.msk.f32.gmra.mxu1 %vm69_vm1, %v34_v9  ;;  %v2380_v30 = vld [vmem:[%s4417_s0 + $0x130] sm:$0xff]  ;;  %v2381_v34 = vld [vmem:[%s4417_s0 + $0x138] sm:$0xff]  ;;  %v41_v38 = vld [vmem:[%s4417_s0 + $0x40] sm:$0xff] }
   0xd   :  { %2393 = vmatmul.msk.f32.gmra.mxu2 %vm69_vm1, %v2375_v10  ;;  %v2414_v31 = vld [vmem:[%s4417_s0 + $0x1b0] sm:$0xff]  ;;  %v2415_v35 = vld [vmem:[%s4417_s0 + $0x1b8] sm:$0xff]  ;;  %v2382_v39 = vld [vmem:[%s4417_s0 + $0x140] sm:$0xff] }
   0xe   :  { %2427 = vmatmul.msk.f32.gmra.mxu3 %vm69_vm1, %v2409_v11  ;;  %v2458_v36 = vld [vmem:[%s4416_s1 + $0x10] sm:$0xf]  ;;  %v2416_v40 = vld [vmem:[%s4417_s0 + $0x1c0] sm:$0xff]  ;;  %v2332_v41 = vld [vmem:[%s4417_s0 + $0xc8] sm:$0xff] }
   0xf   :  { %2459 = vmatpush.msk.msrb.mxu0 %vm118_vm0, %v2458_v36  ;;  %v42_v42 = vld [vmem:[%s4417_s0 + $0x48] sm:$0xff]  ;;  %v2333_v45 = vld [vmem:[%s4417_s0 + $0xd0] sm:$0xff]  ;;  %v2334_v49 = vld [vmem:[%s4417_s0 + $0xd8] sm:$0xff] }
  0x10   :  { %v2383_v43 = vld [vmem:[%s4417_s0 + $0x148] sm:$0xff]  ;;  %v43_v46 = vld [vmem:[%s4417_s0 + $0x50] sm:$0xff]  ;;  %v44_v50 = vld [vmem:[%s4417_s0 + $0x58] sm:$0xff] }
  0x11   :  { %v2417_v44 = vld [vmem:[%s4417_s0 + $0x1c8] sm:$0xff]  ;;  %v2384_v47 = vld [vmem:[%s4417_s0 + $0x150] sm:$0xff]  ;;  %v2385_v51 = vld [vmem:[%s4417_s0 + $0x158] sm:$0xff] }
  0x12   :  { %v2418_v48 = vld [vmem:[%s4417_s0 + $0x1d0] sm:$0xff]  ;;  %v2419_v52 = vld [vmem:[%s4417_s0 + $0x1d8] sm:$0xff]  ;;  %v2335_v53 = vld [vmem:[%s4417_s0 + $0xe0] sm:$0xff] }
  0x13   :  { %2343 = vmatmul.msk.f32.gmra.mxu0 %vm69_vm1, %v2325_v12  ;;  %v45_v54 = vld [vmem:[%s4417_s0 + $0x60] sm:$0xff]  ;;  %v2526_v56 = vld [vmem:[%s4416_s1 + $0x18] sm:$0xf]  ;;  %v2492_v58 = vld [vmem:[%s4416_s1 + $0x14] sm:$0xf] }
  0x14   :  { %2360 = vmatmul.msk.f32.gmra.mxu1 %vm69_vm1, %v35_v13  ;;  %v2386_v55 = vld [vmem:[%s4417_s0 + $0x160] sm:$0xff]  ;;  %2527 = vmatpush.msk.msrb.mxu2 %vm118_vm0, %v2526_v56  ;;  %v2560_v59 = vld [vmem:[%s4416_s1 + $0x1c] sm:$0xf]  ;;  %v2336_v60 = vld [vmem:[%s4417_s0 + $0xe8] sm:$0xff] }
  0x15   :  { %2394 = vmatmul.msk.f32.gmra.mxu2 %vm69_vm1, %v2376_v14  ;;  %v2420_v57 = vld [vmem:[%s4417_s0 + $0x1e0] sm:$0xff]  ;;  %2493 = vmatpush.msk.msrb.mxu1 %vm118_vm0, %v2492_v58  ;;  %v46_v61 = vld [vmem:[%s4417_s0 + $0x68] sm:$0xff]  ;;  %v2337_v0 = vld [vmem:[%s4417_s0 + $0xf0] sm:$0xff] }
  0x16   :  { %2428 = vmatmul.msk.f32.gmra.mxu3 %vm69_vm1, %v2410_v15  ;;  %v2387_v62 = vld [vmem:[%s4417_s0 + $0x168] sm:$0xff]  ;;  %v47_v1 = vld [vmem:[%s4417_s0 + $0x70] sm:$0xff]  ;;  %v2338_v4 = vld [vmem:[%s4417_s0 + $0xf8] sm:$0xff] }
  0x17   :  { %2561 = vmatpush.msk.msrb.mxu3 %vm118_vm0, %v2560_v59  ;;  %v2421_v63 = vld [vmem:[%s4417_s0 + $0x1e8] sm:$0xff]  ;;  %v2388_v2 = vld [vmem:[%s4417_s0 + $0x170] sm:$0xff]  ;;  %v48_v5 = vld [vmem:[%s4417_s0 + $0x78] sm:$0xff] }
  0x18   :  { %v2422_v3 = vld [vmem:[%s4417_s0 + $0x1f0] sm:$0xff]  ;;  %v2389_v6 = vld [vmem:[%s4417_s0 + $0x178] sm:$0xff]  ;;  %v2442_v9 = vld [vmem:[%s4417_s0 + $0x200] sm:$0xff] }
  0x19   :  { %v2423_v7 = vld [vmem:[%s4417_s0 + $0x1f8] sm:$0xff]  ;;  %v2510_v11 = vld [vmem:[%s4417_s0 + $0x300] sm:$0xff] }
  0x1a   :  { %v2476_v12 = vld [vmem:[%s4417_s0 + $0x280] sm:$0xff] }
  0x1b   :  { %2344 = vmatmul.msk.f32.gmra.mxu0 %vm69_vm1, %v2326_v16  ;;  %v2544_v13 = vld [vmem:[%s4417_s0 + $0x380] sm:$0xff] }
  0x1c   :  { %2361 = vmatmul.msk.f32.gmra.mxu1 %vm69_vm1, %v36_v17 }
  0x1d   :  { %2395 = vmatmul.msk.f32.gmra.mxu2 %vm69_vm1, %v2377_v18  ;;  %v2443_v18 = vld [vmem:[%s4417_s0 + $0x208] sm:$0xff] }
  0x1e   :  { %2429 = vmatmul.msk.f32.gmra.mxu3 %vm69_vm1, %v2411_v19 }
  0x23   :  { %2345 = vmatmul.msk.f32.gmra.mxu0 %vm69_vm1, %v2327_v20 }
  0x24   :  { %2362 = vmatmul.msk.f32.gmra.mxu1 %vm69_vm1, %v37_v21  ;;  %v2511_v21 = vld [vmem:[%s4417_s0 + $0x308] sm:$0xff] }
  0x25   :  { %2396 = vmatmul.msk.f32.gmra.mxu2 %vm69_vm1, %v2378_v22  ;;  %v2477_v22 = vld [vmem:[%s4417_s0 + $0x288] sm:$0xff] }
  0x26   :  { %2430 = vmatmul.msk.f32.gmra.mxu3 %vm69_vm1, %v2412_v23 }
  0x2b   :  { %2346 = vmatmul.msk.f32.gmra.mxu0 %vm69_vm1, %v2328_v24  ;;  %v2545_v24 = vld [vmem:[%s4417_s0 + $0x388] sm:$0xff] }
  0x2c   :  { %2363 = vmatmul.msk.f32.gmra.mxu1 %vm69_vm1, %v38_v25 }
  0x2d   :  { %2397 = vmatmul.msk.f32.gmra.mxu2 %vm69_vm1, %v2379_v26 }
  0x2e   :  { %2431 = vmatmul.msk.f32.gmra.mxu3 %vm69_vm1, %v2413_v27 }
  0x33   :  { %2347 = vmatmul.msk.f32.gmra.mxu0 %vm69_vm1, %v2329_v28 }
  0x34   :  { %2364 = vmatmul.msk.f32.gmra.mxu1 %vm69_vm1, %v39_v29  ;;  %v2444_v29 = vld [vmem:[%s4417_s0 + $0x210] sm:$0xff] }
  0x35   :  { %2398 = vmatmul.msk.f32.gmra.mxu2 %vm69_vm1, %v2380_v30 }
  0x36   :  { %2432 = vmatmul.msk.f32.gmra.mxu3 %vm69_vm1, %v2414_v31 }
  0x3b   :  { %2348 = vmatmul.msk.f32.gmra.mxu0 %vm69_vm1, %v2330_v32  ;;  %v2512_v32 = vld [vmem:[%s4417_s0 + $0x310] sm:$0xff] }
  0x3c   :  { %2365 = vmatmul.msk.f32.gmra.mxu1 %vm69_vm1, %v40_v33  ;;  %v2478_v33 = vld [vmem:[%s4417_s0 + $0x290] sm:$0xff] }
  0x3d   :  { %2399 = vmatmul.msk.f32.gmra.mxu2 %vm69_vm1, %v2381_v34 }
  0x3e   :  { %2433 = vmatmul.msk.f32.gmra.mxu3 %vm69_vm1, %v2415_v35  ;;  %v2546_v35 = vld [vmem:[%s4417_s0 + $0x390] sm:$0xff] }
  0x43   :  { %2349 = vmatmul.msk.f32.gmra.mxu0 %vm69_vm1, %v2331_v37 }
  0x44   :  { %2366 = vmatmul.msk.f32.gmra.mxu1 %vm69_vm1, %v41_v38 }
  0x45   :  { %2400 = vmatmul.msk.f32.gmra.mxu2 %vm69_vm1, %v2382_v39 }
  0x46   :  { %2434 = vmatmul.msk.f32.gmra.mxu3 %vm69_vm1, %v2416_v40  ;;  %v2445_v40 = vld [vmem:[%s4417_s0 + $0x218] sm:$0xff] }
  0x4b   :  { %2350 = vmatmul.msk.f32.gmra.mxu0 %vm69_vm1, %v2332_v41 }
  0x4c   :  { %2367 = vmatmul.msk.f32.gmra.mxu1 %vm69_vm1, %v42_v42 }
  0x4d   :  { %2401 = vmatmul.msk.f32.gmra.mxu2 %vm69_vm1, %v2383_v43  ;;  %v2513_v43 = vld [vmem:[%s4417_s0 + $0x318] sm:$0xff] }
  0x4e   :  { %2435 = vmatmul.msk.f32.gmra.mxu3 %vm69_vm1, %v2417_v44  ;;  %v2479_v44 = vld [vmem:[%s4417_s0 + $0x298] sm:$0xff] }
  0x53   :  { %2351 = vmatmul.msk.f32.gmra.mxu0 %vm69_vm1, %v2333_v45 }
  0x54   :  { %2368 = vmatmul.msk.f32.gmra.mxu1 %vm69_vm1, %v43_v46  ;;  %v2547_v46 = vld [vmem:[%s4417_s0 + $0x398] sm:$0xff] }
  0x55   :  { %2402 = vmatmul.msk.f32.gmra.mxu2 %vm69_vm1, %v2384_v47 }
  0x56   :  { %2436 = vmatmul.msk.f32.gmra.mxu3 %vm69_vm1, %v2418_v48 }
  0x5b   :  { %2352 = vmatmul.msk.f32.gmra.mxu0 %vm69_vm1, %v2334_v49 }
  0x5c   :  { %2369 = vmatmul.msk.f32.gmra.mxu1 %vm69_vm1, %v44_v50 }
  0x5d   :  { %2403 = vmatmul.msk.f32.gmra.mxu2 %vm69_vm1, %v2385_v51  ;;  %v2446_v51 = vld [vmem:[%s4417_s0 + $0x220] sm:$0xff] }
  0x5e   :  { %2437 = vmatmul.msk.f32.gmra.mxu3 %vm69_vm1, %v2419_v52 }
  0x63   :  { %2353 = vmatmul.msk.f32.gmra.mxu0 %vm69_vm1, %v2335_v53 }
  0x64   :  { %2370 = vmatmul.msk.f32.gmra.mxu1 %vm69_vm1, %v45_v54  ;;  %v2514_v54 = vld [vmem:[%s4417_s0 + $0x320] sm:$0xff] }
  0x65   :  { %2404 = vmatmul.msk.f32.gmra.mxu2 %vm69_vm1, %v2386_v55  ;;  %v2480_v55 = vld [vmem:[%s4417_s0 + $0x2a0] sm:$0xff] }
  0x66   :  { %2438 = vmatmul.msk.f32.gmra.mxu3 %vm69_vm1, %v2420_v57  ;;  %v2548_v57 = vld [vmem:[%s4417_s0 + $0x3a0] sm:$0xff] }
  0x6b   :  { %2354 = vmatmul.msk.f32.gmra.mxu0 %vm69_vm1, %v2336_v60 }
  0x6c   :  { %2371 = vmatmul.msk.f32.gmra.mxu1 %vm69_vm1, %v46_v61 }
  0x6d   :  { %2405 = vmatmul.msk.f32.gmra.mxu2 %vm69_vm1, %v2387_v62  ;;  %v2447_v62 = vld [vmem:[%s4417_s0 + $0x228] sm:$0xff] }
  0x6e   :  { %2439 = vmatmul.msk.f32.gmra.mxu3 %vm69_vm1, %v2421_v63 }
  0x73   :  { %2355 = vmatmul.msk.f32.gmra.mxu0 %vm69_vm1, %v2337_v0 }
  0x74   :  { %2372 = vmatmul.msk.f32.gmra.mxu1 %vm69_vm1, %v47_v1  ;;  %v2515_v1 = vld [vmem:[%s4417_s0 + $0x328] sm:$0xff] }
  0x75   :  { %2406 = vmatmul.msk.f32.gmra.mxu2 %vm69_vm1, %v2388_v2  ;;  %v2481_v2 = vld [vmem:[%s4417_s0 + $0x2a8] sm:$0xff] }
  0x76   :  { %2440 = vmatmul.msk.f32.gmra.mxu3 %vm69_vm1, %v2422_v3 }
  0x7b   :  { %2356 = vmatmul.msk.f32.gmra.mxu0 %vm69_vm1, %v2338_v4  ;;  %v2549_v4 = vld [vmem:[%s4417_s0 + $0x3a8] sm:$0xff] }
  0x7c   :  { %2373 = vmatmul.msk.f32.gmra.mxu1 %vm69_vm1, %v48_v5 }
  0x7d   :  { %2407 = vmatmul.msk.f32.gmra.mxu2 %vm69_vm1, %v2389_v6 }
  0x7e   :  { %2441 = vmatmul.msk.f32.gmra.mxu3 %vm69_vm1, %v2423_v7 }
  0x80   :  { %v139_v8 = vpop.f32.mrf.mxu0 }
  0x81   :  { %v255_v10 = vpop.f32.mrf.mxu1 }
  0x82   :  { %v256_v14 = vadd.f32 %v255_v10, %v139_v8 }
  0x83   :  { %2460 = vmatmul.msk.f32.vlgmr.msrb.gmra.mxu0 %vm69_vm1, %v2442_v9  ;;  %v2448_v9 = vld [vmem:[%s4417_s0 + $0x230] sm:$0xff] }
  0x84   :  { %2494 = vmatmul.msk.f32.vlgmr.msrb.gmra.mxu1 %vm69_vm1, %v2476_v12  ;;  %v2516_v12 = vld [vmem:[%s4417_s0 + $0x330] sm:$0xff] }
  0x85   :  { %2528 = vmatmul.msk.f32.vlgmr.msrb.gmra.mxu2 %vm69_vm1, %v2510_v11 }
  0x86   :  { %2562 = vmatmul.msk.f32.vlgmr.msrb.gmra.mxu3 %vm69_vm1, %v2544_v13  ;;  %v2482_v13 = vld [vmem:[%s4417_s0 + $0x2b0] sm:$0xff] }
  0x88   :  { %v390_v15 = vpop.f32.mrf.mxu2  ;;  %v142_v17 = vpop.f32.mrf.mxu0 }
  0x89   :  { %v438_v16 = vadd.f32 %v390_v15, %v256_v14  ;;  %v258_v19 = vpop.f32.mrf.mxu1  ;;  %v541_v20 = vpop.f32.mrf.mxu3  ;;  %v2550_v15 = vld [vmem:[%s4417_s0 + $0x3b0] sm:$0xff] }
  0x8a   :  { %v259_v25 = vadd.f32 %v258_v19, %v142_v17 }
  0x8b   :  { %v3155_v23 = vadd.f32 %v541_v20, %v438_v16  ;;  %2461 = vmatmul.msk.f32.gmra.mxu0 %vm69_vm1, %v2443_v18  ;;  %v2449_v20 = vld [vmem:[%s4417_s0 + $0x238] sm:$0xff] }
  0x8c   :  { %2495 = vmatmul.msk.f32.gmra.mxu1 %vm69_vm1, %v2477_v22  ;;  %v2517_v22 = vld [vmem:[%s4417_s0 + $0x338] sm:$0xff] }
  0x8d   :  { %2529 = vmatmul.msk.f32.gmra.mxu2 %vm69_vm1, %v2511_v21 }
  0x8e   :  { %2563 = vmatmul.msk.f32.gmra.mxu3 %vm69_vm1, %v2545_v24  ;;  %v2483_v24 = vld [vmem:[%s4417_s0 + $0x2b8] sm:$0xff] }
  0x90   :  { %v393_v26 = vpop.f32.mrf.mxu2  ;;  %v145_v28 = vpop.f32.mrf.mxu0 }
  0x91   :  { %v439_v27 = vadd.f32 %v393_v26, %v259_v25  ;;  %v261_v30 = vpop.f32.mrf.mxu1  ;;  %v544_v31 = vpop.f32.mrf.mxu3 }
  0x92   :  { %v262_v36 = vadd.f32 %v261_v30, %v145_v28 }
  0x93   :  { %v3173_v34 = vadd.f32 %v544_v31, %v439_v27  ;;  %2462 = vmatmul.msk.f32.gmra.mxu0 %vm69_vm1, %v2444_v29  ;;  %v2551_v27 = vld [vmem:[%s4417_s0 + $0x3b8] sm:$0xff] }
  0x94   :  { %2496 = vmatmul.msk.f32.gmra.mxu1 %vm69_vm1, %v2478_v33 }
  0x95   :  { %2530 = vmatmul.msk.f32.gmra.mxu2 %vm69_vm1, %v2512_v32  ;;  %v2450_v32 = vld [vmem:[%s4417_s0 + $0x240] sm:$0xff] }
  0x96   :  { %2564 = vmatmul.msk.f32.gmra.mxu3 %vm69_vm1, %v2546_v35  ;;  %v2518_v35 = vld [vmem:[%s4417_s0 + $0x340] sm:$0xff] }
  0x98   :  { %v396_v37 = vpop.f32.mrf.mxu2  ;;  %v148_v39 = vpop.f32.mrf.mxu0 }
  0x99   :  { %v440_v38 = vadd.f32 %v396_v37, %v262_v36  ;;  %v264_v41 = vpop.f32.mrf.mxu1  ;;  %v547_v42 = vpop.f32.mrf.mxu3  ;;  %v2484_v36 = vld [vmem:[%s4417_s0 + $0x2c0] sm:$0xff] }
  0x9a   :  { %v265_v47 = vadd.f32 %v264_v41, %v148_v39  ;;  %v2552_v39 = vld [vmem:[%s4417_s0 + $0x3c0] sm:$0xff]  ;;  %v2451_v41 = vld [vmem:[%s4417_s0 + $0x248] sm:$0xff] }
  0x9b   :  { %v3191_v45 = vadd.f32 %v547_v42, %v440_v38  ;;  %2463 = vmatmul.msk.f32.gmra.mxu0 %vm69_vm1, %v2445_v40  ;;  %v2594_v38 = vld [vmem:[%s4416_s1 + $0x20] sm:$0xf]  ;;  %v2519_v42 = vld [vmem:[%s4417_s0 + $0x348] sm:$0xff] }
  0x9c   :  { %2497 = vmatmul.msk.f32.gmra.mxu1 %vm69_vm1, %v2479_v44  ;;  %2595 = vmatpush.msk.msra.mxu0 %vm118_vm0, %v2594_v38  ;;  %v2553_v44 = vld [vmem:[%s4417_s0 + $0x3c8] sm:$0xff] }
  0x9d   :  { %2531 = vmatmul.msk.f32.gmra.mxu2 %vm69_vm1, %v2513_v43  ;;  %v2485_v43 = vld [vmem:[%s4417_s0 + $0x2c8] sm:$0xff] }
  0x9e   :  { %2565 = vmatmul.msk.f32.gmra.mxu3 %vm69_vm1, %v2547_v46 }
  0xa0   :  { %v399_v48 = vpop.f32.mrf.mxu2  ;;  %v151_v50 = vpop.f32.mrf.mxu0 }
  0xa1   :  { %v441_v49 = vadd.f32 %v399_v48, %v265_v47  ;;  %v267_v52 = vpop.f32.mrf.mxu1  ;;  %v550_v53 = vpop.f32.mrf.mxu3  ;;  %v2452_v47 = vld [vmem:[%s4417_s0 + $0x250] sm:$0xff] }
  0xa2   :  { %v268_v58 = vadd.f32 %v267_v52, %v151_v50  ;;  %v2520_v48 = vld [vmem:[%s4417_s0 + $0x350] sm:$0xff]  ;;  %v2453_v52 = vld [vmem:[%s4417_s0 + $0x258] sm:$0xff] }
  0xa3   :  { %v3209_v56 = vadd.f32 %v550_v53, %v441_v49  ;;  %2464 = vmatmul.msk.f32.gmra.mxu0 %vm69_vm1, %v2446_v51  ;;  %v2486_v49 = vld [vmem:[%s4417_s0 + $0x2d0] sm:$0xff]  ;;  %v2521_v53 = vld [vmem:[%s4417_s0 + $0x358] sm:$0xff] }
  0xa4   :  { %2498 = vmatmul.msk.f32.gmra.mxu1 %vm69_vm1, %v2480_v55  ;;  %v2554_v50 = vld [vmem:[%s4417_s0 + $0x3d0] sm:$0xff]  ;;  %v2555_v55 = vld [vmem:[%s4417_s0 + $0x3d8] sm:$0xff] }
  0xa5   :  { %2532 = vmatmul.msk.f32.gmra.mxu2 %vm69_vm1, %v2514_v54  ;;  %v2487_v54 = vld [vmem:[%s4417_s0 + $0x2d8] sm:$0xff] }
  0xa6   :  { %2566 = vmatmul.msk.f32.gmra.mxu3 %vm69_vm1, %v2548_v57 }
  0xa8   :  { %v402_v59 = vpop.f32.mrf.mxu2  ;;  %v154_v61 = vpop.f32.mrf.mxu0 }
  0xa9   :  { %v442_v60 = vadd.f32 %v402_v59, %v268_v58  ;;  %v270_v63 = vpop.f32.mrf.mxu1  ;;  %v553_v0 = vpop.f32.mrf.mxu3  ;;  %v2454_v58 = vld [vmem:[%s4417_s0 + $0x260] sm:$0xff] }
  0xaa   :  { %v271_v5 = vadd.f32 %v270_v63, %v154_v61  ;;  %v2522_v59 = vld [vmem:[%s4417_s0 + $0x360] sm:$0xff]  ;;  %v2455_v63 = vld [vmem:[%s4417_s0 + $0x268] sm:$0xff] }
  0xab   :  { %v3227_v3 = vadd.f32 %v553_v0, %v442_v60  ;;  %2465 = vmatmul.msk.f32.gmra.mxu0 %vm69_vm1, %v2447_v62  ;;  %v2488_v60 = vld [vmem:[%s4417_s0 + $0x2e0] sm:$0xff]  ;;  %v2523_v0 = vld [vmem:[%s4417_s0 + $0x368] sm:$0xff] }
  0xac   :  { %2499 = vmatmul.msk.f32.gmra.mxu1 %vm69_vm1, %v2481_v2  ;;  %v2556_v61 = vld [vmem:[%s4417_s0 + $0x3e0] sm:$0xff]  ;;  %v2557_v2 = vld [vmem:[%s4417_s0 + $0x3e8] sm:$0xff] }
  0xad   :  { %2533 = vmatmul.msk.f32.gmra.mxu2 %vm69_vm1, %v2515_v1  ;;  %v2489_v1 = vld [vmem:[%s4417_s0 + $0x2e8] sm:$0xff] }
  0xae   :  { %2567 = vmatmul.msk.f32.gmra.mxu3 %vm69_vm1, %v2549_v4 }
  0xb0   :  { %v405_v6 = vpop.f32.mrf.mxu2  ;;  %v157_v8 = vpop.f32.mrf.mxu0 }
  0xb1   :  { %v443_v7 = vadd.f32 %v405_v6, %v271_v5  ;;  %v273_v10 = vpop.f32.mrf.mxu1  ;;  %v556_v11 = vpop.f32.mrf.mxu3  ;;  %v2456_v5 = vld [vmem:[%s4417_s0 + $0x270] sm:$0xff] }
  0xb2   :  { %v274_v16 = vadd.f32 %v273_v10, %v157_v8  ;;  %v2524_v6 = vld [vmem:[%s4417_s0 + $0x370] sm:$0xff]  ;;  %v2457_v10 = vld [vmem:[%s4417_s0 + $0x278] sm:$0xff] }
  0xb3   :  { %v3245_v14 = vadd.f32 %v556_v11, %v443_v7  ;;  %2466 = vmatmul.msk.f32.gmra.mxu0 %vm69_vm1, %v2448_v9  ;;  %v2490_v7 = vld [vmem:[%s4417_s0 + $0x2f0] sm:$0xff]  ;;  %v2525_v11 = vld [vmem:[%s4417_s0 + $0x378] sm:$0xff] }
  0xb4   :  { %2500 = vmatmul.msk.f32.gmra.mxu1 %vm69_vm1, %v2482_v13  ;;  %v2558_v8 = vld [vmem:[%s4417_s0 + $0x3f0] sm:$0xff]  ;;  %v2559_v13 = vld [vmem:[%s4417_s0 + $0x3f8] sm:$0xff] }
  0xb5   :  { %2534 = vmatmul.msk.f32.gmra.mxu2 %vm69_vm1, %v2516_v12  ;;  %v2491_v12 = vld [vmem:[%s4417_s0 + $0x2f8] sm:$0xff] }
  0xb6   :  { %2568 = vmatmul.msk.f32.gmra.mxu3 %vm69_vm1, %v2550_v15 }
  0xb8   :  { %v408_v17 = vpop.f32.mrf.mxu2  ;;  %v160_v19 = vpop.f32.mrf.mxu0 }
  0xb9   :  { %v444_v18 = vadd.f32 %v408_v17, %v274_v16  ;;  %v559_v21 = vpop.f32.mrf.mxu3  ;;  %v276_v26 = vpop.f32.mrf.mxu1  ;;  %v2578_v16 = vld [vmem:[%s4417_s0 + $0x400] sm:$0xff] }
  0xba   :  { %v277_v28 = vadd.f32 %v276_v26, %v160_v19 }
  0xbb   :  { %v3263_v25 = vadd.f32 %v559_v21, %v444_v18  ;;  %2467 = vmatmul.msk.f32.gmra.mxu0 %vm69_vm1, %v2449_v20  ;;  %v2579_v18 = vld [vmem:[%s4417_s0 + $0x408] sm:$0xff] }
  0xbc   :  { %2501 = vmatmul.msk.f32.gmra.mxu1 %vm69_vm1, %v2483_v24  ;;  %v2580_v24 = vld [vmem:[%s4417_s0 + $0x410] sm:$0xff] }
  0xbd   :  { %2535 = vmatmul.msk.f32.gmra.mxu2 %vm69_vm1, %v2517_v22 }
  0xbe   :  { %2569 = vmatmul.msk.f32.gmra.mxu3 %vm69_vm1, %v2551_v27 }
  0xc0   :  { %v411_v29 = vpop.f32.mrf.mxu2  ;;  %v3272_v31 = vpop.f32.mrf.mxu0 }
  0xc1   :  { %v445_v30 = vadd.f32 %v411_v29, %v277_v28  ;;  %v562_v33 = vpop.f32.mrf.mxu3  ;;  %v3433_v19 = vpop.f32.mrf.mxu1 }
  0xc3   :  { %v3283_v37 = vadd.f32 %v562_v33, %v445_v30  ;;  %2468 = vmatmul.msk.f32.gmra.mxu0 %vm69_vm1, %v2450_v32  ;;  %v2581_v30 = vld [vmem:[%s4417_s0 + $0x418] sm:$0xff] }
  0xc4   :  { %2502 = vmatmul.msk.f32.gmra.mxu1 %vm69_vm1, %v2484_v36  ;;  %v2582_v36 = vld [vmem:[%s4417_s0 + $0x420] sm:$0xff] }
  0xc5   :  { %2536 = vmatmul.msk.f32.gmra.mxu2 %vm69_vm1, %v2518_v35 }
  0xc6   :  { %2570 = vmatmul.msk.f32.gmra.mxu3 %vm69_vm1, %v2552_v39 }
  0xc8   :  { %v3296_v40 = vpop.f32.mrf.mxu0  ;;  %v3435_v20 = vpop.f32.mrf.mxu2 }
  0xc9   :  { %v3438_v21 = vpop.f32.mrf.mxu3  ;;  %v3445_v26 = vpop.f32.mrf.mxu1 }
  0xcb   :  { %2469 = vmatmul.msk.f32.gmra.mxu0 %vm69_vm1, %v2451_v41 }
  0xcc   :  { %2503 = vmatmul.msk.f32.gmra.mxu1 %vm69_vm1, %v2485_v43  ;;  %v2583_v43 = vld [vmem:[%s4417_s0 + $0x428] sm:$0xff] }
  0xcd   :  { %2537 = vmatmul.msk.f32.gmra.mxu2 %vm69_vm1, %v2519_v42 }
  0xce   :  { %2571 = vmatmul.msk.f32.gmra.mxu3 %vm69_vm1, %v2553_v44 }
  0xd0   :  { %v3314_v46 = vpop.f32.mrf.mxu0  ;;  %v3448_v27 = vpop.f32.mrf.mxu2 }
  0xd1   :  { %v3450_v28 = vpop.f32.mrf.mxu3  ;;  %v3458_v32 = vpop.f32.mrf.mxu1 }
  0xd3   :  { %2470 = vmatmul.msk.f32.gmra.mxu0 %vm69_vm1, %v2452_v47 }
  0xd4   :  { %2504 = vmatmul.msk.f32.gmra.mxu1 %vm69_vm1, %v2486_v49 }
  0xd5   :  { %2538 = vmatmul.msk.f32.gmra.mxu2 %vm69_vm1, %v2520_v48  ;;  %v2584_v48 = vld [vmem:[%s4417_s0 + $0x430] sm:$0xff] }
  0xd6   :  { %2572 = vmatmul.msk.f32.gmra.mxu3 %vm69_vm1, %v2554_v50 }
  0xd8   :  { %v3332_v51 = vpop.f32.mrf.mxu0  ;;  %v3460_v33 = vpop.f32.mrf.mxu2 }
  0xd9   :  { %v3467_v38 = vpop.f32.mrf.mxu3  ;;  %v3470_v39 = vpop.f32.mrf.mxu1 }
  0xda   :  { %4427 = vst [vmem:[#allocation4_spill] sm:$0xff] %v3467_v38 }
  0xdb   :  { %2471 = vmatmul.msk.f32.gmra.mxu0 %vm69_vm1, %v2453_v52 }
  0xdc   :  { %2505 = vmatmul.msk.f32.gmra.mxu1 %vm69_vm1, %v2487_v54  ;;  %v2585_v54 = vld [vmem:[%s4417_s0 + $0x438] sm:$0xff] }
  0xdd   :  { %2539 = vmatmul.msk.f32.gmra.mxu2 %vm69_vm1, %v2521_v53 }
  0xde   :  { %2573 = vmatmul.msk.f32.gmra.mxu3 %vm69_vm1, %v2555_v55 }
  0xe0   :  { %v3350_v57 = vpop.f32.mrf.mxu0  ;;  %v3472_v41 = vpop.f32.mrf.mxu2 }
  0xe1   :  { %v3480_v44 = vpop.f32.mrf.mxu3  ;;  %v3487_v49 = vpop.f32.mrf.mxu1 }
  0xe2   :  { %4428 = vst [vmem:[#allocation5_spill] sm:$0xff] %v3480_v44 }
  0xe3   :  { %2472 = vmatmul.msk.f32.gmra.mxu0 %vm69_vm1, %v2454_v58 }
  0xe4   :  { %2506 = vmatmul.msk.f32.gmra.mxu1 %vm69_vm1, %v2488_v60 }
  0xe5   :  { %2540 = vmatmul.msk.f32.gmra.mxu2 %vm69_vm1, %v2522_v59 }
  0xe6   :  { %2574 = vmatmul.msk.f32.gmra.mxu3 %vm69_vm1, %v2556_v61  ;;  %v2586_v61 = vld [vmem:[%s4417_s0 + $0x440] sm:$0xff] }
  0xe8   :  { %v3368_v62 = vpop.f32.mrf.mxu0  ;;  %v3489_v50 = vpop.f32.mrf.mxu2 }
  0xe9   :  { %v3492_v52 = vpop.f32.mrf.mxu3  ;;  %v3499_v55 = vpop.f32.mrf.mxu1 }
  0xea   :  { %4429 = vst [vmem:[#allocation6_spill] sm:$0xff] %v3492_v52 }
  0xeb   :  { %2473 = vmatmul.msk.f32.gmra.mxu0 %vm69_vm1, %v2455_v63 }
  0xec   :  { %2507 = vmatmul.msk.f32.gmra.mxu1 %vm69_vm1, %v2489_v1 }
  0xed   :  { %2541 = vmatmul.msk.f32.gmra.mxu2 %vm69_vm1, %v2523_v0 }
  0xee   :  { %2575 = vmatmul.msk.f32.gmra.mxu3 %vm69_vm1, %v2557_v2  ;;  %v2587_v2 = vld [vmem:[%s4417_s0 + $0x448] sm:$0xff] }
  0xf0   :  { %v3386_v4 = vpop.f32.mrf.mxu0  ;;  %v3502_v58 = vpop.f32.mrf.mxu2 }
  0xf1   :  { %v3504_v59 = vpop.f32.mrf.mxu3  ;;  %v3512_v63 = vpop.f32.mrf.mxu1 }
  0xf2   :  { %4430 = vst [vmem:[#allocation7_spill] sm:$0xff] %v3504_v59 }
  0xf3   :  { %2474 = vmatmul.msk.f32.gmra.mxu0 %vm69_vm1, %v2456_v5 }
  0xf4   :  { %2508 = vmatmul.msk.f32.gmra.mxu1 %vm69_vm1, %v2490_v7 }
  0xf5   :  { %2542 = vmatmul.msk.f32.gmra.mxu2 %vm69_vm1, %v2524_v6 }
  0xf6   :  { %2576 = vmatmul.msk.f32.gmra.mxu3 %vm69_vm1, %v2558_v8 }
  0xf8   :  { %v3404_v9 = vpop.f32.mrf.mxu0  ;;  %v3514_v0 = vpop.f32.mrf.mxu2 }
  0xf9   :  { %4426 = vst [vmem:[#allocation3_spill] sm:$0xff] %v3404_v9  ;;  %v3521_v5 = vpop.f32.mrf.mxu3  ;;  %v3524_v6 = vpop.f32.mrf.mxu1 }
  0xfa   :  { %4432 = vst [vmem:[#allocation9_spill] sm:$0xff] %v3521_v5 }
  0xfb   :  { %2475 = vmatmul.msk.f32.gmra.mxu0 %vm69_vm1, %v2457_v10  ;;  %4433 = vst [vmem:[#allocation10_spill] sm:$0xff] %v3524_v6  ;;  %v2588_v10 = vld [vmem:[%s4417_s0 + $0x450] sm:$0xff] }
  0xfc   :  { %2509 = vmatmul.msk.f32.gmra.mxu1 %vm69_vm1, %v2491_v12 }
  0xfd   :  { %2543 = vmatmul.msk.f32.gmra.mxu2 %vm69_vm1, %v2525_v11 }
  0xfe   :  { %2577 = vmatmul.msk.f32.gmra.mxu3 %vm69_vm1, %v2559_v13 }
 0x100   :  { %v3422_v15 = vpop.f32.mrf.mxu0  ;;  %v3526_v7 = vpop.f32.mrf.mxu2 }
 0x101   :  { %4434 = vst [vmem:[#allocation11_spill] sm:$0xff] %v3526_v7  ;;  %v3534_v11 = vpop.f32.mrf.mxu3  ;;  %v843_v12 = vpop.f32.mrf.mxu1  ;;  %v2592_v7 = vld [vmem:[%s4417_s0 + $0x470] sm:$0xff] }
 0x102   :  { %4436 = vst [vmem:[#allocation13_spill] sm:$0xff] %v3534_v11 }
 0x103   :  { %2596 = vmatmul.msk.f32.vlgmr.msra.gmra.mxu0 %vm69_vm1, %v2578_v16  ;;  %v2589_v16 = vld [vmem:[%s4417_s0 + $0x458] sm:$0xff] }
 0x108   :  { %v3428_v17 = vpop.f32.mrf.mxu0 }
 0x109   :  { %v741_v9 = vadd.f32 %v3428_v17, %v3173_v34 }
 0x10b   :  { %2597 = vmatmul.msk.f32.gmra.mxu0 %vm69_vm1, %v2579_v18  ;;  %v994_v18 = vpop.f32.mrf.mxu2 }
 0x110   :  { %v3440_v22 = vpop.f32.mrf.mxu0 }
 0x111   :  { %v742_v44 = vadd.f32 %v3440_v22, %v3191_v45 }
 0x113   :  { %2598 = vmatmul.msk.f32.gmra.mxu0 %vm69_vm1, %v2580_v24  ;;  %v1145_v24 = vpop.f32.mrf.mxu3 }
 0x118   :  { %v3452_v29 = vpop.f32.mrf.mxu0 }
 0x11b   :  { %2599 = vmatmul.msk.f32.gmra.mxu0 %vm69_vm1, %v2581_v30 }
 0x120   :  { %v3462_v35 = vpop.f32.mrf.mxu0 }
 0x123   :  { %2600 = vmatmul.msk.f32.gmra.mxu0 %vm69_vm1, %v2582_v36  ;;  %v2590_v36 = vld [vmem:[%s4417_s0 + $0x460] sm:$0xff] }
 0x128   :  { %v3474_v42 = vpop.f32.mrf.mxu0 }
 0x12b   :  { %2601 = vmatmul.msk.f32.gmra.mxu0 %vm69_vm1, %v2583_v43  ;;  %v846_v43 = vpop.f32.mrf.mxu1 }
 0x130   :  { %v3482_v47 = vpop.f32.mrf.mxu0 }
 0x133   :  { %2602 = vmatmul.msk.f32.gmra.mxu0 %vm69_vm1, %v2584_v48  ;;  %v997_v48 = vpop.f32.mrf.mxu2 }
 0x138   :  { %v3494_v53 = vpop.f32.mrf.mxu0 }
 0x13b   :  { %2603 = vmatmul.msk.f32.gmra.mxu0 %vm69_vm1, %v2585_v54  ;;  %v1148_v54 = vpop.f32.mrf.mxu3 }
 0x140   :  { %v3506_v60 = vpop.f32.mrf.mxu0 }
 0x143   :  { %2604 = vmatmul.msk.f32.gmra.mxu0 %vm69_vm1, %v2586_v61 }
 0x148   :  { %v3516_v1 = vpop.f32.mrf.mxu0 }
 0x149   :  { %4431 = vst [vmem:[#allocation8_spill] sm:$0xff] %v3516_v1 }
 0x14b   :  { %2605 = vmatmul.msk.f32.gmra.mxu0 %vm69_vm1, %v2587_v2  ;;  %v2591_v2 = vld [vmem:[%s4417_s0 + $0x468] sm:$0xff] }
 0x150   :  { %v3528_v8 = vpop.f32.mrf.mxu0 }
 0x151   :  { %4435 = vst [vmem:[#allocation12_spill] sm:$0xff] %v3528_v8 }
 0x153   :  { %2606 = vmatmul.msk.f32.gmra.mxu0 %vm69_vm1, %v2588_v10  ;;  %v849_v10 = vpop.f32.mrf.mxu1 }
 0x158   :  { %v3536_v13 = vpop.f32.mrf.mxu0 }
 0x159   :  { %4437 = vst [vmem:[#allocation14_spill] sm:$0xff] %v3536_v13 }
 0x15b   :  { %2607 = vmatmul.msk.f32.gmra.mxu0 %vm69_vm1, %v2589_v16  ;;  %v1000_v16 = vpop.f32.mrf.mxu2 }
 0x160   :  { %v3542_v30 = vpop.f32.mrf.mxu0 }
 0x161   :  { %4438 = vst [vmem:[#allocation15_spill] sm:$0xff] %v3542_v30  ;;  %v1151_v30 = vpop.f32.mrf.mxu3 }
 0x163   :  { %2608 = vmatmul.msk.f32.gmra.mxu0 %vm69_vm1, %v2590_v36  ;;  %v740_v36 = vadd.f32 %v3422_v15, %v3155_v23  ;;  %v1003_v13 = vpop.f32.mrf.mxu2  ;;  %v892_v23 = vadd.f32 %v846_v43, %v741_v9  ;;  %v743_v9 = vadd.f32 %v3452_v29, %v3209_v56 }
 0x165   :  { %v891_v8 = vadd.f32 %v843_v12, %v740_v36 }
 0x168   :  { %v3548_v61 = vpop.f32.mrf.mxu0 }
 0x169   :  { %4439 = vst [vmem:[#allocation16_spill] sm:$0xff] %v3548_v61  ;;  %v852_v61 = vpop.f32.mrf.mxu1  ;;  %v1154_v6 = vpop.f32.mrf.mxu3 }
 0x16a   :  { %v894_v43 = vadd.f32 %v852_v61, %v743_v9 }
 0x16b   :  { %2609 = vmatmul.msk.f32.gmra.mxu0 %vm69_vm1, %v2591_v2  ;;  %v2593_v2 = vld [vmem:[%s4417_s0 + $0x478] sm:$0xff]  ;;  %v1006_v1 = vpop.f32.mrf.mxu2 }
 0x16c   :  { %v1045_v22 = vadd.f32 %v1003_v13, %v894_v43 }
 0x170   :  { %v3554_v11 = vpop.f32.mrf.mxu0 }
 0x171   :  { %4440 = vst [vmem:[#allocation17_spill] sm:$0xff] %v3554_v11  ;;  %v1042_v11 = vadd.f32 %v994_v18, %v891_v8  ;;  %v855_v59 = vpop.f32.mrf.mxu1  ;;  %v1157_v38 = vpop.f32.mrf.mxu3  ;;  %v893_v18 = vadd.f32 %v849_v10, %v742_v44  ;;  %v744_v44 = vadd.f32 %v3462_v35, %v3227_v3 }
 0x173   :  { %2610 = vmatmul.msk.f32.gmra.mxu0 %vm69_vm1, %v2592_v7  ;;  %v1193_v7 = vadd.f32 %v1145_v24, %v1042_v11  ;;  %v1044_v34 = vadd.f32 %v1000_v16, %v893_v18  ;;  %v3578_v17 = vpop.f32.mrf.mxu2  ;;  %v895_v16 = vadd.f32 %v855_v59, %v744_v44 }
 0x175   :  { %v1046_v29 = vadd.f32 %v1006_v1, %v895_v16 }
 0x178   :  { %v3562_v5 = vpop.f32.mrf.mxu0 }
 0x179   :  { %4441 = vst [vmem:[#allocation18_spill] sm:$0xff] %v3562_v5  ;;  %v1043_v5 = vadd.f32 %v997_v48, %v892_v23  ;;  %v3582_v11 = vpop.f32.mrf.mxu3  ;;  %v1197_v23 = vadd.f32 %v1157_v38, %v1046_v29  ;;  %v280_v29 = vadd.f32 %v3433_v19, %v3272_v31  ;;  %v289_v31 = vadd.f32 %v3470_v39, %v3332_v51 }
 0x17a   :  { %v292_v19 = vadd.f32 %v3487_v49, %v3350_v57  ;;  %v4448_v49 = vld [vmem:[#allocation4_spill] sm:$0xff] }
 0x17b   :  { %2611 = vmatmul.msk.f32.gmra.mxu0 %vm69_vm1, %v2593_v2  ;;  %v1194_v12 = vadd.f32 %v1148_v54, %v1043_v5  ;;  %v3576_v2 = vpop.f32.mrf.mxu1  ;;  %v3588_v48 = vpop.f32.mrf.mxu2  ;;  %v1196_v54 = vadd.f32 %v1154_v6, %v1045_v22 }
 0x17c   :  { %v450_v51 = vadd.f32 %v3489_v50, %v292_v19  ;;  %v4449_v50 = vld [vmem:[#allocation5_spill] sm:$0xff] }
 0x180   :  { %v1296_v52 = vpop.f32.mrf.mxu0 }
 0x181   :  { %v3570_v15 = vadd.f32 %v1296_v52, %v1193_v7  ;;  %v1195_v52 = vadd.f32 %v1151_v30, %v1044_v34  ;;  %v3592_v56 = vpop.f32.mrf.mxu3 }
 0x183   :  { %v861_v5 = vpop.f32.mrf.mxu1  ;;  %v1015_v61 = vpop.f32.mrf.mxu2 }
 0x188   :  { %v1299_v8 = vpop.f32.mrf.mxu0 }
 0x189   :  { %v3574_v36 = vadd.f32 %v1299_v8, %v1194_v12  ;;  %v3596_v13 = vpop.f32.mrf.mxu3 }
 0x18b   :  { %v864_v30 = vpop.f32.mrf.mxu1  ;;  %v1018_v35 = vpop.f32.mrf.mxu2 }
 0x190   :  { %v1302_v24 = vpop.f32.mrf.mxu0 }
 0x191   :  { %v3584_v45 = vadd.f32 %v1302_v24, %v1195_v52  ;;  %v3600_v6 = vpop.f32.mrf.mxu3 }
 0x193   :  { %v867_v18 = vpop.f32.mrf.mxu1  ;;  %v3604_v9 = vpop.f32.mrf.mxu2 }
 0x198   :  { %v1305_v10 = vpop.f32.mrf.mxu0 }
 0x199   :  { %v3590_v7 = vadd.f32 %v1305_v10, %v1196_v54  ;;  %v3606_v1 = vpop.f32.mrf.mxu3 }
 0x19a   :  { %4442 = vst [vmem:[#allocation19_spill] sm:$0xff] %v3606_v1  ;;  %v446_v1 = vadd.f32 %v3435_v20, %v280_v29  ;;  %v295_v20 = vadd.f32 %v3499_v55, %v3368_v62  ;;  %v298_v62 = vadd.f32 %v3512_v63, %v3386_v4  ;;  %v4451_v63 = vld [vmem:[#allocation6_spill] sm:$0xff] }
 0x19b   :  { %v870_v34 = vpop.f32.mrf.mxu1  ;;  %v3612_v24 = vpop.f32.mrf.mxu2 }
 0x19c   :  { %v451_v57 = vadd.f32 %v3502_v58, %v295_v20  ;;  %v4456_v20 = vld [vmem:[#allocation9_spill] sm:$0xff] }
 0x1a0   :  { %v1308_v12 = vpop.f32.mrf.mxu0 }
 0x1a1   :  { %v3594_v8 = vadd.f32 %v1308_v12, %v1197_v23  ;;  %v3616_v22 = vpop.f32.mrf.mxu3 }
 0x1a2   :  { %4444 = vst [vmem:[#allocation21_spill] sm:$0xff] %v3616_v22  ;;  %v283_v22 = vadd.f32 %v3445_v26, %v3296_v40  ;;  %v746_v40 = vadd.f32 %v3482_v47, %v3263_v25  ;;  %v597_v26 = vadd.f32 %v3438_v21, %v446_v1  ;;  %v3671_v47 = vld [vmem:[%s4418_s2] ss:$0 sm:$0xff] }
 0x1a3   :  { %v3610_v52 = vpop.f32.mrf.mxu1  ;;  %v3620_v54 = vpop.f32.mrf.mxu2  ;;  %v4452_v1 = vld [vmem:[#allocation7_spill] sm:$0xff] }
 0x1a4   :  { %4445 = vst [vmem:[#allocation22_spill] sm:$0xff] %v3620_v54  ;;  %v745_v54 = vadd.f32 %v3474_v42, %v3245_v14  ;;  %v897_v42 = vadd.f32 %v861_v5, %v746_v40  ;;  %v3681_v5 = vadd.f32 %v3671_v47, %v3574_v36  ;;  %v3694_v36 = vadd.f32 %v3671_v47, %v3584_v45 }
 0x1a6   :  { %v896_v25 = vadd.f32 %v3576_v2, %v745_v54  ;;  %v601_v2 = vadd.f32 %v4451_v63, %v450_v51  ;;  %v4454_v54 = vld [vmem:[#allocation10_spill] sm:$0xff]  ;;  %v1382_v51 = vsel %vm1380_vm2, %v3681_v5, 0.0 }
 0x1a8   :  { %v3598_v3 = vpop.f32.mrf.mxu0 }
 0x1a9   :  { %v3624_v16 = vpop.f32.mrf.mxu3 }
 0x1aa   :  { %4447 = vst [vmem:[#allocation24_spill] sm:$0xff] %v3624_v16  ;;  %v286_v16 = vadd.f32 %v3458_v32, %v3314_v46  ;;  %v747_v46 = vadd.f32 %v3494_v53, %v3283_v37  ;;  %v1047_v37 = vadd.f32 %v3578_v17, %v896_v25  ;;  %v1048_v17 = vadd.f32 %v3588_v48, %v897_v42 }
 0x1ab   :  { %v3618_v44 = vpop.f32.mrf.mxu1 }
 0x1ac   :  { %v448_v14 = vadd.f32 %v3460_v33, %v286_v16  ;;  %v748_v33 = vadd.f32 %v3506_v60, %v597_v26  ;;  %v898_v55 = vadd.f32 %v864_v30, %v747_v46  ;;  %v1198_v26 = vadd.f32 %v3582_v11, %v1047_v37  ;;  %v4457_v46 = vld [vmem:[#allocation14_spill] sm:$0xff] }
 0x1ad   :  { %v3702_v11 = vadd.f32 %v3671_v47, %v3590_v7  ;;  %v3715_v7 = vadd.f32 %v3671_v47, %v3594_v8 }
 0x1ae   :  { %v599_v4 = vadd.f32 %v4448_v49, %v448_v14  ;;  %v1049_v16 = vadd.f32 %v1015_v61, %v898_v55  ;;  %v899_v29 = vadd.f32 %v867_v18, %v748_v33  ;;  %v3690_v14 = vadd.f32 %v3671_v47, %v3570_v15 }
 0x1af   :  { %v1199_v18 = vadd.f32 %v3592_v56, %v1048_v17  ;;  %v1349_v15 = vadd.f32 %v3598_v3, %v1198_v26  ;;  %v1384_v33 = vsel %vm1380_vm2, %v3694_v36, 0.0  ;;  %v1386_v49 = vsel %vm1380_vm2, %v3702_v11, 0.0  ;;  %v4464_v17 = vld [vmem:[#allocation11_spill] sm:$0xff] }
 0x1b0   :  { %v3602_v59 = vpop.f32.mrf.mxu0  ;;  %v1050_v48 = vadd.f32 %v1018_v35, %v899_v29  ;;  %v1381_v56 = vsel %vm1380_vm2, %v3690_v14, 0.0 }
 0x1b1   :  { %v3655_v32 = vpop.f32.mrf.mxu3  ;;  %v1383_v37 = vadd.f32 %v1382_v51, %v1381_v56 }
 0x1b2   :  { %v1201_v3 = vadd.f32 %v3600_v6, %v1050_v48  ;;  %v4467_v48 = vld [vmem:[#allocation24_spill] sm:$0xff] }
 0x1b3   :  { %v3628_v23 = vpop.f32.mrf.mxu1 }
 0x1b8   :  { %v3608_v38 = vpop.f32.mrf.mxu0 }
 0x1b9   :  { %v1184_v25 = vpop.f32.mrf.mxu3 }
 0x1bb   :  { %v882_v60 = vpop.f32.mrf.mxu1 }
 0x1c0   :  { %v3614_v43 = vpop.f32.mrf.mxu0 }
 0x1c1   :  { %4443 = vst [vmem:[#allocation20_spill] sm:$0xff] %v3614_v43  ;;  %v3635_v43 = vpop.f32.mrf.mxu2 }
 0x1c8   :  { %v3622_v10 = vpop.f32.mrf.mxu0 }
 0x1c9   :  { %4446 = vst [vmem:[#allocation23_spill] sm:$0xff] %v3622_v10  ;;  %v447_v10 = vadd.f32 %v3448_v27, %v283_v22  ;;  %v449_v27 = vadd.f32 %v3472_v41, %v289_v31  ;;  %v452_v41 = vadd.f32 %v3514_v0, %v298_v62  ;;  %v602_v0 = vadd.f32 %v4452_v1, %v451_v57  ;;  %v4453_v22 = vld [vmem:[#allocation3_spill] sm:$0xff]  ;;  %v4455_v31 = vld [vmem:[#allocation12_spill] sm:$0xff]  ;;  %v1033_v19 = vpop.f32.mrf.mxu2 }
 0x1ca   :  { %v750_v30 = vadd.f32 %v4455_v31, %v599_v4  ;;  %v1200_v57 = vadd.f32 %v3596_v13, %v1049_v16  ;;  %v1350_v13 = vadd.f32 %v3602_v59, %v1199_v18  ;;  %v3725_v4 = vadd.f32 %v3671_v47, %v1349_v15  ;;  %v4461_v59 = vld [vmem:[#allocation22_spill] sm:$0xff]  ;;  %v4463_v1 = vld [vmem:[#allocation20_spill] sm:$0xff]  ;;  %v4468_v15 = vld [vmem:[#allocation13_spill] sm:$0xff] }
 0x1cb   :  { %v598_v21 = vadd.f32 %v3450_v28, %v447_v10  ;;  %v600_v53 = vadd.f32 %v4449_v50, %v449_v27  ;;  %v4450_v28 = vld [vmem:[#allocation8_spill] sm:$0xff]  ;;  %v301_v10 = vadd.f32 %v4454_v54, %v4453_v22  ;;  %v603_v40 = vadd.f32 %v4456_v20, %v452_v41  ;;  %v4460_v50 = vld [vmem:[#allocation19_spill] sm:$0xff] }
 0x1cc   :  { %v901_v35 = vadd.f32 %v3610_v52, %v750_v30  ;;  %v4459_v52 = vld [vmem:[#allocation16_spill] sm:$0xff]  ;;  %v1351_v8 = vadd.f32 %v3608_v38, %v1200_v57  ;;  %v1390_v30 = vsel %vm1380_vm2, %v3725_v4, 0.0 }
 0x1cd   :  { %v749_v58 = vadd.f32 %v4450_v28, %v598_v21  ;;  %v751_v61 = vadd.f32 %v4457_v46, %v600_v53  ;;  %v753_v41 = vadd.f32 %v4459_v52, %v602_v0  ;;  %v1385_v28 = vadd.f32 %v1384_v33, %v1383_v37 }
 0x1ce   :  { %v1052_v42 = vadd.f32 %v3612_v24, %v901_v35  ;;  %v1388_v24 = vsel %vm1380_vm2, %v3715_v7, 0.0  ;;  %v1352_v0 = vadd.f32 %v4463_v1, %v1201_v3  ;;  %v453_v38 = vadd.f32 %v4464_v17, %v301_v10  ;;  %v1187_v35 = vpop.f32.mrf.mxu3  ;;  %v4469_v3 = vld [vmem:[#allocation18_spill] sm:$0xff] }
 0x1cf   :  { %v900_v27 = vadd.f32 %v870_v34, %v749_v58  ;;  %v4458_v34 = vld [vmem:[#allocation15_spill] sm:$0xff]  ;;  %v4462_v58 = vld [vmem:[#allocation17_spill] sm:$0xff]  ;;  %v904_v54 = vadd.f32 %v882_v60, %v753_v41  ;;  %v1387_v29 = vadd.f32 %v1386_v49, %v1385_v28  ;;  %v3744_v20 = vadd.f32 %v3671_v47, %v1351_v8 }
 0x1d0   :  { %v3630_v12 = vpop.f32.mrf.mxu0  ;;  %v752_v62 = vadd.f32 %v4458_v34, %v601_v2  ;;  %v754_v63 = vadd.f32 %v4462_v58, %v603_v40  ;;  %v3735_v2 = vadd.f32 %v3671_v47, %v1350_v13  ;;  %v4466_v40 = vld [vmem:[#allocation23_spill] sm:$0xff]  ;;  %v3751_v60 = vadd.f32 %v3671_v47, %v1352_v0 }
 0x1d1   :  { %v1051_v45 = vadd.f32 %v3604_v9, %v900_v27  ;;  %v902_v9 = vadd.f32 %v3618_v44, %v751_v61  ;;  %v885_v44 = vpop.f32.mrf.mxu1  ;;  %v1036_v16 = vpop.f32.mrf.mxu2  ;;  %v1055_v46 = vadd.f32 %v1033_v19, %v904_v54  ;;  %v1389_v61 = vadd.f32 %v1388_v24, %v1387_v29 }
 0x1d2   :  { %v903_v6 = vadd.f32 %v3628_v23, %v752_v62  ;;  %v4465_v23 = vld [vmem:[#allocation21_spill] sm:$0xff]  ;;  %v905_v18 = vadd.f32 %v885_v44, %v754_v63  ;;  %v604_v57 = vadd.f32 %v4468_v15, %v453_v38  ;;  %v1394_v19 = vsel %vm1380_vm2, %v3744_v20, 0.0 }
 0x1d3   :  { %v1202_v53 = vadd.f32 %v4460_v50, %v1051_v45  ;;  %v1053_v55 = vadd.f32 %v4461_v59, %v902_v9  ;;  %v1203_v31 = vadd.f32 %v4465_v23, %v1052_v42  ;;  %v1391_v34 = vadd.f32 %v1390_v30, %v1389_v61 }
 0x1d4   :  { %v1054_v22 = vadd.f32 %v3635_v43, %v903_v6  ;;  %v1392_v43 = vsel %vm1380_vm2, %v3735_v2, 0.0  ;;  %v1056_v62 = vadd.f32 %v1036_v16, %v905_v18  ;;  %v1206_v13 = vadd.f32 %v1184_v25, %v1055_v46 }
 0x1d5   :  { %v1353_v26 = vadd.f32 %v4466_v40, %v1202_v53  ;;  %v1204_v27 = vadd.f32 %v4467_v48, %v1053_v55  ;;  %v1354_v51 = vadd.f32 %v3630_v12, %v1203_v31  ;;  %v755_v9 = vadd.f32 %v4469_v3, %v604_v57 }
 0x1d6   :  { %v1205_v45 = vadd.f32 %v3655_v32, %v1054_v22  ;;  %v1393_v52 = vadd.f32 %v1392_v43, %v1391_v34  ;;  %v1396_v12 = vsel %vm1380_vm2, %v3751_v60, 0.0  ;;  %v1207_v49 = vadd.f32 %v1187_v35, %v1056_v62  ;;  %v1190_v0 = vpop.f32.mrf.mxu3 }
 0x1d7   :  { %v3759_v56 = vadd.f32 %v3671_v47, %v1353_v26  ;;  %v3766_v32 = vadd.f32 %v3671_v47, %v1354_v51  ;;  %v2789_v55 = vmov 128.0  }
 0x1d8   :  { %v3664_v39 = vpop.f32.mrf.mxu0  ;;  %v1395_v42 = vadd.f32 %v1394_v19, %v1393_v52  ;;  %2721 = vrcp.f32 %v2789_v55 }
 0x1d9   :  { %v1355_v33 = vadd.f32 %v3664_v39, %v1204_v27  ;;  %v888_v37 = vpop.f32.mrf.mxu1  ;;  %v1398_v8 = vsel %vm1380_vm2, %v3759_v56, 0.0  ;;  %v1039_v25 = vpop.f32.mrf.mxu2  ;;  %v1400_v44 = vsel %vm1380_vm2, %v3766_v32, 0.0 }
 0x1da   :  { %v1397_v53 = vadd.f32 %v1396_v12, %v1395_v42  ;;  %v906_v6 = vadd.f32 %v888_v37, %v755_v9 }
 0x1db   :  { %v3771_v50 = vadd.f32 %v3671_v47, %v1355_v33 }
 0x1dc   :  { %v1399_v58 = vadd.f32 %v1398_v8, %v1397_v53  ;;  %v1057_v63 = vadd.f32 %v1039_v25, %v906_v6 }
 0x1dd   :  { %v1402_v24 = vsel %vm1380_vm2, %v3771_v50, 0.0 }
 0x1de   :  { %v1401_v17 = vadd.f32 %v1400_v44, %v1399_v58  ;;  %v2722_v54 = vpop.eup %2721  ;;  %v1208_v29 = vadd.f32 %v1190_v0, %v1057_v63 }
 0x1df   :  { %v1419_v48 = vmul.f32 128.0, %v2722_v54  ;;  %vm1423_vm3 = vweird.f32 %v2722_v54 }
 0x1e0   :  { %v1332_v21 = vpop.f32.mrf.mxu0  ;;  %v1403_v16 = vadd.f32 %v1402_v24, %v1401_v17 }
 0x1e1   :  { %v1356_v41 = vadd.f32 %v1332_v21, %v1205_v45  ;;  %v1420_v18 = vsub.f32 1.0, %v1419_v48 }
 0x1e3   :  { %v3776_v21 = vadd.f32 %v3671_v47, %v1356_v41  ;;  %v1421_v15 = vmul.f32 %v2722_v54, %v1420_v18 }
 0x1e5   :  { %v1404_v38 = vsel %vm1380_vm2, %v3776_v21, 0.0  ;;  %v1422_v35 = vadd.f32 %v2722_v54, %v1421_v15 }
 0x1e6   :  { %v1405_v31 = vadd.f32 %v1404_v38, %v1403_v16 }
 0x1e7   :  { %v3797_v19 = vsel %vm1423_vm3, %v2722_v54, %v1422_v35 }
 0x1e8   :  { %v1335_v10 = vpop.f32.mrf.mxu0 }
 0x1e9   :  { %v1357_v39 = vadd.f32 %v1335_v10, %v1206_v13 }
 0x1eb   :  { %v3781_v1 = vadd.f32 %v3671_v47, %v1357_v39 }
 0x1ed   :  { %v1406_v23 = vsel %vm1380_vm2, %v3781_v1, 0.0 }
 0x1ee   :  { %v1407_v27 = vadd.f32 %v1406_v23, %v1405_v31 }
 0x1f0   :  { %v1338_v59 = vpop.f32.mrf.mxu0 }
 0x1f1   :  { %v1358_v28 = vadd.f32 %v1338_v59, %v1207_v49 }
 0x1f3   :  { %v3786_v22 = vadd.f32 %v3671_v47, %v1358_v28 }
 0x1f5   :  { %v1408_v40 = vsel %vm1380_vm2, %v3786_v22, 0.0 }
 0x1f6   :  { %v1409_v61 = vadd.f32 %v1408_v40, %v1407_v27 }
 0x1f8   :  { %v1341_v30 = vpop.f32.mrf.mxu0 }
 0x1f9   :  { %v1359_v26 = vadd.f32 %v1341_v30, %v1208_v29 }
 0x1fb   :  { %v3793_v46 = vadd.f32 %v3671_v47, %v1359_v26 }
 0x1fd   :  { %v1410_v10 = vsel %vm1380_vm2, %v3793_v46, 0.0 }
 0x1fe   :  { %v1411_v43 = vadd.f32 %v1410_v10, %v1409_v61 }
 0x200   :  { %v1412_v51 = vrot.slane %v1411_v43, 4 }
 0x202   :  { %v1413_v57 = vadd.f32 %v1412_v51, %v1411_v43 }
 0x204   :  { %v1414_v45 = vrot.slane %v1413_v57, 2 }
 0x206   :  { %v1415_v34 = vadd.f32 %v1414_v45, %v1413_v57 }
 0x208   :  { %v1416_v62 = vrot.slane %v1415_v34, 1 }
 0x20a   :  { %v1417_v33 = vadd.f32 %v1416_v62, %v1415_v34 }
 0x20c   :  { %v3800_v47 = vmul.f32 %v3797_v19, %v1417_v33 }
 0x20e   :  { %v1426_v13 = vsub.f32 %v3690_v14, %v3800_v47  ;;  %v1427_v3 = vsub.f32 %v3681_v5, %v3800_v47  ;;  %v1428_v9 = vsub.f32 %v3694_v36, %v3800_v47  ;;  %v1429_v52 = vsub.f32 %v3702_v11, %v3800_v47 }
 0x20f   :  { %v1430_v37 = vsub.f32 %v3715_v7, %v3800_v47  ;;  %v1431_v49 = vsub.f32 %v3725_v4, %v3800_v47  ;;  %v1432_v59 = vsub.f32 %v3735_v2, %v3800_v47  ;;  %v1433_v28 = vsub.f32 %v3744_v20, %v3800_v47 }
 0x210   :  { %v1442_v12 = vmul.f32 %v1426_v13, %v1426_v13  ;;  %v1443_v41 = vmul.f32 %v1427_v3, %v1427_v3  ;;  %v1444_v42 = vmul.f32 %v1428_v9, %v1428_v9  ;;  %v1445_v8 = vmul.f32 %v1429_v52, %v1429_v52 }
 0x211   :  { %v1446_v55 = vmul.f32 %v1430_v37, %v1430_v37  ;;  %v1447_v58 = vmul.f32 %v1431_v49, %v1431_v49  ;;  %v1434_v0 = vsub.f32 %v3751_v60, %v3800_v47  ;;  %v1448_v17 = vmul.f32 %v1432_v59, %v1432_v59 }
 0x212   :  { %v1458_v39 = vsel %vm1380_vm2, %v1442_v12, 0.0  ;;  %v1459_v25 = vsel %vm1380_vm2, %v1443_v41, 0.0  ;;  %v1461_v6 = vsel %vm1380_vm2, %v1444_v42, 0.0  ;;  %v1463_v63 = vsel %vm1380_vm2, %v1445_v8, 0.0 }
 0x213   :  { %v1460_v53 = vadd.f32 %v1459_v25, %v1458_v39  ;;  %v1465_v38 = vsel %vm1380_vm2, %v1446_v55, 0.0  ;;  %v1435_v16 = vsub.f32 %v3759_v56, %v3800_v47  ;;  %v1449_v29 = vmul.f32 %v1433_v28, %v1433_v28 }
 0x214   :  { %v1467_v23 = vsel %vm1380_vm2, %v1447_v58, 0.0  ;;  %v1436_v30 = vsub.f32 %v3766_v32, %v3800_v47  ;;  %v1450_v40 = vmul.f32 %v1434_v0, %v1434_v0  ;;  %v1469_v26 = vsel %vm1380_vm2, %v1448_v17, 0.0 }
 0x215   :  { %v1462_v44 = vadd.f32 %v1461_v6, %v1460_v53  ;;  %v1437_v27 = vsub.f32 %v3771_v50, %v3800_v47  ;;  %v1451_v61 = vmul.f32 %v1435_v16, %v1435_v16  ;;  %v1471_v10 = vsel %vm1380_vm2, %v1449_v29, 0.0  ;;  %v1599_v29 = vld [vmem:[%s4419_s6 + $0x8] sm:$0xff] }
 0x216   :  { %v1438_v43 = vsub.f32 %v3776_v21, %v3800_v47  ;;  %v1452_v51 = vmul.f32 %v1436_v30, %v1436_v30  ;;  %v1473_v15 = vsel %vm1380_vm2, %v1450_v40, 0.0  ;;  %v1439_v45 = vsub.f32 %v3781_v1, %v3800_v47 }
 0x217   :  { %v1464_v24 = vadd.f32 %v1463_v63, %v1462_v44  ;;  %v1453_v35 = vmul.f32 %v1437_v27, %v1437_v27  ;;  %v1475_v34 = vsel %vm1380_vm2, %v1451_v61, 0.0  ;;  %v1440_v33 = vsub.f32 %v3786_v22, %v3800_v47 }
 0x218   :  { %v1454_v13 = vmul.f32 %v1438_v43, %v1438_v43  ;;  %v1477_v3 = vsel %vm1380_vm2, %v1452_v51, 0.0  ;;  %v1441_v52 = vsub.f32 %v3793_v46, %v3800_v47  ;;  %v1455_v12 = vmul.f32 %v1439_v45, %v1439_v45  ;;  %v1509_v43 = vld [vmem:[%s4421_s4] sm:$0x1] }
 0x219   :  { %v1466_v54 = vadd.f32 %v1465_v38, %v1464_v24  ;;  %v1479_v41 = vsel %vm1380_vm2, %v1453_v35, 0.0  ;;  %v1456_v42 = vmul.f32 %v1440_v33, %v1440_v33  ;;  %v1601_v38 = vld [vmem:[%s4419_s6 + $0x18] sm:$0xff] }
 0x21a   :  { %v1481_v49 = vsel %vm1380_vm2, %v1454_v13, 0.0  ;;  %v1457_v39 = vmul.f32 %v1441_v52, %v1441_v52  ;;  %v1483_v25 = vsel %vm1380_vm2, %v1455_v12, 0.0  ;;  %1666 = vmatpush.msra.mxu1 %v1601_v38 }
 0x21b   :  { %v1468_v31 = vadd.f32 %v1467_v23, %v1466_v54  ;;  %v1485_v59 = vsel %vm1380_vm2, %v1456_v42, 0.0  ;;  %v1600_v54 = vld [vmem:[%s4419_s6 + $0x10] sm:$0xff] }
 0x21c   :  { %v1487_v6 = vsel %vm1380_vm2, %v1457_v39, 0.0  ;;  %1667 = vmatpush.msra.mxu1 %v1600_v54 }
 0x21d   :  { %v1470_v48 = vadd.f32 %v1469_v26, %v1468_v31  ;;  %v1598_v31 = vld [vmem:[%s4419_s6] sm:$0xff] }
 0x21e   :  { %1668 = vmatpush.msra.mxu1 %v1599_v29  ;;  %v1580_v29 = vld [vmem:[%s4422_s5 + $0x70] sm:$0xff] }
 0x21f   :  { %v1472_v18 = vadd.f32 %v1471_v10, %v1470_v48 }
 0x220   :  { %1669 = vmatpush.msra.mxu1 %v1598_v31 }
 0x221   :  { %v1474_v57 = vadd.f32 %v1473_v15, %v1472_v18 }
 0x223   :  { %v1476_v62 = vadd.f32 %v1475_v34, %v1474_v57 }
 0x225   :  { %v1478_v9 = vadd.f32 %v1477_v3, %v1476_v62 }
 0x227   :  { %v1480_v37 = vadd.f32 %v1479_v41, %v1478_v9 }
 0x229   :  { %v1482_v8 = vadd.f32 %v1481_v49, %v1480_v37 }
 0x22b   :  { %v1484_v53 = vadd.f32 %v1483_v25, %v1482_v8 }
 0x22d   :  { %v1486_v55 = vadd.f32 %v1485_v59, %v1484_v53  ;;  %v1581_v53 = vld [vmem:[%s4422_s5 + $0x78] sm:$0xff] }
 0x22f   :  { %v1488_v44 = vadd.f32 %v1487_v6, %v1486_v55 }
 0x231   :  { %v1489_v28 = vrot.slane %v1488_v44, 4 }
 0x233   :  { %v1490_v58 = vadd.f32 %v1489_v28, %v1488_v44  ;;  %v1577_v44 = vld [vmem:[%s4422_s5 + $0x58] sm:$0xff]  ;;  %v1578_v28 = vld [vmem:[%s4422_s5 + $0x60] sm:$0xff] }
 0x235   :  { %v1491_v63 = vrot.slane %v1490_v58, 2 }
 0x237   :  { %v1492_v24 = vadd.f32 %v1491_v63, %v1490_v58 }
 0x239   :  { %v1493_v0 = vrot.slane %v1492_v24, 1 }
 0x23b   :  { %v1494_v17 = vadd.f32 %v1493_v0, %v1492_v24 }
 0x23d   :  { %v1495_v16 = vmul.f32 %v1494_v17, %v3797_v19  ;;  %v1496_v19 = vld [vmem:[%s4420_s3] sm:$0x1] }
 0x23f   :  { %v1497_v23 = vadd.f32 1e-05, %v1495_v16  ;;  %v1579_v16 = vld [vmem:[%s4422_s5 + $0x68] sm:$0xff] }
 0x241   :  { %2723 = vrsqrt.f32 %v1497_v23  ;;  %vm1504_vm5 = vweird.f32 %v1497_v23 }
 0x247   :  { %v2724_v30 = vpop.eup %2723 }
 0x248   :  { %v1499_v40 = vmul.f32 %v2724_v30, %v1497_v23  ;;  %vm1505_vm4 = vweird.f32 %v2724_v30 }
 0x249   :  { %vm1506_vm6 = vmor %vm1504_vm5, %vm1505_vm4 }
 0x24a   :  { %v1500_v26 = vmul.f32 %v2724_v30, %v1499_v40 }
 0x24c   :  { %v1501_v48 = vmul.f32 0.5, %v1500_v26 }
 0x24e   :  { %v1502_v27 = vsub.f32 1.5, %v1501_v48 }
 0x250   :  { %v1503_v61 = vmul.f32 %v2724_v30, %v1502_v27 }
 0x252   :  { %v1507_v10 = vsel %vm1506_vm6, %v2724_v30, %v1503_v61 }
 0x253   :  { %v1508_v18 = vmul.f32 %v1507_v10, %v1496_v19 }
 0x255   :  { %v1510_v51 = vmul.f32 %v1508_v18, %v3800_v47  ;;  %v3870_v15 = vperm.slane %v1508_v18, 0  ;;  %v1566_v47 = vld [vmem:[%s4422_s5] sm:$0xff]  ;;  %v1568_v18 = vld [vmem:[%s4422_s5 + $0x10] sm:$0xff] }
 0x257   :  { %v1511_v57 = vsub.f32 %v1509_v43, %v1510_v51  ;;  %v1530_v45 = vmul.f32 %v3870_v15, %v3793_v46  ;;  %v1515_v34 = vmul.f32 %v3870_v15, %v3690_v14  ;;  %v1516_v13 = vmul.f32 %v3870_v15, %v3681_v5 }
 0x258   :  { %v1523_v52 = vmul.f32 %v3870_v15, %v3751_v60  ;;  %v1524_v14 = vmul.f32 %v3870_v15, %v3759_v56  ;;  %v1525_v12 = vmul.f32 %v3870_v15, %v3766_v32  ;;  %v1517_v5 = vmul.f32 %v3870_v15, %v3694_v36  ;;  %v1574_v56 = vld [vmem:[%s4422_s5 + $0x40] sm:$0xff] }
 0x259   :  { %v3874_v35 = vperm.slane %v1511_v57, 0  ;;  %v1526_v41 = vmul.f32 %v3870_v15, %v3771_v50  ;;  %v1527_v37 = vmul.f32 %v3870_v15, %v3776_v21  ;;  %v1575_v50 = vld [vmem:[%s4422_s5 + $0x48] sm:$0xff]  ;;  %v1576_v21 = vld [vmem:[%s4422_s5 + $0x50] sm:$0xff]  ;;  %v1528_v39 = vmul.f32 %v3870_v15, %v3781_v1 }
 0x25a   :  { %v1529_v25 = vmul.f32 %v3870_v15, %v3786_v22  ;;  %v1567_v1 = vld [vmem:[%s4422_s5 + $0x8] sm:$0xff]  ;;  %v1518_v43 = vmul.f32 %v3870_v15, %v3702_v11 }
 0x25b   :  { %v1549_v62 = vadd.f32 %v3874_v35, %v1530_v45  ;;  %v1534_v33 = vadd.f32 %v3874_v35, %v1515_v34  ;;  %v1535_v9 = vadd.f32 %v3874_v35, %v1516_v13  ;;  %v1542_v60 = vadd.f32 %v3874_v35, %v1523_v52  ;;  %v1569_v34 = vld [vmem:[%s4422_s5 + $0x18] sm:$0xff] }
 0x25c   :  { %v1543_v32 = vadd.f32 %v3874_v35, %v1524_v14  ;;  %v1544_v36 = vadd.f32 %v3874_v35, %v1525_v12  ;;  %v1545_v49 = vadd.f32 %v3874_v35, %v1526_v41  ;;  %v1546_v8 = vadd.f32 %v3874_v35, %v1527_v37  ;;  %v1571_v14 = vld [vmem:[%s4422_s5 + $0x28] sm:$0xff]  ;;  %v1572_v37 = vld [vmem:[%s4422_s5 + $0x30] sm:$0xff] }
 0x25d   :  { %v1550_v3 = vmax.f32 %v1534_v33, 0.0  ;;  %v1551_v42 = vmax.f32 %v1535_v9, 0.0  ;;  %v1558_v59 = vmax.f32 %v1542_v60, 0.0  ;;  %v1565_v58 = vmax.f32 %v1549_v62, 0.0 }
 0x25e   :  { %v1559_v55 = vmax.f32 %v1543_v32, 0.0  ;;  %v1560_v6 = vmax.f32 %v1544_v36, 0.0  ;;  %v1561_v22 = vmax.f32 %v1545_v49, 0.0  ;;  %v1562_v63 = vmax.f32 %v1546_v8, 0.0  ;;  %v1573_v32 = vld [vmem:[%s4422_s5 + $0x38] sm:$0xff] }
 0x25f   :  { %v3886_v46 = vadd.f32 %v1566_v47, %v1550_v3  ;;  %v1547_v24 = vadd.f32 %v3874_v35, %v1528_v39  ;;  %v1548_v0 = vadd.f32 %v3874_v35, %v1529_v25  ;;  %v3934_v17 = vadd.f32 %v1574_v56, %v1558_v59  ;;  %v1570_v47 = vld [vmem:[%s4422_s5 + $0x20] sm:$0xff] }
 0x260   :  { %v3936_v38 = vadd.f32 %v1575_v50, %v1559_v55  ;;  %v3938_v54 = vadd.f32 %v1576_v21, %v1560_v6  ;;  %v3946_v23 = vadd.f32 %v1581_v53, %v1565_v58  ;;  %v3948_v31 = vadd.f32 %v1577_v44, %v1561_v22  ;;  %v2720_v50 = vld [vmem:[%s4423_s7] ss:$0 sm:$0xff]  ;;  %s2791_s7 = smov 112  }
 0x261   :  { %2612 = vmatmul.msk.f32.vlgmr.msra.gmra.mxu1 %vm1380_vm2, %v3886_v46  ;;  %v3950_v30 = vadd.f32 %v1578_v28, %v1562_v63  ;;  %v1563_v40 = vmax.f32 %v1547_v24, 0.0  ;;  %v1564_v26 = vmax.f32 %v1548_v0, 0.0  ;;  %v3952_v48 = vadd.f32 %v1567_v1, %v1551_v42 }
 0x262   :  { %v1536_v27 = vadd.f32 %v3874_v35, %v1517_v5  ;;  %v1537_v57 = vadd.f32 %v3874_v35, %v1518_v43  ;;  %v1519_v62 = vmul.f32 %v3870_v15, %v3715_v7  ;;  %v1520_v3 = vmul.f32 %v3870_v15, %v3725_v4 }
 0x263   :  { %v3955_v19 = vadd.f32 %v1579_v16, %v1563_v40  ;;  %v3957_v61 = vadd.f32 %v1580_v29, %v1564_v26  ;;  %v1521_v12 = vmul.f32 %v3870_v15, %v3735_v2  ;;  %v1522_v42 = vmul.f32 %v3870_v15, %v3744_v20 }
 0x264   :  { %v1552_v10 = vmax.f32 %v1536_v27, 0.0  ;;  %v1553_v45 = vmax.f32 %v1537_v57, 0.0  ;;  %v1538_v13 = vadd.f32 %v3874_v35, %v1519_v62  ;;  %v1539_v52 = vadd.f32 %v3874_v35, %v1520_v3 }
 0x265   :  { %v1540_v41 = vadd.f32 %v3874_v35, %v1521_v12  ;;  %v1541_v56 = vadd.f32 %v3874_v35, %v1522_v42 }
 0x266   :  { %v3966_v51 = vadd.f32 %v1568_v18, %v1552_v10  ;;  %v3976_v33 = vadd.f32 %v1569_v34, %v1553_v45  ;;  %v1554_v11 = vmax.f32 %v1538_v13, 0.0  ;;  %v1555_v7 = vmax.f32 %v1539_v52, 0.0 }
 0x267   :  { %v1556_v4 = vmax.f32 %v1540_v41, 0.0  ;;  %v1557_v2 = vmax.f32 %v1541_v56, 0.0 }
 0x268   :  { %v3986_v9 = vadd.f32 %v1570_v47, %v1554_v11  ;;  %v3996_v5 = vadd.f32 %v1571_v14, %v1555_v7 }
 0x269   :  { %2613 = vmatmul.msk.f32.gmra.mxu1 %vm1380_vm2, %v3952_v48  ;;  %v4006_v60 = vadd.f32 %v1572_v37, %v1556_v4  ;;  %v4014_v36 = vadd.f32 %v1573_v32, %v1557_v2 }
 0x271   :  { %2614 = vmatmul.msk.f32.gmra.mxu1 %vm1380_vm2, %v3966_v51 }
 0x279   :  { %2615 = vmatmul.msk.f32.gmra.mxu1 %vm1380_vm2, %v3976_v33 }
 0x281   :  { %2616 = vmatmul.msk.f32.gmra.mxu1 %vm1380_vm2, %v3986_v9 }
 0x289   :  { %2617 = vmatmul.msk.f32.gmra.mxu1 %vm1380_vm2, %v3996_v5 }
 0x291   :  { %2618 = vmatmul.msk.f32.gmra.mxu1 %vm1380_vm2, %v4006_v60 }
 0x299   :  { %2619 = vmatmul.msk.f32.gmra.mxu1 %vm1380_vm2, %v4014_v36 }
 0x2a1   :  { %2620 = vmatmul.msk.f32.gmra.mxu1 %vm1380_vm2, %v3934_v17 }
 0x2a9   :  { %2621 = vmatmul.msk.f32.gmra.mxu1 %vm1380_vm2, %v3936_v38 }
 0x2b1   :  { %2622 = vmatmul.msk.f32.gmra.mxu1 %vm1380_vm2, %v3938_v54 }
 0x2b9   :  { %2623 = vmatmul.msk.f32.gmra.mxu1 %vm1380_vm2, %v3948_v31 }
 0x2c1   :  { %2624 = vmatmul.msk.f32.gmra.mxu1 %vm1380_vm2, %v3950_v30 }
 0x2c9   :  { %2625 = vmatmul.msk.f32.gmra.mxu1 %vm1380_vm2, %v3955_v19 }
 0x2d1   :  { %2626 = vmatmul.msk.f32.gmra.mxu1 %vm1380_vm2, %v3957_v61 }
 0x2d9   :  { %2627 = vmatmul.msk.f32.gmra.mxu1 %vm1380_vm2, %v3946_v23 }
 0x2de   :  { %v1671_v20 = vpop.f32.mrf.mxu1 }
 0x2df   :  { %v1672_v44 = vadd.f32 %v2720_v50, %v1671_v20 }
 0x2e6   :  { %v1674_v15 = vpop.f32.mrf.mxu1 }
 0x2e7   :  { %v1675_v63 = vadd.f32 %v2720_v50, %v1674_v15 }
 0x2e9   :  { %v2694_v3 = vpack.i.bf16 %v1672_v44, %v1675_v63 }
 0x2ee   :  { %v1677_v35 = vpop.f32.mrf.mxu1 }
 0x2ef   :  { %v4041_v39 = vadd.f32 %v2720_v50, %v1677_v35 }
 0x2f6   :  { %v1680_v21 = vpop.f32.mrf.mxu1 }
 0x2f7   :  { %v4037_v49 = vadd.f32 %v2720_v50, %v1680_v21 }
 0x2f9   :  { %1734 = vrot.lane.b32.xlu2 %v4037_v49, %s2790_s10  ;;  %v2689_v45 = vpack.i.bf16 %v4041_v39, %v4037_v49 }
 0x2fe   :  { %v1683_v8 = vpop.f32.mrf.mxu1 }
 0x2ff   :  { %v4049_v55 = vadd.f32 %v2720_v50, %v1683_v8 }
 0x301   :  { %1732 = vrot.lane.b32.xlu2 %v4041_v39, %s2790_s10 }
 0x306   :  { %v1686_v25 = vpop.f32.mrf.mxu1 }
 0x307   :  { %v4045_v53 = vadd.f32 %v2720_v50, %v1686_v25 }
 0x309   :  { %1738 = vrot.lane.b32.xlu1 %v4045_v53, %s2790_s10  ;;  %v2684_v47 = vpack.i.bf16 %v4049_v55, %v4045_v53 }
 0x30e   :  { %v1689_v59 = vpop.f32.mrf.mxu1 }
 0x30f   :  { %v4058_v1 = vadd.f32 %v2720_v50, %v1689_v59 }
 0x311   :  { %1736 = vrot.lane.b32.xlu1 %v4049_v55, %s2790_s10 }
 0x316   :  { %v1692_v6 = vpop.f32.mrf.mxu1 }
 0x317   :  { %v4053_v28 = vadd.f32 %v2720_v50, %v1692_v6 }
 0x319   :  { %1742 = vrot.lane.b32.xlu0 %v4053_v28, %s2790_s10  ;;  %1728 = vrot.lane.b32.xlu1 %v1672_v44, %s2790_s10  ;;  %v2679_v11 = vpack.i.bf16 %v4058_v1, %v4053_v28 }
 0x31e   :  { %v1695_v58 = vpop.f32.mrf.mxu1 }
 0x31f   :  { %v4086_v34 = vadd.f32 %v2720_v50, %v1695_v58 }
 0x321   :  { %1740 = vrot.lane.b32.xlu0 %v4058_v1, %s2790_s10 }
 0x326   :  { %v1698_v22 = vpop.f32.mrf.mxu1 }
 0x327   :  { %v4094_v13 = vadd.f32 %v2720_v50, %v1698_v22 }
 0x329   :  { %1730 = vrot.lane.b32.xlu0 %v1675_v63, %s2790_s10 }
 0x32e   :  { %v1701_v24 = vpop.f32.mrf.mxu1 }
 0x32f   :  { %v4067_v27 = vadd.f32 %v2720_v50, %v1701_v24 }
 0x336   :  { %v1704_v0 = vpop.f32.mrf.mxu1 }
 0x337   :  { %v4075_v43 = vadd.f32 %v2720_v50, %v1704_v0 }
 0x33e   :  { %v1707_v16 = vpop.f32.mrf.mxu1 }
 0x33f   :  { %v4088_v62 = vadd.f32 %v2720_v50, %v1707_v16 }
 0x346   :  { %v1710_v29 = vpop.f32.mrf.mxu1 }
 0x347   :  { %v4063_v40 = vadd.f32 %v2720_v50, %v1710_v29 }
 0x349   :  { %2039 = vrot.lane.b32.xlu1 %v4063_v40, %s2790_s10 }
 0x34e   :  { %v1713_v26 = vpop.f32.mrf.mxu1 }
 0x34f   :  { %v4069_v10 = vadd.f32 %v2720_v50, %v1713_v26 }
 0x351   :  { %2041 = vrot.lane.b32.xlu0 %v4069_v10, %s2790_s10  ;;  %2033 = vrot.lane.b32.xlu1 %v4067_v27, %s2790_s10 }
 0x353   :  { %v1735_v12 = vpop.permute.xlu2 %1734 }
 0x356   :  { %v1716_v18 = vpop.f32.mrf.mxu1 }
 0x357   :  { %v4077_v57 = vadd.f32 %v2720_v50, %v1716_v18 }
 0x359   :  { %2043 = vrot.lane.b32.xlu2 %v4077_v57, %s2790_s10  ;;  %2035 = vrot.lane.b32.xlu0 %v4075_v43, %s2790_s10 }
 0x35a   :  { %2690 = vrot.lane.b32.xlu1 %v2689_v45, %s2791_s7 }
 0x35b   :  { %v1733_v4 = vpop.permute.xlu2 %1732 }
 0x361   :  { %2037 = vrot.lane.b32.xlu2 %v4088_v62, %s2790_s10  ;;  %2029 = vrot.lane.b32.xlu0 %v4086_v34, %s2790_s10 }
 0x369   :  { %2031 = vrot.lane.b32.xlu2 %v4094_v13, %s2790_s10  ;;  %2680 = vrot.lane.b32.xlu0 %v2679_v11, %s2791_s7 }
 0x371   :  { %2685 = vrot.lane.b32.xlu2 %v2684_v47, %s2791_s7 }
 0x379   :  { %2695 = vrot.lane.b32.xlu2 %v2694_v3, %s2791_s7 }
 0x37b   :  { %v1739_v7 = vpop.permute.xlu1 %1738 }
 0x383   :  { %v1737_v41 = vpop.permute.xlu1 %1736 }
 0x38b   :  { %v1743_v52 = vpop.permute.xlu0 %1742  ;;  %v1729_v42 = vpop.permute.xlu1 %1728 }
 0x38c   :  { %2628 = vmatpush.xpose.msk.msra.mxu2 %vm1744_vm7, %v1743_v52 }
 0x393   :  { %v1741_v14 = vpop.permute.xlu0 %1740 }
 0x394   :  { %2629 = vmatpush.xpose.msk.msra.mxu2 %vm1744_vm7, %v1741_v14 }
 0x398   :  { %2630 = vmatpush.xpose.msk.msra.mxu2 %vm1744_vm7, %v1739_v7 }
 0x39b   :  { %v1731_v37 = vpop.permute.xlu0 %1730 }
 0x39c   :  { %2631 = vmatpush.xpose.msk.msra.mxu2 %vm1744_vm7, %v1737_v41 }
 0x3a0   :  { %2632 = vmatpush.xpose.msk.msra.mxu2 %vm1744_vm7, %v1735_v12 }
 0x3a4   :  { %2633 = vmatpush.xpose.msk.msra.mxu2 %vm1744_vm7, %v1733_v4 }
 0x3a8   :  { %2634 = vmatpush.xpose.msk.msra.mxu2 %vm1744_vm7, %v1731_v37 }
 0x3ac   :  { %2635 = vmatpush.xpose.msk.msra.mxu2 %vm1744_vm7, %v1729_v42 }
 0x3af   :  { %2636 = vmatmul.msk.f32.vlgmr.msra.gmra.mxu2 %vm1744_vm7, %v1672_v44 }
 0x3b3   :  { %v2044_v56 = vpop.permute.xlu2 %2043 }
 0x3b4   :  { %2652 = vmatpush.xpose.msk.msrb.mxu2 %vm1744_vm7, %v2044_v56 }
 0x3b7   :  { %2637 = vmatmul.msk.f32.gmra.mxu2 %vm1744_vm7, %v1675_v63 }
 0x3bb   :  { %v2038_v32 = vpop.permute.xlu2 %2037  ;;  %v2040_v20 = vpop.permute.xlu1 %2039 }
 0x3bf   :  { %2638 = vmatmul.msk.f32.gmra.mxu2 %vm1744_vm7, %v4041_v39 }
 0x3c3   :  { %v2042_v2 = vpop.permute.xlu0 %2041  ;;  %v2032_v35 = vpop.permute.xlu2 %2031 }
 0x3c4   :  { %2653 = vmatpush.xpose.msk.msrb.mxu2 %vm1744_vm7, %v2042_v2  ;;  %v2034_v50 = vpop.permute.xlu1 %2033 }
 0x3c7   :  { %2639 = vmatmul.msk.f32.gmra.mxu2 %vm1744_vm7, %v4037_v49 }
 0x3c8   :  { %2654 = vmatpush.xpose.msk.msrb.mxu2 %vm1744_vm7, %v2040_v20 }
 0x3cb   :  { %v2036_v15 = vpop.permute.xlu0 %2035  ;;  %v2686_v49 = vpop.permute.xlu2 %2685 }
 0x3cc   :  { %2655 = vmatpush.xpose.msk.msrb.mxu2 %vm1744_vm7, %v2038_v32  ;;  %v2687_v59 = vunpack.i.l.bf16 %v2686_v49  ;;  %v2688_v6 = vunpack.i.h.bf16 %v2686_v49 }
 0x3cf   :  { %2640 = vmatmul.msk.f32.gmra.mxu2 %vm1744_vm7, %v4049_v55  ;;  %v2691_v55 = vpop.permute.xlu1 %2690 }
 0x3d0   :  { %2656 = vmatpush.xpose.msk.msrb.mxu2 %vm1744_vm7, %v2036_v15  ;;  %v2692_v44 = vunpack.i.l.bf16 %v2691_v55  ;;  %v2693_v58 = vunpack.i.h.bf16 %v2691_v55 }
 0x3d3   :  { %v2030_v21 = vpop.permute.xlu0 %2029 }
 0x3d4   :  { %2657 = vmatpush.xpose.msk.msrb.mxu2 %vm1744_vm7, %v2034_v50 }
 0x3d7   :  { %2641 = vmatmul.msk.f32.gmra.mxu2 %vm1744_vm7, %v4045_v53  ;;  %v2696_v53 = vpop.permute.xlu2 %2695 }
 0x3d8   :  { %2658 = vmatpush.xpose.msk.msrb.mxu2 %vm1744_vm7, %v2032_v35  ;;  %v2697_v22 = vunpack.i.l.bf16 %v2696_v53  ;;  %v2698_v63 = vunpack.i.h.bf16 %v2696_v53 }
 0x3db   :  { %v2681_v8 = vpop.permute.xlu0 %2680 }
 0x3dc   :  { %v2682_v39 = vunpack.i.l.bf16 %v2681_v8  ;;  %2659 = vmatpush.xpose.msk.msrb.mxu2 %vm1744_vm7, %v2030_v21  ;;  %v2683_v25 = vunpack.i.h.bf16 %v2681_v8 }
 0x3de   :  { %1963 = vmatpush.msra.mxu3 %v2682_v39 }
 0x3df   :  { %2642 = vmatmul.msk.f32.gmra.mxu2 %vm1744_vm7, %v4058_v1 }
 0x3e0   :  { %1964 = vmatpush.msra.mxu3 %v2683_v25 }
 0x3e2   :  { %1965 = vmatpush.msra.mxu3 %v2687_v59 }
 0x3e4   :  { %1966 = vmatpush.msra.mxu3 %v2688_v6 }
 0x3e6   :  { %1967 = vmatpush.msra.mxu3 %v2692_v44 }
 0x3e7   :  { %2643 = vmatmul.msk.f32.gmra.mxu2 %vm1744_vm7, %v4053_v28 }
 0x3e8   :  { %1968 = vmatpush.msra.mxu3 %v2693_v58 }
 0x3ea   :  { %1969 = vmatpush.msra.mxu3 %v2697_v22 }
 0x3ec   :  { %1970 = vmatpush.msra.mxu3 %v2698_v63 }
 0x3ef   :  { %2660 = vmatmul.msk.f32.vlgmr.msrb.gmra.mxu2 %vm1744_vm7, %v4086_v34 }
 0x3f7   :  { %2661 = vmatmul.msk.f32.gmra.mxu2 %vm1744_vm7, %v4094_v13 }
 0x3ff   :  { %2662 = vmatmul.msk.f32.gmra.mxu2 %vm1744_vm7, %v4067_v27 }
 0x407   :  { %2663 = vmatmul.msk.f32.gmra.mxu2 %vm1744_vm7, %v4075_v43 }
 0x40f   :  { %2664 = vmatmul.msk.f32.gmra.mxu2 %vm1744_vm7, %v4088_v62 }
 0x417   :  { %2665 = vmatmul.msk.f32.gmra.mxu2 %vm1744_vm7, %v4063_v40 }
 0x41f   :  { %2666 = vmatmul.msk.f32.gmra.mxu2 %vm1744_vm7, %v4069_v10 }
 0x427   :  { %2667 = vmatmul.msk.f32.gmra.mxu2 %vm1744_vm7, %v4077_v57 }
 0x432   :  { %v1794_v28 = vpop.f32.mrf.mxu2 }
 0x433   :  { %v1819_v1 = vsel %vm1818_vm8, %v1794_v28, -inf }
 0x434   :  { %1820 = vmax.xlane.f32.xlu1 %v1819_v1 }
 0x43a   :  { %v1797_v24 = vpop.f32.mrf.mxu2 }
 0x43b   :  { %v1822_v0 = vsel %vm1818_vm8, %v1797_v24, -inf }
 0x43c   :  { %1823 = vmax.xlane.f32.xlu2 %v1822_v0 }
 0x442   :  { %v1800_v16 = vpop.f32.mrf.mxu2 }
 0x443   :  { %v1825_v29 = vsel %vm1818_vm8, %v1800_v16, -inf }
 0x444   :  { %1826 = vmax.xlane.f32.xlu0 %v1825_v29 }
 0x44a   :  { %v1803_v26 = vpop.f32.mrf.mxu2 }
 0x44b   :  { %v1828_v18 = vsel %vm1818_vm8, %v1803_v26, -inf }
 0x44c   :  { %1829 = vmax.xlane.f32.xlu2 %v1828_v18 }
 0x452   :  { %v1806_v45 = vpop.f32.mrf.mxu2 }
 0x453   :  { %v1831_v11 = vsel %vm1818_vm8, %v1806_v45, -inf }
 0x454   :  { %1832 = vmax.xlane.f32.xlu1 %v1831_v11 }
 0x45a   :  { %v1809_v47 = vpop.f32.mrf.mxu2 }
 0x45b   :  { %v1834_v3 = vsel %vm1818_vm8, %v1809_v47, -inf }
 0x45c   :  { %1835 = vmax.xlane.f32.xlu2 %v1834_v3 }
 0x462   :  { %v4157_v52 = vpop.f32.mrf.mxu2 }
 0x463   :  { %v1837_v7 = vsel %vm1818_vm8, %v4157_v52, -inf }
 0x464   :  { %1838 = vmax.xlane.f32.xlu1 %v1837_v7 }
 0x46a   :  { %v4161_v14 = vpop.f32.mrf.mxu2 }
 0x46b   :  { %v1840_v12 = vsel %vm1818_vm8, %v4161_v14, -inf }
 0x46c   :  { %1841 = vmax.xlane.f32.xlu0 %v1840_v12 }
 0x472   :  { %v4165_v41 = vpop.f32.mrf.mxu2 }
 0x473   :  { %v2118_v4 = vsel %vm1818_vm8, %v4165_v41, -inf }
 0x474   :  { %2119 = vmax.xlane.f32.xlu1 %v2118_v4 }
 0x47a   :  { %v4169_v37 = vpop.f32.mrf.mxu2 }
 0x47b   :  { %v2121_v42 = vsel %vm1818_vm8, %v4169_v37, -inf }
 0x47c   :  { %2122 = vmax.xlane.f32.xlu0 %v2121_v42 }
 0x482   :  { %v4173_v56 = vpop.f32.mrf.mxu2 }
 0x483   :  { %v2124_v2 = vsel %vm1818_vm8, %v4173_v56, -inf }
 0x484   :  { %2125 = vmax.xlane.f32.xlu2 %v2124_v2 }
 0x48a   :  { %v4177_v32 = vpop.f32.mrf.mxu2 }
 0x48b   :  { %v2127_v20 = vsel %vm1818_vm8, %v4177_v32, -inf }
 0x48c   :  { %2128 = vmax.xlane.f32.xlu0 %v2127_v20 }
 0x492   :  { %v4181_v15 = vpop.f32.mrf.mxu2 }
 0x493   :  { %v2130_v35 = vsel %vm1818_vm8, %v4181_v15, -inf }
 0x494   :  { %2131 = vmax.xlane.f32.xlu1 %v2130_v35 }
 0x49a   :  { %v4185_v50 = vpop.f32.mrf.mxu2 }
 0x49b   :  { %v2133_v21 = vsel %vm1818_vm8, %v4185_v50, -inf }
 0x49c   :  { %2134 = vmax.xlane.f32.xlu2 %v2133_v21 }
 0x4a7   :  { %v1821_v49 = vpop.xlane.xlu1 %1820 }
 0x4a8   :  { %v1843_v8 = vsub.f32 %v1794_v28, %v1821_v49 }
 0x4aa   :  { %v1851_v39 = vmul.f32 1.442695, %v1843_v8 }
 0x4ac   :  { %2725 = vpow2.f32 %v1851_v39 }
 0x4af   :  { %v1824_v25 = vpop.xlane.xlu2 %1823 }
 0x4b0   :  { %v1844_v59 = vsub.f32 %v1797_v24, %v1824_v25 }
 0x4b2   :  { %v4189_v55 = vpop.eup %2725  ;;  %v1853_v6 = vmul.f32 1.442695, %v1844_v59 }
 0x4b3   :  { %v1867_v44 = vsel %vm1818_vm8, %v4189_v55, 0.0 }
 0x4b4   :  { %2727 = vpow2.f32 %v1853_v6  ;;  %1868 = vadd.xlane.f32.xlu1 %v1867_v44 }
 0x4b7   :  { %v1827_v53 = vpop.xlane.xlu0 %1826 }
 0x4b8   :  { %v1845_v58 = vsub.f32 %v1800_v16, %v1827_v53  ;;  %v2704_v53 = vpack.i.bf16 %v4088_v62, %v4063_v40  ;;  %v2709_v40 = vpack.i.bf16 %v4067_v27, %v4075_v43 }
 0x4ba   :  { %v4193_v22 = vpop.eup %2727  ;;  %v1855_v63 = vmul.f32 1.442695, %v1845_v58 }
 0x4bb   :  { %v1870_v28 = vsel %vm1818_vm8, %v4193_v22, 0.0 }
 0x4bc   :  { %2729 = vpow2.f32 %v1855_v63  ;;  %1871 = vadd.xlane.f32.xlu2 %v1870_v28  ;;  %v2699_v28 = vpack.i.bf16 %v4069_v10, %v4077_v57 }
 0x4bf   :  { %v1830_v1 = vpop.xlane.xlu2 %1829 }
 0x4c0   :  { %v1846_v24 = vsub.f32 %v1803_v26, %v1830_v1 }
 0x4c2   :  { %v4197_v0 = vpop.eup %2729  ;;  %v1857_v29 = vmul.f32 1.442695, %v1846_v24 }
 0x4c3   :  { %v1873_v18 = vsel %vm1818_vm8, %v4197_v0, 0.0 }
 0x4c4   :  { %2731 = vpow2.f32 %v1857_v29  ;;  %1874 = vadd.xlane.f32.xlu0 %v1873_v18 }
 0x4c7   :  { %v1833_v11 = vpop.xlane.xlu1 %1832 }
 0x4c8   :  { %v1847_v16 = vsub.f32 %v1806_v45, %v1833_v11 }
 0x4ca   :  { %v4201_v3 = vpop.eup %2731  ;;  %v1859_v7 = vmul.f32 1.442695, %v1847_v16 }
 0x4cb   :  { %v1876_v12 = vsel %vm1818_vm8, %v4201_v3, 0.0 }
 0x4cc   :  { %2733 = vpow2.f32 %v1859_v7  ;;  %1877 = vadd.xlane.f32.xlu0 %v1876_v12 }
 0x4cf   :  { %v1836_v4 = vpop.xlane.xlu2 %1835 }
 0x4d0   :  { %v1848_v26 = vsub.f32 %v1809_v47, %v1836_v4  ;;  %v4214_v47 = vpop.f32.mrf.mxu2 }
 0x4d1   :  { %v2136_v25 = vsel %vm1818_vm8, %v4214_v47, -inf }
 0x4d2   :  { %v4205_v42 = vpop.eup %2733  ;;  %v1861_v2 = vmul.f32 1.442695, %v1848_v26 }
 0x4d3   :  { %v1879_v20 = vsel %vm1818_vm8, %v4205_v42, 0.0 }
 0x4d4   :  { %2735 = vpow2.f32 %v1861_v2  ;;  %1880 = vadd.xlane.f32.xlu1 %v1879_v20 }
 0x4d7   :  { %v1839_v35 = vpop.xlane.xlu1 %1838 }
 0x4d8   :  { %v1849_v45 = vsub.f32 %v4157_v52, %v1839_v35  ;;  %v4242_v7 = vpop.f32.mrf.mxu2 }
 0x4d9   :  { %v2139_v43 = vsel %vm1818_vm8, %v4242_v7, -inf }
 0x4da   :  { %v4210_v21 = vpop.eup %2735  ;;  %v1863_v49 = vmul.f32 1.442695, %v1849_v45 }
 0x4db   :  { %v1882_v8 = vsel %vm1818_vm8, %v4210_v21, 0.0 }
 0x4dc   :  { %2737 = vpow2.f32 %v1863_v49  ;;  %1883 = vadd.xlane.f32.xlu2 %v1882_v8 }
 0x4df   :  { %v1842_v1 = vpop.xlane.xlu0 %1841 }
 0x4e2   :  { %v4216_v39 = vpop.eup %2737 }
 0x4e3   :  { %v1885_v59 = vsel %vm1818_vm8, %v4216_v39, 0.0 }
 0x4e4   :  { %2137 = vmax.xlane.f32.xlu2 %v2136_v25  ;;  %1886 = vadd.xlane.f32.xlu0 %v1885_v59 }
 0x4e7   :  { %v2120_v52 = vpop.xlane.xlu1 %2119 }
 0x4e8   :  { %v2142_v6 = vsub.f32 %v4165_v41, %v2120_v52  ;;  %v1850_v41 = vsub.f32 %v4161_v14, %v1842_v1 }
 0x4ea   :  { %v2150_v44 = vmul.f32 1.442695, %v2142_v6  ;;  %v1865_v24 = vmul.f32 1.442695, %v1850_v41 }
 0x4ec   :  { %2739 = vpow2.f32 %v2150_v44 }
 0x4ed   :  { %2705 = vrot.lane.b32.xlu1 %v2704_v53, %s2791_s7  ;;  %2741 = vpow2.f32 %v1865_v24 }
 0x4ef   :  { %v2123_v62 = vpop.xlane.xlu0 %2122 }
 0x4f0   :  { %v2143_v24 = vsub.f32 %v4169_v37, %v2123_v62 }
 0x4f2   :  { %v4226_v58 = vpop.eup %2739 }
 0x4f3   :  { %v2166_v63 = vsel %vm1818_vm8, %v4226_v58, 0.0  ;;  %v4237_v29 = vpop.eup %2741 }
 0x4f4   :  { %2167 = vadd.xlane.f32.xlu2 %v2166_v63  ;;  %v1888_v11 = vsel %vm1818_vm8, %v4237_v29, 0.0 }
 0x4f7   :  { %v2126_v57 = vpop.xlane.xlu2 %2125 }
 0x4f8   :  { %2700 = vrot.lane.b32.xlu0 %v2699_v28, %s2791_s7  ;;  %v2144_v12 = vsub.f32 %v4173_v56, %v2126_v57  ;;  %v2714_v56 = vpack.i.bf16 %v4086_v34, %v4094_v13 }
 0x4fa   :  { %v2154_v20 = vmul.f32 1.442695, %v2144_v12 }
 0x4ff   :  { %v2129_v18 = vpop.xlane.xlu0 %2128 }
 0x500   :  { %v2145_v10 = vsub.f32 %v4177_v32, %v2129_v18  ;;  %v2152_v18 = vmul.f32 1.442695, %v2143_v24 }
 0x502   :  { %v2156_v16 = vmul.f32 1.442695, %v2145_v10 }
 0x504   :  { %2743 = vpow2.f32 %v2156_v16 }
 0x507   :  { %v2132_v14 = vpop.xlane.xlu1 %2131 }
 0x508   :  { %v2146_v27 = vsub.f32 %v4181_v15, %v2132_v14 }
 0x50a   :  { %v2158_v4 = vmul.f32 1.442695, %v2146_v27  ;;  %v4248_v2 = vpop.eup %2743 }
 0x50b   :  { %v2175_v15 = vsel %vm1818_vm8, %v4248_v2, 0.0 }
 0x50c   :  { %2710 = vrot.lane.b32.xlu2 %v2709_v40, %s2791_s7  ;;  %2745 = vpow2.f32 %v2158_v4 }
 0x50f   :  { %v2135_v26 = vpop.xlane.xlu2 %2134 }
 0x510   :  { %v2147_v32 = vsub.f32 %v4185_v50, %v2135_v26 }
 0x512   :  { %v2160_v45 = vmul.f32 1.442695, %v2147_v32  ;;  %v4253_v49 = vpop.eup %2745 }
 0x513   :  { %v2178_v52 = vsel %vm1818_vm8, %v4253_v49, 0.0 }
 0x517   :  { %1889 = vadd.xlane.f32.xlu1 %v1888_v11 }
 0x522   :  { %2140 = vmax.xlane.f32.xlu0 %v2139_v43 }
 0x527   :  { %v1869_v35 = vpop.xlane.xlu1 %1868 }
 0x528   :  { %2747 = vrcp.f32 %v1869_v35 }
 0x529   :  { %2749 = vpow2.f32 %v2154_v20 }
 0x52a   :  { %2176 = vadd.xlane.f32.xlu0 %v2175_v15  ;;  %2751 = vpow2.f32 %v2160_v45 }
 0x52e   :  { %v2748_v8 = vpop.eup %2747 }
 0x52f   :  { %v1899_v25 = vmul.f32 %v2748_v8, %v4189_v55  ;;  %v1872_v59 = vpop.xlane.xlu2 %1871  ;;  %v4259_v50 = vpop.eup %2749 }
 0x530   :  { %2753 = vrcp.f32 %v1872_v59  ;;  %2715 = vrot.lane.b32.xlu1 %v2714_v56, %s2791_s7  ;;  %v2172_v6 = vsel %vm1818_vm8, %v4259_v50, 0.0  ;;  %v4266_v44 = vpop.eup %2751 }
 0x531   :  { %2644 = vmatmul.msk.f32.vlgmr.msra.gmra.mxu3 %vm1818_vm8, %v1899_v25  ;;  %v2181_v53 = vsel %vm1818_vm8, %v4266_v44, 0.0 }
 0x532   :  { %2179 = vadd.xlane.f32.xlu0 %v2178_v52 }
 0x535   :  { %2173 = vadd.xlane.f32.xlu2 %v2172_v6 }
 0x536   :  { %v2754_v34 = vpop.eup %2753 }
 0x537   :  { %v1875_v13 = vpop.xlane.xlu0 %1874  ;;  %v1900_v55 = vmul.f32 %v2754_v34, %v4193_v22 }
 0x538   :  { %2755 = vrcp.f32 %v1875_v13 }
 0x539   :  { %2645 = vmatmul.msk.f32.gmra.mxu3 %vm1818_vm8, %v1900_v55 }
 0x53a   :  { %2182 = vadd.xlane.f32.xlu0 %v2181_v53 }
 0x53e   :  { %v2756_v63 = vpop.eup %2755 }
 0x53f   :  { %v1878_v28 = vpop.xlane.xlu0 %1877  ;;  %v1901_v1 = vmul.f32 %v2756_v63, %v4197_v0 }
 0x540   :  { %2757 = vrcp.f32 %v1878_v28 }
 0x541   :  { %2646 = vmatmul.msk.f32.gmra.mxu3 %vm1818_vm8, %v1901_v1 }
 0x546   :  { %v2758_v41 = vpop.eup %2757 }
 0x547   :  { %v1881_v40 = vpop.xlane.xlu1 %1880  ;;  %v1902_v22 = vmul.f32 %v2758_v41, %v4201_v3 }
 0x548   :  { %2759 = vrcp.f32 %v1881_v40 }
 0x549   :  { %2647 = vmatmul.msk.f32.gmra.mxu3 %vm1818_vm8, %v1902_v22  ;;  %2761 = vpow2.f32 %v2152_v18 }
 0x54e   :  { %v2760_v11 = vpop.eup %2759 }
 0x54f   :  { %v1884_v10 = vpop.xlane.xlu2 %1883  ;;  %v1903_v57 = vmul.f32 %v2760_v11, %v4205_v42  ;;  %v4279_v0 = vpop.eup %2761 }
 0x550   :  { %2763 = vrcp.f32 %v1884_v10  ;;  %v2169_v27 = vsel %vm1818_vm8, %v4279_v0, 0.0 }
 0x551   :  { %2648 = vmatmul.msk.f32.gmra.mxu3 %vm1818_vm8, %v1903_v57 }
 0x556   :  { %v2764_v16 = vpop.eup %2763 }
 0x557   :  { %v2138_v14 = vpop.xlane.xlu2 %2137  ;;  %v1887_v37 = vpop.xlane.xlu0 %1886  ;;  %v1904_v62 = vmul.f32 %v2764_v16, %v4210_v21 }
 0x558   :  { %v2148_v3 = vsub.f32 %v4214_v47, %v2138_v14  ;;  %2765 = vrcp.f32 %v1887_v37 }
 0x559   :  { %2649 = vmatmul.msk.f32.gmra.mxu3 %vm1818_vm8, %v1904_v62 }
 0x55a   :  { %v2162_v43 = vmul.f32 1.442695, %v2148_v3  ;;  %2170 = vadd.xlane.f32.xlu1 %v2169_v27 }
 0x55c   :  { %2767 = vpow2.f32 %v2162_v43 }
 0x55e   :  { %v2766_v42 = vpop.eup %2765 }
 0x55f   :  { %v1905_v12 = vmul.f32 %v2766_v42, %v4216_v39  ;;  %v2706_v32 = vpop.permute.xlu1 %2705 }
 0x560   :  { %v2707_v15 = vunpack.i.l.bf16 %v2706_v32  ;;  %v2708_v8 = vunpack.i.h.bf16 %v2706_v32 }
 0x561   :  { %2650 = vmatmul.msk.f32.gmra.mxu3 %vm1818_vm8, %v1905_v12 }
 0x562   :  { %v4288_v4 = vpop.eup %2767 }
 0x563   :  { %v2184_v21 = vsel %vm1818_vm8, %v4288_v4, 0.0 }
 0x564   :  { %2185 = vadd.xlane.f32.xlu1 %v2184_v21 }
 0x567   :  { %v2168_v47 = vpop.xlane.xlu2 %2167 }
 0x56a   :  { %v2701_v26 = vpop.permute.xlu0 %2700 }
 0x56b   :  { %v2702_v20 = vunpack.i.l.bf16 %v2701_v26  ;;  %v2703_v35 = vunpack.i.h.bf16 %v2701_v26 }
 0x56d   :  { %2262 = vmatpush.msrb.mxu3 %v2702_v20 }
 0x56f   :  { %2263 = vmatpush.msrb.mxu3 %v2703_v35  ;;  %v2711_v45 = vpop.permute.xlu2 %2710 }
 0x570   :  { %v2712_v39 = vunpack.i.l.bf16 %v2711_v45  ;;  %v2713_v56 = vunpack.i.h.bf16 %v2711_v45 }
 0x571   :  { %2264 = vmatpush.msrb.mxu3 %v2707_v15 }
 0x573   :  { %2265 = vmatpush.msrb.mxu3 %v2708_v8 }
 0x575   :  { %2266 = vmatpush.msrb.mxu3 %v2712_v39 }
 0x577   :  { %2267 = vmatpush.msrb.mxu3 %v2713_v56 }
 0x58a   :  { %v1890_v25 = vpop.xlane.xlu1 %1889 }
 0x58b   :  { %2769 = vrcp.f32 %v1890_v25 }
 0x591   :  { %v2770_v59 = vpop.eup %2769 }
 0x592   :  { %v1906_v52 = vmul.f32 %v2770_v59, %v4237_v29 }
 0x594   :  { %2651 = vmatmul.msk.f32.gmra.mxu3 %vm1818_vm8, %v1906_v52 }
 0x595   :  { %v2141_v6 = vpop.xlane.xlu0 %2140 }
 0x596   :  { %v2149_v34 = vsub.f32 %v4242_v7, %v2141_v6  ;;  %v4304_v7 = vstv %s4424_s8 }
 0x598   :  { %v2164_v13 = vmul.f32 1.442695, %v2149_v34 }
 0x59a   :  { %2771 = vpow2.f32 %v2164_v13 }
 0x59b   :  { %2773 = vrcp.f32 %v2168_v47 }
 0x59d   :  { %v2177_v27 = vpop.xlane.xlu0 %2176 }
 0x5a0   :  { %v4295_v55 = vpop.eup %2771 }
 0x5a1   :  { %v2187_v53 = vsel %vm1818_vm8, %v4295_v55, 0.0  ;;  %v2774_v28 = vpop.eup %2773 }
 0x5a2   :  { %2188 = vadd.xlane.f32.xlu2 %v2187_v53  ;;  %v2716_v63 = vpop.permute.xlu1 %2715  ;;  %v2198_v29 = vmul.f32 %v2774_v28, %v4226_v58 }
 0x5a3   :  { %v2717_v1 = vunpack.i.l.bf16 %v2716_v63  ;;  %v2718_v41 = vunpack.i.h.bf16 %v2716_v63 }
 0x5a5   :  { %2268 = vmatpush.msrb.mxu3 %v2717_v1  ;;  %v2180_v20 = vpop.xlane.xlu0 %2179 }
 0x5a7   :  { %2269 = vmatpush.msrb.mxu3 %v2718_v41 }
 0x5a8   :  { %2668 = vmatmul.msk.f32.vlgmr.msrb.gmra.mxu3 %vm1818_vm8, %v2198_v29  ;;  %v2174_v62 = vpop.xlane.xlu2 %2173 }
 0x5b4   :  { %v1972_v24 = vpop.f32.mrf.mxu3 }
 0x5b5   :  { %v1997_v40 = vmul.f32 %v4304_v7, %v1972_v24 }
 0x5b7   :  { %v2005_v22 = vadd.f32 %v1997_v40, %v3886_v46 }
 0x5b9   :  { %2013 = vst.msk [vmem:[%s4425_s9] sm:$0xff] %vm1380_vm2, %v2005_v22 }
 0x5bc   :  { %v1975_v18 = vpop.f32.mrf.mxu3 }
 0x5bd   :  { %v1998_v58 = vmul.f32 %v4304_v7, %v1975_v18 }
 0x5bf   :  { %v2006_v11 = vadd.f32 %v1998_v58, %v3952_v48 }
 0x5c1   :  { %2014 = vst.msk [vmem:[%s4425_s9 + $0x8] sm:$0xff] %vm1380_vm2, %v2006_v11 }
 0x5c4   :  { %v1978_v10 = vpop.f32.mrf.mxu3 }
 0x5c5   :  { %v1999_v57 = vmul.f32 %v4304_v7, %v1978_v10 }
 0x5c7   :  { %v2007_v46 = vadd.f32 %v1999_v57, %v3966_v51 }
 0x5c9   :  { %2015 = vst.msk [vmem:[%s4425_s9 + $0x10] sm:$0xff] %vm1380_vm2, %v2007_v46 }
 0x5cc   :  { %v1981_v16 = vpop.f32.mrf.mxu3 }
 0x5cd   :  { %v2000_v14 = vmul.f32 %v4304_v7, %v1981_v16  ;;  %v2171_v37 = vpop.xlane.xlu1 %2170 }
 0x5ce   :  { %2775 = vrcp.f32 %v2171_v37 }
 0x5cf   :  { %v2008_v48 = vadd.f32 %v2000_v14, %v3976_v33  ;;  %2777 = vrcp.f32 %v2174_v62 }
 0x5d0   :  { %2779 = vrcp.f32 %v2177_v27 }
 0x5d1   :  { %2016 = vst.msk [vmem:[%s4425_s9 + $0x18] sm:$0xff] %vm1380_vm2, %v2008_v48  ;;  %2781 = vrcp.f32 %v2180_v20 }
 0x5d4   :  { %v2776_v3 = vpop.eup %2775  ;;  %v1984_v51 = vpop.f32.mrf.mxu3 }
 0x5d5   :  { %v2001_v43 = vmul.f32 %v4304_v7, %v1984_v51  ;;  %v2199_v42 = vmul.f32 %v2776_v3, %v4279_v0  ;;  %v2778_v33 = vpop.eup %2777 }
 0x5d6   :  { %v2200_v26 = vmul.f32 %v2778_v33, %v4259_v50  ;;  %v2183_v50 = vpop.xlane.xlu0 %2182 }
 0x5d7   :  { %v2009_v12 = vadd.f32 %v2001_v43, %v3986_v9  ;;  %2669 = vmatmul.msk.f32.gmra.mxu3 %vm1818_vm8, %v2199_v42  ;;  %v2780_v9 = vpop.eup %2779  ;;  %2783 = vrcp.f32 %v2183_v50  ;;  %v2186_v39 = vpop.xlane.xlu1 %2185 }
 0x5d8   :  { %v2201_v15 = vmul.f32 %v2780_v9, %v4248_v2  ;;  %2785 = vrcp.f32 %v2186_v39 }
 0x5d9   :  { %2017 = vst.msk [vmem:[%s4425_s9 + $0x20] sm:$0xff] %vm1380_vm2, %v2009_v12 }
 0x5dc   :  { %v1987_v21 = vpop.f32.mrf.mxu3 }
 0x5dd   :  { %v2002_v47 = vmul.f32 %v4304_v7, %v1987_v21 }
 0x5df   :  { %v2010_v32 = vadd.f32 %v2002_v47, %v3996_v5  ;;  %2670 = vmatmul.msk.f32.gmra.mxu3 %vm1818_vm8, %v2200_v26  ;;  %v2782_v5 = vpop.eup %2781 }
 0x5e0   :  { %v2202_v8 = vmul.f32 %v2782_v5, %v4253_v49  ;;  %v2784_v56 = vpop.eup %2783 }
 0x5e1   :  { %2018 = vst.msk [vmem:[%s4425_s9 + $0x28] sm:$0xff] %vm1380_vm2, %v2010_v32  ;;  %v2203_v2 = vmul.f32 %v2784_v56, %v4266_v44 }
 0x5e4   :  { %v1990_v0 = vpop.f32.mrf.mxu3 }
 0x5e5   :  { %v2003_v35 = vmul.f32 %v4304_v7, %v1990_v0 }
 0x5e7   :  { %v2011_v45 = vadd.f32 %v2003_v35, %v4006_v60  ;;  %2671 = vmatmul.msk.f32.gmra.mxu3 %vm1818_vm8, %v2201_v15  ;;  %v2786_v60 = vpop.eup %2785 }
 0x5e8   :  { %v2204_v25 = vmul.f32 %v2786_v60, %v4288_v4 }
 0x5e9   :  { %2019 = vst.msk [vmem:[%s4425_s9 + $0x30] sm:$0xff] %vm1380_vm2, %v2011_v45 }
 0x5ef   :  { %2672 = vmatmul.msk.f32.gmra.mxu3 %vm1818_vm8, %v2202_v8 }
 0x5f7   :  { %2673 = vmatmul.msk.f32.gmra.mxu3 %vm1818_vm8, %v2203_v2 }
 0x5ff   :  { %2674 = vmatmul.msk.f32.gmra.mxu3 %vm1818_vm8, %v2204_v25 }
 0x615   :  { %v2189_v59 = vpop.xlane.xlu2 %2188 }
 0x616   :  { %2787 = vrcp.f32 %v2189_v59 }
 0x617   :  { %v1993_v52 = vpop.f32.mrf.mxu3 }
 0x618   :  { %v2004_v6 = vmul.f32 %v4304_v7, %v1993_v52 }
 0x61a   :  { %v2012_v49 = vadd.f32 %v2004_v6, %v4014_v36 }
 0x61c   :  { %v2788_v34 = vpop.eup %2787  ;;  %2020 = vst.msk [vmem:[%s4425_s9 + $0x38] sm:$0xff] %vm1380_vm2, %v2012_v49 }
 0x61d   :  { %v2205_v44 = vmul.f32 %v2788_v34, %v4295_v55 }
 0x61f   :  { %2675 = vmatmul.msk.f32.gmra.mxu3 %vm1818_vm8, %v2205_v44 }
 0x62b   :  { %v2271_v4 = vpop.f32.mrf.mxu3 }
 0x62c   :  { %v2295_v13 = vmul.f32 %v2271_v4, %v4304_v7 }
 0x62e   :  { %v2303_v53 = vadd.f32 %v2295_v13, %v3934_v17 }
 0x630   :  { %2311 = vst.msk [vmem:[%s4425_s9 + $0x40] sm:$0xff] %vm1380_vm2, %v2303_v53 }
 0x65a   :  { %v2274_v36 = vpop.f32.mrf.mxu3 }
 0x65b   :  { %v2296_v63 = vmul.f32 %v2274_v36, %v4304_v7 }
 0x65d   :  { %v2304_v28 = vadd.f32 %v2296_v63, %v3936_v38 }
 0x65f   :  { %2312 = vst.msk [vmem:[%s4425_s9 + $0x48] sm:$0xff] %vm1380_vm2, %v2304_v28 }
 0x662   :  { %v2277_v55 = vpop.f32.mrf.mxu3 }
 0x663   :  { %v2297_v1 = vmul.f32 %v2277_v55, %v4304_v7 }
 0x665   :  { %v2305_v17 = vadd.f32 %v2297_v1, %v3938_v54 }
 0x667   :  { %2313 = vst.msk [vmem:[%s4425_s9 + $0x50] sm:$0xff] %vm1380_vm2, %v2305_v17 }
 0x66a   :  { %v2280_v41 = vpop.f32.mrf.mxu3 }
 0x66b   :  { %v2298_v29 = vmul.f32 %v2280_v41, %v4304_v7 }
 0x66d   :  { %v2306_v38 = vadd.f32 %v2298_v29, %v3948_v31 }
 0x66f   :  { %2314 = vst.msk [vmem:[%s4425_s9 + $0x58] sm:$0xff] %vm1380_vm2, %v2306_v38 }
 0x672   :  { %v2283_v24 = vpop.f32.mrf.mxu3 }
 0x673   :  { %v2299_v40 = vmul.f32 %v2283_v24, %v4304_v7 }
 0x675   :  { %v2307_v54 = vadd.f32 %v2299_v40, %v3950_v30 }
 0x677   :  { %2315 = vst.msk [vmem:[%s4425_s9 + $0x60] sm:$0xff] %vm1380_vm2, %v2307_v54 }
 0x67a   :  { %v2286_v22 = vpop.f32.mrf.mxu3 }
 0x67b   :  { %v2300_v18 = vmul.f32 %v2286_v22, %v4304_v7 }
 0x67d   :  { %v2308_v31 = vadd.f32 %v2300_v18, %v3955_v19 }
 0x67f   :  { %2316 = vst.msk [vmem:[%s4425_s9 + $0x68] sm:$0xff] %vm1380_vm2, %v2308_v31 }
 0x682   :  { %v2289_v58 = vpop.f32.mrf.mxu3 }
 0x683   :  { %v2301_v11 = vmul.f32 %v2289_v58, %v4304_v7 }
 0x685   :  { %v2309_v30 = vadd.f32 %v2301_v11, %v3957_v61 }
 0x687   :  { %2317 = vst.msk [vmem:[%s4425_s9 + $0x70] sm:$0xff] %vm1380_vm2, %v2309_v30 }
 0x6a2   :  { %v2292_v10 = vpop.f32.mrf.mxu3 }
 0x6a3   :  { %v2302_v57 = vmul.f32 %v2292_v10, %v4304_v7 }
 0x6a5   :  { %v2310_v19 = vadd.f32 %v2302_v57, %v3946_v23 }
 0x6a7   :  { %2318 = vst.msk [vmem:[%s4425_s9 + $0x78] sm:$0xff] %vm1380_vm2, %v2310_v19 }

</bundles_post_ra>
